<compile_context>
chip_gen: v7x
topology: tpu7x:2x2x1
jax: 0.10.0
libtpu: 0.0.40
codegen_flags: <defaults>
</compile_context>

<pallas_src>
import functools

import numpy as np
import jax
import jax.numpy as jnp
from jax import lax
from jax.experimental import pallas as pl
from jax.experimental.pallas import tpu as pltpu

SHIFTS = (1, 3)
# positions of the "-1" tap of kernel1 relative to the center, per direction
NEG_OFFSETS = ((-1, -1), (-1, 0), (-1, 1), (0, -1))
BN_EPS = 1e-5
_SMALL_C = 8      # at/below this channel count the 1x1 mixes run on the VPU, not the MXU


def _silu(t):
    return t * jax.nn.sigmoid(t)


def _round_up(v, m):
    return (v + m - 1) // m * m


# ------------------------------ host wrapper ------------------------------

def mlc_forward(x, params, *, single_buffer_consts=True):
    """MLC forward. x: (N, C, H, W) float32 (NCHW, like the PyTorch module)."""
    N, C, H, W = x.shape
    HW = H * W
    Ch = C // 2
    Cp = _round_up(C, 8)          # per-tap channel block, padded to the sublane tile
    n_shifts = len(SHIFTS)
    n_dirs = len(NEG_OFFSETS)
    small_c = C <= _SMALL_C

    # ---- fold eval-mode BatchNorm of the two BaseConvs; build 2-D mixing matrices ----
    s1 = params['bn1_gamma'] / jnp.sqrt(params['bn1_var'] + BN_EPS)
    w3t = jnp.transpose(params['w_down3'] * s1, (0, 1, 3, 2)).reshape(9, C, C)   # (tap,co,ci)
    w3p = jnp.pad(w3t, ((0, 0), (0, 0), (0, Cp - C)))                            # (tap,co,Cp)
    w3f = jnp.transpose(w3p, (1, 0, 2)).reshape(C, 9 * Cp).astype(jnp.bfloat16)  # fused taps
    b3 = (params['bn1_beta'] - params['bn1_mean'] * s1).reshape(C, 1)
    wd = params['w_down1'].reshape(1, C)
    bd = params['b_down1'].reshape(1, 1)
    s2 = params['bn2_gamma'] / jnp.sqrt(params['bn2_var'] + BN_EPS)
    wa = jnp.transpose(params['w_out_a'] * s2)                                   # (Ch, C)
    ba = (params['bn2_beta'] - params['bn2_mean'] * s2).reshape(Ch, 1)
    wb = jnp.transpose(params['w_out_b'])                                        # (C, Ch)
    bb = params['b_out_b'].reshape(C, 1)

    # lane-dense layout: flattened spatial axis (H*W) on lanes (unmasked vst when HW%128==0)
    xf = x.reshape(N, C, HW)

    def kernel(x_ref, w3_ref, b3_ref, wd_ref, bd_ref,
               wa_ref, ba_ref, wb_ref, bb_ref, out_ref,
               stack_ref, n1_ref, n2_ref):
        xi = x_ref[0]                                        # (C, HW) f32

        # ---- in-kernel zero-padding masks from a lane iota (no HBM mask traffic).
        #      row/col recovered without integer div/mod (float floor-div is exact here).
        lanef = lax.broadcasted_iota(jnp.int32, (1, HW), 1).astype(jnp.float32)
        rowf = jnp.floor((lanef + 0.5) * (1.0 / W))
        colf = lanef - rowf * W
        mask_cache = {}

        def shift_mask(di, dj):
            if (di, dj) not in mask_cache:
                ok = ((rowf + di >= 0.0) & (rowf + di <= H - 1.0) &
                      (colf + dj >= 0.0) & (colf + dj <= W - 1.0))
                mask_cache[(di, dj)] = ok.astype(jnp.float32)
            return mask_cache[(di, dj)]

        def shifted(v, di, dj):
            """v spatially shifted by (di, dj), zero padded (flattened lane rotate)."""
            if di == 0 and dj == 0:
                return v
            off = di * W + dj
            rolled = pltpu.roll(v, (-off) % HW, axis=1)      # XLU lane rotate
            return rolled * shift_mask(di, dj)               # zero out wrapped lanes

        def mix(w, v):
            """(O, I) x (I, HW) channel mix: f32 VPU MACs at tiny C, bf16 MXU otherwise."""
            if small_c:
                out = w[:, 0:1] * v[0:1, :]
                for ci in range(1, v.shape[0]):
                    out = out + w[:, ci:ci + 1] * v[ci:ci + 1, :]
                return out
            return jnp.dot(w.astype(jnp.bfloat16), v.astype(jnp.bfloat16),
                           preferred_element_type=jnp.float32)

        # ---- down_conv: 3x3 BaseConv (BN folded) as ONE fused bf16 MXU matmul over the
        #      (9*Cp, HW) tap stack, + SiLU, then 1x1 conv C->1 (+bias).
        if Cp != C:
            stack_ref[...] = jnp.zeros_like(stack_ref)       # keep weight-masked pad rows finite
        for kh in range(3):
            for kw in range(3):
                t = kh * 3 + kw
                stack_ref[pl.ds(t * Cp, C), :] = shifted(xi, kh - 1, kw - 1)
        acc = jnp.dot(w3_ref[...], stack_ref[...].astype(jnp.bfloat16),
                      preferred_element_type=jnp.float32) + b3_ref[...]
        h = _silu(acc)                                       # (C, HW)
        d = mix(wd_ref[...], h) + bd_ref[...]                # (1, HW)

        # ---- MPCM directional contrasts, sublane-packed: min over directions,
        #      (max + mean)/2 over shifts, relu, sigmoid -> local attention mask.
        for si, s in enumerate(SHIFTS):
            for k, (di, dj) in enumerate(NEG_OFFSETS):
                r = si * n_dirs + k
                n1_ref[pl.ds(r, 1), :] = shifted(d, di * s, dj * s)
                n2_ref[pl.ds(r, 1), :] = shifted(d, -di * s, -dj * s)
        per_shift = []
        for si in range(n_shifts):
            b1 = n1_ref[pl.ds(si * n_dirs, n_dirs), :]       # (4, HW) packed
            b2 = n2_ref[pl.ds(si * n_dirs, n_dirs), :]
            prod = (d - b1) * (d - b2)                       # full-vreg VPU work
            per_shift.append(jnp.min(prod, axis=0, keepdims=True))
        mx = per_shift[0]
        tot = per_shift[0]
        for t in per_shift[1:]:
            mx = jnp.maximum(mx, t)
            tot = tot + t
        comb = (mx + tot * (1.0 / n_shifts)) * 0.5
        local_mask = jax.nn.sigmoid(jnp.maximum(comb, 0.0))  # (1, HW)

        # ---- out_conv (1x1 BaseConv BN-folded + SiLU, 1x1 + bias + sigmoid) + residual
        y = local_mask * xi                                  # (C, HW)
        h1 = _silu(mix(wa_ref[...], y) + ba_ref[...])        # (Ch, HW)
        om = jax.nn.sigmoid(mix(wb_ref[...], h1) + bb_ref[...])
        out_ref[0] = xi * (om + 1.0)                         # out_mask * x + x

    def const_spec(a):
        zeros = (0,) * a.ndim
        kwargs = {}
        if single_buffer_consts:
            # constant block index -> one VMEM buffer is enough (halves weight VMEM)
            kwargs['pipeline_mode'] = pl.Buffered(1)
        return pl.BlockSpec(a.shape, lambda n, _z=zeros: _z, **kwargs)

    consts = (w3f, b3, wd, bd, wa, ba, wb, bb)
    out = pl.pallas_call(
        kernel,
        out_shape=jax.ShapeDtypeStruct((N, C, HW), jnp.float32),
        grid=(N,),
        in_specs=[pl.BlockSpec((1, C, HW), lambda n: (n, 0, 0))]
                 + [const_spec(c) for c in consts],
        out_specs=pl.BlockSpec((1, C, HW), lambda n: (n, 0, 0)),
        scratch_shapes=[
            pltpu.VMEM((9 * Cp, HW), jnp.float32),             # fused 3x3 tap stack
            pltpu.VMEM((n_shifts * n_dirs, HW), jnp.float32),  # MPCM neighbours (+dir)
            pltpu.VMEM((n_shifts * n_dirs, HW), jnp.float32),  # MPCM neighbours (-dir)
        ],
        compiler_params=pltpu.CompilerParams(
            dimension_semantics=("parallel",)),
    )(xf, *consts)
    return out.reshape(N, C, H, W)


# --------------------------- pure-JAX reference ---------------------------

def mlc_reference(x, params):
    def conv(inp, w_oihw, padding=0, dilation=1, bias=None):
        out = lax.conv_general_dilated(
            inp, w_oihw, window_strides=(1, 1),
            padding=((padding, padding), (padding, padding)),
            rhs_dilation=(dilation, dilation),
            dimension_numbers=('NCHW', 'OIHW', 'NCHW'),
            precision=lax.Precision.HIGHEST)
        if bias is not None:
            out = out + bias.reshape(1, -1, 1, 1)
        return out

    def bn(t, g, b, m, v):
        rs = lambda a: a.reshape(1, -1, 1, 1)
        return (t - rs(m)) / jnp.sqrt(rs(v) + BN_EPS) * rs(g) + rs(b)

    C = x.shape[1]
    # down_conv
    w3_oihw = jnp.transpose(params['w_down3'], (3, 2, 0, 1))
    d = _silu(bn(conv(x, w3_oihw, padding=1),
                 params['bn1_gamma'], params['bn1_beta'],
                 params['bn1_mean'], params['bn1_var']))
    d = conv(d, params['w_down1'].reshape(1, C, 1, 1), bias=params['b_down1'])
    # MPCM directional contrasts (kernel1 / kernel2 from the PyTorch module)
    w1 = np.array([[[-1, 0, 0], [0, 1, 0], [0, 0, 0]],
                   [[0, -1, 0], [0, 1, 0], [0, 0, 0]],
                   [[0, 0, -1], [0, 1, 0], [0, 0, 0]],
                   [[0, 0, 0], [-1, 1, 0], [0, 0, 0]]],
                  dtype=np.float32).reshape(4, 1, 3, 3)
    w2 = w1[:, :, ::-1, ::-1].copy()
    k1, k2 = jnp.asarray(w1), jnp.asarray(w2)
    outs = []
    for s in SHIFTS:
        o = conv(d, k1, padding=s, dilation=s) * conv(d, k2, padding=s, dilation=s)
        outs.append(jnp.min(o, axis=1, keepdims=True))
    st = jnp.stack(outs, axis=-1)
    comb = (jnp.max(st, axis=-1) + jnp.mean(st, axis=-1)) * 0.5
    local_mask = jax.nn.sigmoid(jax.nn.relu(comb))
    # out_conv
    y = local_mask * x
    wa_oihw = jnp.transpose(params['w_out_a'])[:, :, None, None]     # (Ch, C, 1, 1)
    h = _silu(bn(conv(y, wa_oihw),
                 params['bn2_gamma'], params['bn2_beta'],
                 params['bn2_mean'], params['bn2_var']))
    wb_oihw = jnp.transpose(params['w_out_b'])[:, :, None, None]     # (C, Ch, 1, 1)
    out_mask = jax.nn.sigmoid(conv(h, wb_oihw, bias=params['b_out_b']))
    return out_mask * x + x


# --------------------------------- main ------------------------------------

def make_params(key, C):
    Ch = C // 2
    ks = jax.random.split(key, 14)
    return {
        'w_down3':   0.25 * jax.random.normal(ks[0], (3, 3, C, C), jnp.float32),
        'bn1_gamma': 1.0 + 0.1 * jax.random.normal(ks[1], (C,), jnp.float32),
        'bn1_beta':  0.1 * jax.random.normal(ks[2], (C,), jnp.float32),
        'bn1_mean':  0.1 * jax.random.normal(ks[3], (C,), jnp.float32),
        'bn1_var':   1.0 + 0.1 * jax.random.uniform(ks[4], (C,), jnp.float32),
        'w_down1':   0.25 * jax.random.normal(ks[5], (C,), jnp.float32),
        'b_down1':   0.1 * jax.random.normal(ks[6], (1,), jnp.float32),
        'w_out_a':   0.25 * jax.random.normal(ks[7], (C, Ch), jnp.float32),
        'bn2_gamma': 1.0 + 0.1 * jax.random.normal(ks[8], (Ch,), jnp.float32),
        'bn2_beta':  0.1 * jax.random.normal(ks[9], (Ch,), jnp.float32),
        'bn2_mean':  0.1 * jax.random.normal(ks[10], (Ch,), jnp.float32),
        'bn2_var':   1.0 + 0.1 * jax.random.uniform(ks[11], (Ch,), jnp.float32),
        'w_out_b':   0.25 * jax.random.normal(ks[12], (Ch, C), jnp.float32),
        'b_out_b':   0.1 * jax.random.normal(ks[13], (C,), jnp.float32),
    }


if __name__ == "__main__":
    # cen: (batch, in_channels, H, W); in_channels=4, scale/i unused in forward.
    N, C, H, W = 2, 4, 16, 16
    key = jax.random.PRNGKey(0)
    kx, kp = jax.random.split(key)
    x = jax.random.normal(kx, (N, C, H, W), jnp.float32)
    params = make_params(kp, C)

    fwd_sb = jax.jit(functools.partial(mlc_forward, single_buffer_consts=True))
    fwd_db = jax.jit(functools.partial(mlc_forward, single_buffer_consts=False))
    try:
        out = jax.block_until_ready(fwd_sb(x, params))
    except Exception:
        # pl.Buffered(1) not supported by this jax build -> default double-buffered consts
        out = jax.block_until_ready(fwd_db(x, params))

    ref = mlc_reference(x, params)
    # bf16 MXU operands (f32 accumulation) for the 3x3 conv vs. HIGHEST-precision f32
    # XLA convs in the reference -> allow ~1e-2 relative slack.
    np.testing.assert_allclose(np.asarray(out), np.asarray(ref), rtol=2e-2, atol=2e-2)
    print("KERNEL_OK")
</pallas_src>

<mosaic_0001>
module attributes {stable_mosaic.version = 11 : i64} {
  func.func @kernel(%arg0: i32, %arg1: memref<1x4x256xf32, #tpu.memory_space<vmem>>, %arg2: memref<4x72xbf16, #tpu.memory_space<vmem>>, %arg3: memref<4x1xf32, #tpu.memory_space<vmem>>, %arg4: memref<1x4xf32, #tpu.memory_space<vmem>>, %arg5: memref<1x1xf32, #tpu.memory_space<vmem>>, %arg6: memref<2x4xf32, #tpu.memory_space<vmem>>, %arg7: memref<2x1xf32, #tpu.memory_space<vmem>>, %arg8: memref<4x2xf32, #tpu.memory_space<vmem>>, %arg9: memref<4x1xf32, #tpu.memory_space<vmem>>, %arg10: memref<1x4x256xf32, #tpu.memory_space<vmem>>, %arg11: memref<72x256xf32, #tpu.memory_space<vmem>>, %arg12: memref<8x256xf32, #tpu.memory_space<vmem>>, %arg13: memref<8x256xf32, #tpu.memory_space<vmem>>) attributes {dimension_semantics = [#tpu.dimension_semantics<parallel>], iteration_bounds = array<i64: 2>, scalar_prefetch = 0 : i64, scratch_operands = 3 : i64, tpu.core_type = #tpu.core_type<tc>, window_params = [{transform_indices = @transform_0, window_bounds = array<i64: 1, 4, 256>}, {pipeline_mode = #tpu.pipeline_mode<synchronous>, transform_indices = @transform_1, window_bounds = array<i64: 4, 72>}, {pipeline_mode = #tpu.pipeline_mode<synchronous>, transform_indices = @transform_2, window_bounds = array<i64: 4, 1>}, {pipeline_mode = #tpu.pipeline_mode<synchronous>, transform_indices = @transform_3, window_bounds = array<i64: 1, 4>}, {pipeline_mode = #tpu.pipeline_mode<synchronous>, transform_indices = @transform_4, window_bounds = array<i64: 1, 1>}, {pipeline_mode = #tpu.pipeline_mode<synchronous>, transform_indices = @transform_5, window_bounds = array<i64: 2, 4>}, {pipeline_mode = #tpu.pipeline_mode<synchronous>, transform_indices = @transform_6, window_bounds = array<i64: 2, 1>}, {pipeline_mode = #tpu.pipeline_mode<synchronous>, transform_indices = @transform_7, window_bounds = array<i64: 4, 2>}, {pipeline_mode = #tpu.pipeline_mode<synchronous>, transform_indices = @transform_8, window_bounds = array<i64: 4, 1>}, {transform_indices = @transform_9, window_bounds = array<i64: 1, 4, 256>}]} {
    %c0 = arith.constant 0 : index
    %c0_0 = arith.constant 0 : index
    %c0_1 = arith.constant 0 : index
    %0 = vector.load %arg1[%c0, %c0_0, %c0_1] : memref<1x4x256xf32, #tpu.memory_space<vmem>>, vector<1x4x256xf32>
    %1 = vector.shape_cast %0 : vector<1x4x256xf32> to vector<4x256xf32>
    %2 = tpu.iota {dimensions = array<i32: 1>} : vector<1x256xi32>
    %3 = arith.sitofp %2 : vector<1x256xi32> to vector<1x256xf32>
    %cst = arith.constant 5.000000e-01 : f32
    %4 = vector.broadcast %cst : f32 to vector<1x256xf32>
    %5 = arith.addf %3, %4 : vector<1x256xf32>
    %cst_2 = arith.constant 6.250000e-02 : f32
    %6 = vector.broadcast %cst_2 : f32 to vector<1x256xf32>
    %7 = arith.mulf %5, %6 : vector<1x256xf32>
    %8 = math.floor %7 : vector<1x256xf32>
    %cst_3 = arith.constant 1.600000e+01 : f32
    %9 = vector.broadcast %cst_3 : f32 to vector<1x256xf32>
    %10 = arith.mulf %8, %9 : vector<1x256xf32>
    %11 = arith.subf %3, %10 : vector<1x256xf32>
    %cst_4 = arith.constant 0.000000e+00 : f32
    %12 = vector.broadcast %cst_4 : f32 to vector<72x256xf32>
    %c0_5 = arith.constant 0 : index
    %c0_6 = arith.constant 0 : index
    %13 = vector.load %arg11[%c0_5, %c0_6] : memref<72x256xf32, #tpu.memory_space<vmem>>, vector<72x256xf32>
    tpu.vector_store %arg11[%c0_5, %c0_6], %12 {strides = array<i32>} : memref<72x256xf32, #tpu.memory_space<vmem>>, vector<72x256xf32>,
    %c17_i32 = arith.constant 17 : i32
    %14 = tpu.dynamic_rotate %1 by %c17_i32 dim 1 : vector<4x256xf32>, i32 -> vector<4x256xf32>
    %cst_7 = arith.constant -1.000000e+00 : f32
    %15 = vector.broadcast %cst_7 : f32 to vector<1x256xf32>
    %16 = arith.addf %8, %15 : vector<1x256xf32>
    %cst_8 = arith.constant 0.000000e+00 : f32
    %17 = vector.broadcast %cst_8 : f32 to vector<1x256xf32>
    %18 = arith.cmpf oge, %16, %17 : vector<1x256xf32>
    %cst_9 = arith.constant -1.000000e+00 : f32
    %19 = vector.broadcast %cst_9 : f32 to vector<1x256xf32>
    %20 = arith.addf %8, %19 : vector<1x256xf32>
    %cst_10 = arith.constant 1.500000e+01 : f32
    %21 = vector.broadcast %cst_10 : f32 to vector<1x256xf32>
    %22 = arith.cmpf ole, %20, %21 : vector<1x256xf32>
    %23 = arith.andi %18, %22 : vector<1x256xi1>
    %cst_11 = arith.constant -1.000000e+00 : f32
    %24 = vector.broadcast %cst_11 : f32 to vector<1x256xf32>
    %25 = arith.addf %11, %24 : vector<1x256xf32>
    %cst_12 = arith.constant 0.000000e+00 : f32
    %26 = vector.broadcast %cst_12 : f32 to vector<1x256xf32>
    %27 = arith.cmpf oge, %25, %26 : vector<1x256xf32>
    %28 = arith.andi %23, %27 : vector<1x256xi1>
    %cst_13 = arith.constant -1.000000e+00 : f32
    %29 = vector.broadcast %cst_13 : f32 to vector<1x256xf32>
    %30 = arith.addf %11, %29 : vector<1x256xf32>
    %cst_14 = arith.constant 1.500000e+01 : f32
    %31 = vector.broadcast %cst_14 : f32 to vector<1x256xf32>
    %32 = arith.cmpf ole, %30, %31 : vector<1x256xf32>
    %33 = arith.andi %28, %32 : vector<1x256xi1>
    %34 = arith.extui %33 : vector<1x256xi1> to vector<1x256xi32>
    %35 = arith.sitofp %34 : vector<1x256xi32> to vector<1x256xf32>
    %36 = vector.broadcast %35 : vector<1x256xf32> to vector<4x256xf32>
    %37 = arith.mulf %14, %36 : vector<4x256xf32>
    %c0_15 = arith.constant 0 : index
    %c0_16 = arith.constant 0 : index
    %38 = vector.load %arg11[%c0_15, %c0_16] : memref<72x256xf32, #tpu.memory_space<vmem>>, vector<4x256xf32>
    tpu.vector_store %arg11[%c0_15, %c0_16], %37 {strides = array<i32>} : memref<72x256xf32, #tpu.memory_space<vmem>>, vector<4x256xf32>,
    %c16_i32 = arith.constant 16 : i32
    %39 = tpu.dynamic_rotate %1 by %c16_i32 dim 1 : vector<4x256xf32>, i32 -> vector<4x256xf32>
    %cst_17 = arith.constant -1.000000e+00 : f32
    %40 = vector.broadcast %cst_17 : f32 to vector<1x256xf32>
    %41 = arith.addf %8, %40 : vector<1x256xf32>
    %cst_18 = arith.constant 0.000000e+00 : f32
    %42 = vector.broadcast %cst_18 : f32 to vector<1x256xf32>
    %43 = arith.cmpf oge, %41, %42 : vector<1x256xf32>
    %cst_19 = arith.constant -1.000000e+00 : f32
    %44 = vector.broadcast %cst_19 : f32 to vector<1x256xf32>
    %45 = arith.addf %8, %44 : vector<1x256xf32>
    %cst_20 = arith.constant 1.500000e+01 : f32
    %46 = vector.broadcast %cst_20 : f32 to vector<1x256xf32>
    %47 = arith.cmpf ole, %45, %46 : vector<1x256xf32>
    %48 = arith.andi %43, %47 : vector<1x256xi1>
    %cst_21 = arith.constant 0.000000e+00 : f32
    %49 = vector.broadcast %cst_21 : f32 to vector<1x256xf32>
    %50 = arith.addf %11, %49 : vector<1x256xf32>
    %cst_22 = arith.constant 0.000000e+00 : f32
    %51 = vector.broadcast %cst_22 : f32 to vector<1x256xf32>
    %52 = arith.cmpf oge, %50, %51 : vector<1x256xf32>
    %53 = arith.andi %48, %52 : vector<1x256xi1>
    %cst_23 = arith.constant 0.000000e+00 : f32
    %54 = vector.broadcast %cst_23 : f32 to vector<1x256xf32>
    %55 = arith.addf %11, %54 : vector<1x256xf32>
    %cst_24 = arith.constant 1.500000e+01 : f32
    %56 = vector.broadcast %cst_24 : f32 to vector<1x256xf32>
    %57 = arith.cmpf ole, %55, %56 : vector<1x256xf32>
    %58 = arith.andi %53, %57 : vector<1x256xi1>
    %59 = arith.extui %58 : vector<1x256xi1> to vector<1x256xi32>
    %60 = arith.sitofp %59 : vector<1x256xi32> to vector<1x256xf32>
    %61 = vector.broadcast %60 : vector<1x256xf32> to vector<4x256xf32>
    %62 = arith.mulf %39, %61 : vector<4x256xf32>
    %c8 = arith.constant 8 : index
    %c0_25 = arith.constant 0 : index
    %63 = vector.load %arg11[%c8, %c0_25] : memref<72x256xf32, #tpu.memory_space<vmem>>, vector<4x256xf32>
    tpu.vector_store %arg11[%c8, %c0_25], %62 {strides = array<i32>} : memref<72x256xf32, #tpu.memory_space<vmem>>, vector<4x256xf32>,
    %c15_i32 = arith.constant 15 : i32
    %64 = tpu.dynamic_rotate %1 by %c15_i32 dim 1 : vector<4x256xf32>, i32 -> vector<4x256xf32>
    %cst_26 = arith.constant -1.000000e+00 : f32
    %65 = vector.broadcast %cst_26 : f32 to vector<1x256xf32>
    %66 = arith.addf %8, %65 : vector<1x256xf32>
    %cst_27 = arith.constant 0.000000e+00 : f32
    %67 = vector.broadcast %cst_27 : f32 to vector<1x256xf32>
    %68 = arith.cmpf oge, %66, %67 : vector<1x256xf32>
    %cst_28 = arith.constant -1.000000e+00 : f32
    %69 = vector.broadcast %cst_28 : f32 to vector<1x256xf32>
    %70 = arith.addf %8, %69 : vector<1x256xf32>
    %cst_29 = arith.constant 1.500000e+01 : f32
    %71 = vector.broadcast %cst_29 : f32 to vector<1x256xf32>
    %72 = arith.cmpf ole, %70, %71 : vector<1x256xf32>
    %73 = arith.andi %68, %72 : vector<1x256xi1>
    %cst_30 = arith.constant 1.000000e+00 : f32
    %74 = vector.broadcast %cst_30 : f32 to vector<1x256xf32>
    %75 = arith.addf %11, %74 : vector<1x256xf32>
    %cst_31 = arith.constant 0.000000e+00 : f32
    %76 = vector.broadcast %cst_31 : f32 to vector<1x256xf32>
    %77 = arith.cmpf oge, %75, %76 : vector<1x256xf32>
    %78 = arith.andi %73, %77 : vector<1x256xi1>
    %cst_32 = arith.constant 1.000000e+00 : f32
    %79 = vector.broadcast %cst_32 : f32 to vector<1x256xf32>
    %80 = arith.addf %11, %79 : vector<1x256xf32>
    %cst_33 = arith.constant 1.500000e+01 : f32
    %81 = vector.broadcast %cst_33 : f32 to vector<1x256xf32>
    %82 = arith.cmpf ole, %80, %81 : vector<1x256xf32>
    %83 = arith.andi %78, %82 : vector<1x256xi1>
    %84 = arith.extui %83 : vector<1x256xi1> to vector<1x256xi32>
    %85 = arith.sitofp %84 : vector<1x256xi32> to vector<1x256xf32>
    %86 = vector.broadcast %85 : vector<1x256xf32> to vector<4x256xf32>
    %87 = arith.mulf %64, %86 : vector<4x256xf32>
    %c16 = arith.constant 16 : index
    %c0_34 = arith.constant 0 : index
    %88 = vector.load %arg11[%c16, %c0_34] : memref<72x256xf32, #tpu.memory_space<vmem>>, vector<4x256xf32>
    tpu.vector_store %arg11[%c16, %c0_34], %87 {strides = array<i32>} : memref<72x256xf32, #tpu.memory_space<vmem>>, vector<4x256xf32>,
    %c1_i32 = arith.constant 1 : i32
    %89 = tpu.dynamic_rotate %1 by %c1_i32 dim 1 : vector<4x256xf32>, i32 -> vector<4x256xf32>
    %cst_35 = arith.constant 0.000000e+00 : f32
    %90 = vector.broadcast %cst_35 : f32 to vector<1x256xf32>
    %91 = arith.addf %8, %90 : vector<1x256xf32>
    %cst_36 = arith.constant 0.000000e+00 : f32
    %92 = vector.broadcast %cst_36 : f32 to vector<1x256xf32>
    %93 = arith.cmpf oge, %91, %92 : vector<1x256xf32>
    %cst_37 = arith.constant 0.000000e+00 : f32
    %94 = vector.broadcast %cst_37 : f32 to vector<1x256xf32>
    %95 = arith.addf %8, %94 : vector<1x256xf32>
    %cst_38 = arith.constant 1.500000e+01 : f32
    %96 = vector.broadcast %cst_38 : f32 to vector<1x256xf32>
    %97 = arith.cmpf ole, %95, %96 : vector<1x256xf32>
    %98 = arith.andi %93, %97 : vector<1x256xi1>
    %cst_39 = arith.constant -1.000000e+00 : f32
    %99 = vector.broadcast %cst_39 : f32 to vector<1x256xf32>
    %100 = arith.addf %11, %99 : vector<1x256xf32>
    %cst_40 = arith.constant 0.000000e+00 : f32
    %101 = vector.broadcast %cst_40 : f32 to vector<1x256xf32>
    %102 = arith.cmpf oge, %100, %101 : vector<1x256xf32>
    %103 = arith.andi %98, %102 : vector<1x256xi1>
    %cst_41 = arith.constant -1.000000e+00 : f32
    %104 = vector.broadcast %cst_41 : f32 to vector<1x256xf32>
    %105 = arith.addf %11, %104 : vector<1x256xf32>
    %cst_42 = arith.constant 1.500000e+01 : f32
    %106 = vector.broadcast %cst_42 : f32 to vector<1x256xf32>
    %107 = arith.cmpf ole, %105, %106 : vector<1x256xf32>
    %108 = arith.andi %103, %107 : vector<1x256xi1>
    %109 = arith.extui %108 : vector<1x256xi1> to vector<1x256xi32>
    %110 = arith.sitofp %109 : vector<1x256xi32> to vector<1x256xf32>
    %111 = vector.broadcast %110 : vector<1x256xf32> to vector<4x256xf32>
    %112 = arith.mulf %89, %111 : vector<4x256xf32>
    %c24 = arith.constant 24 : index
    %c0_43 = arith.constant 0 : index
    %113 = vector.load %arg11[%c24, %c0_43] : memref<72x256xf32, #tpu.memory_space<vmem>>, vector<4x256xf32>
    tpu.vector_store %arg11[%c24, %c0_43], %112 {strides = array<i32>} : memref<72x256xf32, #tpu.memory_space<vmem>>, vector<4x256xf32>,
    %c32 = arith.constant 32 : index
    %c0_44 = arith.constant 0 : index
    %114 = vector.load %arg11[%c32, %c0_44] : memref<72x256xf32, #tpu.memory_space<vmem>>, vector<4x256xf32>
    tpu.vector_store %arg11[%c32, %c0_44], %1 {strides = array<i32>} : memref<72x256xf32, #tpu.memory_space<vmem>>, vector<4x256xf32>,
    %c255_i32 = arith.constant 255 : i32
    %115 = tpu.dynamic_rotate %1 by %c255_i32 dim 1 : vector<4x256xf32>, i32 -> vector<4x256xf32>
    %cst_45 = arith.constant 0.000000e+00 : f32
    %116 = vector.broadcast %cst_45 : f32 to vector<1x256xf32>
    %117 = arith.addf %8, %116 : vector<1x256xf32>
    %cst_46 = arith.constant 0.000000e+00 : f32
    %118 = vector.broadcast %cst_46 : f32 to vector<1x256xf32>
    %119 = arith.cmpf oge, %117, %118 : vector<1x256xf32>
    %cst_47 = arith.constant 0.000000e+00 : f32
    %120 = vector.broadcast %cst_47 : f32 to vector<1x256xf32>
    %121 = arith.addf %8, %120 : vector<1x256xf32>
    %cst_48 = arith.constant 1.500000e+01 : f32
    %122 = vector.broadcast %cst_48 : f32 to vector<1x256xf32>
    %123 = arith.cmpf ole, %121, %122 : vector<1x256xf32>
    %124 = arith.andi %119, %123 : vector<1x256xi1>
    %cst_49 = arith.constant 1.000000e+00 : f32
    %125 = vector.broadcast %cst_49 : f32 to vector<1x256xf32>
    %126 = arith.addf %11, %125 : vector<1x256xf32>
    %cst_50 = arith.constant 0.000000e+00 : f32
    %127 = vector.broadcast %cst_50 : f32 to vector<1x256xf32>
    %128 = arith.cmpf oge, %126, %127 : vector<1x256xf32>
    %129 = arith.andi %124, %128 : vector<1x256xi1>
    %cst_51 = arith.constant 1.000000e+00 : f32
    %130 = vector.broadcast %cst_51 : f32 to vector<1x256xf32>
    %131 = arith.addf %11, %130 : vector<1x256xf32>
    %cst_52 = arith.constant 1.500000e+01 : f32
    %132 = vector.broadcast %cst_52 : f32 to vector<1x256xf32>
    %133 = arith.cmpf ole, %131, %132 : vector<1x256xf32>
    %134 = arith.andi %129, %133 : vector<1x256xi1>
    %135 = arith.extui %134 : vector<1x256xi1> to vector<1x256xi32>
    %136 = arith.sitofp %135 : vector<1x256xi32> to vector<1x256xf32>
    %137 = vector.broadcast %136 : vector<1x256xf32> to vector<4x256xf32>
    %138 = arith.mulf %115, %137 : vector<4x256xf32>
    %c40 = arith.constant 40 : index
    %c0_53 = arith.constant 0 : index
    %139 = vector.load %arg11[%c40, %c0_53] : memref<72x256xf32, #tpu.memory_space<vmem>>, vector<4x256xf32>
    tpu.vector_store %arg11[%c40, %c0_53], %138 {strides = array<i32>} : memref<72x256xf32, #tpu.memory_space<vmem>>, vector<4x256xf32>,
    %c241_i32 = arith.constant 241 : i32
    %140 = tpu.dynamic_rotate %1 by %c241_i32 dim 1 : vector<4x256xf32>, i32 -> vector<4x256xf32>
    %cst_54 = arith.constant 1.000000e+00 : f32
    %141 = vector.broadcast %cst_54 : f32 to vector<1x256xf32>
    %142 = arith.addf %8, %141 : vector<1x256xf32>
    %cst_55 = arith.constant 0.000000e+00 : f32
    %143 = vector.broadcast %cst_55 : f32 to vector<1x256xf32>
    %144 = arith.cmpf oge, %142, %143 : vector<1x256xf32>
    %cst_56 = arith.constant 1.000000e+00 : f32
    %145 = vector.broadcast %cst_56 : f32 to vector<1x256xf32>
    %146 = arith.addf %8, %145 : vector<1x256xf32>
    %cst_57 = arith.constant 1.500000e+01 : f32
    %147 = vector.broadcast %cst_57 : f32 to vector<1x256xf32>
    %148 = arith.cmpf ole, %146, %147 : vector<1x256xf32>
    %149 = arith.andi %144, %148 : vector<1x256xi1>
    %cst_58 = arith.constant -1.000000e+00 : f32
    %150 = vector.broadcast %cst_58 : f32 to vector<1x256xf32>
    %151 = arith.addf %11, %150 : vector<1x256xf32>
    %cst_59 = arith.constant 0.000000e+00 : f32
    %152 = vector.broadcast %cst_59 : f32 to vector<1x256xf32>
    %153 = arith.cmpf oge, %151, %152 : vector<1x256xf32>
    %154 = arith.andi %149, %153 : vector<1x256xi1>
    %cst_60 = arith.constant -1.000000e+00 : f32
    %155 = vector.broadcast %cst_60 : f32 to vector<1x256xf32>
    %156 = arith.addf %11, %155 : vector<1x256xf32>
    %cst_61 = arith.constant 1.500000e+01 : f32
    %157 = vector.broadcast %cst_61 : f32 to vector<1x256xf32>
    %158 = arith.cmpf ole, %156, %157 : vector<1x256xf32>
    %159 = arith.andi %154, %158 : vector<1x256xi1>
    %160 = arith.extui %159 : vector<1x256xi1> to vector<1x256xi32>
    %161 = arith.sitofp %160 : vector<1x256xi32> to vector<1x256xf32>
    %162 = vector.broadcast %161 : vector<1x256xf32> to vector<4x256xf32>
    %163 = arith.mulf %140, %162 : vector<4x256xf32>
    %c48 = arith.constant 48 : index
    %c0_62 = arith.constant 0 : index
    %164 = vector.load %arg11[%c48, %c0_62] : memref<72x256xf32, #tpu.memory_space<vmem>>, vector<4x256xf32>
    tpu.vector_store %arg11[%c48, %c0_62], %163 {strides = array<i32>} : memref<72x256xf32, #tpu.memory_space<vmem>>, vector<4x256xf32>,
    %c240_i32 = arith.constant 240 : i32
    %165 = tpu.dynamic_rotate %1 by %c240_i32 dim 1 : vector<4x256xf32>, i32 -> vector<4x256xf32>
    %cst_63 = arith.constant 1.000000e+00 : f32
    %166 = vector.broadcast %cst_63 : f32 to vector<1x256xf32>
    %167 = arith.addf %8, %166 : vector<1x256xf32>
    %cst_64 = arith.constant 0.000000e+00 : f32
    %168 = vector.broadcast %cst_64 : f32 to vector<1x256xf32>
    %169 = arith.cmpf oge, %167, %168 : vector<1x256xf32>
    %cst_65 = arith.constant 1.000000e+00 : f32
    %170 = vector.broadcast %cst_65 : f32 to vector<1x256xf32>
    %171 = arith.addf %8, %170 : vector<1x256xf32>
    %cst_66 = arith.constant 1.500000e+01 : f32
    %172 = vector.broadcast %cst_66 : f32 to vector<1x256xf32>
    %173 = arith.cmpf ole, %171, %172 : vector<1x256xf32>
    %174 = arith.andi %169, %173 : vector<1x256xi1>
    %cst_67 = arith.constant 0.000000e+00 : f32
    %175 = vector.broadcast %cst_67 : f32 to vector<1x256xf32>
    %176 = arith.addf %11, %175 : vector<1x256xf32>
    %cst_68 = arith.constant 0.000000e+00 : f32
    %177 = vector.broadcast %cst_68 : f32 to vector<1x256xf32>
    %178 = arith.cmpf oge, %176, %177 : vector<1x256xf32>
    %179 = arith.andi %174, %178 : vector<1x256xi1>
    %cst_69 = arith.constant 0.000000e+00 : f32
    %180 = vector.broadcast %cst_69 : f32 to vector<1x256xf32>
    %181 = arith.addf %11, %180 : vector<1x256xf32>
    %cst_70 = arith.constant 1.500000e+01 : f32
    %182 = vector.broadcast %cst_70 : f32 to vector<1x256xf32>
    %183 = arith.cmpf ole, %181, %182 : vector<1x256xf32>
    %184 = arith.andi %179, %183 : vector<1x256xi1>
    %185 = arith.extui %184 : vector<1x256xi1> to vector<1x256xi32>
    %186 = arith.sitofp %185 : vector<1x256xi32> to vector<1x256xf32>
    %187 = vector.broadcast %186 : vector<1x256xf32> to vector<4x256xf32>
    %188 = arith.mulf %165, %187 : vector<4x256xf32>
    %c56 = arith.constant 56 : index
    %c0_71 = arith.constant 0 : index
    %189 = vector.load %arg11[%c56, %c0_71] : memref<72x256xf32, #tpu.memory_space<vmem>>, vector<4x256xf32>
    tpu.vector_store %arg11[%c56, %c0_71], %188 {strides = array<i32>} : memref<72x256xf32, #tpu.memory_space<vmem>>, vector<4x256xf32>,
    %c239_i32 = arith.constant 239 : i32
    %190 = tpu.dynamic_rotate %1 by %c239_i32 dim 1 : vector<4x256xf32>, i32 -> vector<4x256xf32>
    %cst_72 = arith.constant 1.000000e+00 : f32
    %191 = vector.broadcast %cst_72 : f32 to vector<1x256xf32>
    %192 = arith.addf %8, %191 : vector<1x256xf32>
    %cst_73 = arith.constant 0.000000e+00 : f32
    %193 = vector.broadcast %cst_73 : f32 to vector<1x256xf32>
    %194 = arith.cmpf oge, %192, %193 : vector<1x256xf32>
    %cst_74 = arith.constant 1.000000e+00 : f32
    %195 = vector.broadcast %cst_74 : f32 to vector<1x256xf32>
    %196 = arith.addf %8, %195 : vector<1x256xf32>
    %cst_75 = arith.constant 1.500000e+01 : f32
    %197 = vector.broadcast %cst_75 : f32 to vector<1x256xf32>
    %198 = arith.cmpf ole, %196, %197 : vector<1x256xf32>
    %199 = arith.andi %194, %198 : vector<1x256xi1>
    %cst_76 = arith.constant 1.000000e+00 : f32
    %200 = vector.broadcast %cst_76 : f32 to vector<1x256xf32>
    %201 = arith.addf %11, %200 : vector<1x256xf32>
    %cst_77 = arith.constant 0.000000e+00 : f32
    %202 = vector.broadcast %cst_77 : f32 to vector<1x256xf32>
    %203 = arith.cmpf oge, %201, %202 : vector<1x256xf32>
    %204 = arith.andi %199, %203 : vector<1x256xi1>
    %cst_78 = arith.constant 1.000000e+00 : f32
    %205 = vector.broadcast %cst_78 : f32 to vector<1x256xf32>
    %206 = arith.addf %11, %205 : vector<1x256xf32>
    %cst_79 = arith.constant 1.500000e+01 : f32
    %207 = vector.broadcast %cst_79 : f32 to vector<1x256xf32>
    %208 = arith.cmpf ole, %206, %207 : vector<1x256xf32>
    %209 = arith.andi %204, %208 : vector<1x256xi1>
    %210 = arith.extui %209 : vector<1x256xi1> to vector<1x256xi32>
    %211 = arith.sitofp %210 : vector<1x256xi32> to vector<1x256xf32>
    %212 = vector.broadcast %211 : vector<1x256xf32> to vector<4x256xf32>
    %213 = arith.mulf %190, %212 : vector<4x256xf32>
    %c64 = arith.constant 64 : index
    %c0_80 = arith.constant 0 : index
    %214 = vector.load %arg11[%c64, %c0_80] : memref<72x256xf32, #tpu.memory_space<vmem>>, vector<4x256xf32>
    tpu.vector_store %arg11[%c64, %c0_80], %213 {strides = array<i32>} : memref<72x256xf32, #tpu.memory_space<vmem>>, vector<4x256xf32>,
    %c0_81 = arith.constant 0 : index
    %c0_82 = arith.constant 0 : index
    %215 = vector.load %arg2[%c0_81, %c0_82] : memref<4x72xbf16, #tpu.memory_space<vmem>>, vector<4x72xbf16>
    %c0_83 = arith.constant 0 : index
    %c0_84 = arith.constant 0 : index
    %216 = vector.load %arg11[%c0_83, %c0_84] : memref<72x256xf32, #tpu.memory_space<vmem>>, vector<72x256xf32>
    %217 = arith.truncf %216 : vector<72x256xf32> to vector<72x256xbf16>
    %cst_85 = arith.constant dense<0.000000e+00> : vector<4x256xf32>
    %218 = tpu.matmul %215, %217, %cst_85 {dimension_numbers = #tpu.dot_dimension_numbers<[1], [0], [0], [1], [0, 0, 1, 1], [], []>} : vector<4x72xbf16>, vector<72x256xbf16>, vector<4x256xf32> -> vector<4x256xf32>
    %c0_86 = arith.constant 0 : index
    %c0_87 = arith.constant 0 : index
    %219 = vector.load %arg3[%c0_86, %c0_87] : memref<4x1xf32, #tpu.memory_space<vmem>>, vector<4x1xf32>
    %220 = vector.broadcast %219 : vector<4x1xf32> to vector<4x256xf32>
    %221 = arith.addf %218, %220 : vector<4x256xf32>
    %222 = arith.negf %221 : vector<4x256xf32>
    %223 = math.exp %222 : vector<4x256xf32>
    %cst_88 = arith.constant 1.000000e+00 : f32
    %224 = vector.broadcast %cst_88 : f32 to vector<4x256xf32>
    %225 = arith.addf %224, %223 : vector<4x256xf32>
    %226 = arith.divf %224, %225 : vector<4x256xf32>
    %227 = arith.mulf %221, %226 : vector<4x256xf32>
    %c0_89 = arith.constant 0 : index
    %c0_90 = arith.constant 0 : index
    %228 = vector.load %arg4[%c0_89, %c0_90] : memref<1x4xf32, #tpu.memory_space<vmem>>, vector<1x4xf32>
    %229 = vector.extract_strided_slice %228 {offsets = [0, 0], sizes = [1, 1], strides = [1, 1]} : vector<1x4xf32> to vector<1x1xf32>
    %230 = vector.extract_strided_slice %227 {offsets = [0, 0], sizes = [1, 256], strides = [1, 1]} : vector<4x256xf32> to vector<1x256xf32>
    %231 = vector.broadcast %229 : vector<1x1xf32> to vector<1x256xf32>
    %232 = arith.mulf %231, %230 : vector<1x256xf32>
    %233 = vector.extract_strided_slice %228 {offsets = [0, 1], sizes = [1, 1], strides = [1, 1]} : vector<1x4xf32> to vector<1x1xf32>
    %234 = vector.extract_strided_slice %227 {offsets = [1, 0], sizes = [1, 256], strides = [1, 1]} : vector<4x256xf32> to vector<1x256xf32>
    %235 = vector.broadcast %233 : vector<1x1xf32> to vector<1x256xf32>
    %236 = arith.mulf %235, %234 : vector<1x256xf32>
    %237 = arith.addf %232, %236 : vector<1x256xf32>
    %238 = vector.extract_strided_slice %228 {offsets = [0, 2], sizes = [1, 1], strides = [1, 1]} : vector<1x4xf32> to vector<1x1xf32>
    %239 = vector.extract_strided_slice %227 {offsets = [2, 0], sizes = [1, 256], strides = [1, 1]} : vector<4x256xf32> to vector<1x256xf32>
    %240 = vector.broadcast %238 : vector<1x1xf32> to vector<1x256xf32>
    %241 = arith.mulf %240, %239 : vector<1x256xf32>
    %242 = arith.addf %237, %241 : vector<1x256xf32>
    %243 = vector.extract_strided_slice %228 {offsets = [0, 3], sizes = [1, 1], strides = [1, 1]} : vector<1x4xf32> to vector<1x1xf32>
    %244 = vector.extract_strided_slice %227 {offsets = [3, 0], sizes = [1, 256], strides = [1, 1]} : vector<4x256xf32> to vector<1x256xf32>
    %245 = vector.broadcast %243 : vector<1x1xf32> to vector<1x256xf32>
    %246 = arith.mulf %245, %244 : vector<1x256xf32>
    %247 = arith.addf %242, %246 : vector<1x256xf32>
    %c0_91 = arith.constant 0 : index
    %c0_92 = arith.constant 0 : index
    %248 = vector.load %arg5[%c0_91, %c0_92] : memref<1x1xf32, #tpu.memory_space<vmem>>, vector<1x1xf32>
    %249 = vector.broadcast %248 : vector<1x1xf32> to vector<1x256xf32>
    %250 = arith.addf %247, %249 : vector<1x256xf32>
    %c17_i32_93 = arith.constant 17 : i32
    %251 = tpu.dynamic_rotate %250 by %c17_i32_93 dim 1 : vector<1x256xf32>, i32 -> vector<1x256xf32>
    %252 = arith.mulf %251, %35 : vector<1x256xf32>
    %c0_94 = arith.constant 0 : index
    %c0_95 = arith.constant 0 : index
    %253 = vector.load %arg12[%c0_94, %c0_95] : memref<8x256xf32, #tpu.memory_space<vmem>>, vector<1x256xf32>
    tpu.vector_store %arg12[%c0_94, %c0_95], %252 {strides = array<i32>} : memref<8x256xf32, #tpu.memory_space<vmem>>, vector<1x256xf32>,
    %c239_i32_96 = arith.constant 239 : i32
    %254 = tpu.dynamic_rotate %250 by %c239_i32_96 dim 1 : vector<1x256xf32>, i32 -> vector<1x256xf32>
    %255 = arith.mulf %254, %211 : vector<1x256xf32>
    %c0_97 = arith.constant 0 : index
    %c0_98 = arith.constant 0 : index
    %256 = vector.load %arg13[%c0_97, %c0_98] : memref<8x256xf32, #tpu.memory_space<vmem>>, vector<1x256xf32>
    tpu.vector_store %arg13[%c0_97, %c0_98], %255 {strides = array<i32>} : memref<8x256xf32, #tpu.memory_space<vmem>>, vector<1x256xf32>,
    %c16_i32_99 = arith.constant 16 : i32
    %257 = tpu.dynamic_rotate %250 by %c16_i32_99 dim 1 : vector<1x256xf32>, i32 -> vector<1x256xf32>
    %258 = arith.mulf %257, %60 : vector<1x256xf32>
    %c1 = arith.constant 1 : index
    %c0_100 = arith.constant 0 : index
    %259 = vector.load %arg12[%c1, %c0_100] : memref<8x256xf32, #tpu.memory_space<vmem>>, vector<1x256xf32>
    tpu.vector_store %arg12[%c1, %c0_100], %258 {strides = array<i32>} : memref<8x256xf32, #tpu.memory_space<vmem>>, vector<1x256xf32>,
    %c240_i32_101 = arith.constant 240 : i32
    %260 = tpu.dynamic_rotate %250 by %c240_i32_101 dim 1 : vector<1x256xf32>, i32 -> vector<1x256xf32>
    %261 = arith.mulf %260, %186 : vector<1x256xf32>
    %c1_102 = arith.constant 1 : index
    %c0_103 = arith.constant 0 : index
    %262 = vector.load %arg13[%c1_102, %c0_103] : memref<8x256xf32, #tpu.memory_space<vmem>>, vector<1x256xf32>
    tpu.vector_store %arg13[%c1_102, %c0_103], %261 {strides = array<i32>} : memref<8x256xf32, #tpu.memory_space<vmem>>, vector<1x256xf32>,
    %c15_i32_104 = arith.constant 15 : i32
    %263 = tpu.dynamic_rotate %250 by %c15_i32_104 dim 1 : vector<1x256xf32>, i32 -> vector<1x256xf32>
    %264 = arith.mulf %263, %85 : vector<1x256xf32>
    %c2 = arith.constant 2 : index
    %c0_105 = arith.constant 0 : index
    %265 = vector.load %arg12[%c2, %c0_105] : memref<8x256xf32, #tpu.memory_space<vmem>>, vector<1x256xf32>
    tpu.vector_store %arg12[%c2, %c0_105], %264 {strides = array<i32>} : memref<8x256xf32, #tpu.memory_space<vmem>>, vector<1x256xf32>,
    %c241_i32_106 = arith.constant 241 : i32
    %266 = tpu.dynamic_rotate %250 by %c241_i32_106 dim 1 : vector<1x256xf32>, i32 -> vector<1x256xf32>
    %267 = arith.mulf %266, %161 : vector<1x256xf32>
    %c2_107 = arith.constant 2 : index
    %c0_108 = arith.constant 0 : index
    %268 = vector.load %arg13[%c2_107, %c0_108] : memref<8x256xf32, #tpu.memory_space<vmem>>, vector<1x256xf32>
    tpu.vector_store %arg13[%c2_107, %c0_108], %267 {strides = array<i32>} : memref<8x256xf32, #tpu.memory_space<vmem>>, vector<1x256xf32>,
    %c1_i32_109 = arith.constant 1 : i32
    %269 = tpu.dynamic_rotate %250 by %c1_i32_109 dim 1 : vector<1x256xf32>, i32 -> vector<1x256xf32>
    %270 = arith.mulf %269, %110 : vector<1x256xf32>
    %c3 = arith.constant 3 : index
    %c0_110 = arith.constant 0 : index
    %271 = vector.load %arg12[%c3, %c0_110] : memref<8x256xf32, #tpu.memory_space<vmem>>, vector<1x256xf32>
    tpu.vector_store %arg12[%c3, %c0_110], %270 {strides = array<i32>} : memref<8x256xf32, #tpu.memory_space<vmem>>, vector<1x256xf32>,
    %c255_i32_111 = arith.constant 255 : i32
    %272 = tpu.dynamic_rotate %250 by %c255_i32_111 dim 1 : vector<1x256xf32>, i32 -> vector<1x256xf32>
    %273 = arith.mulf %272, %136 : vector<1x256xf32>
    %c3_112 = arith.constant 3 : index
    %c0_113 = arith.constant 0 : index
    %274 = vector.load %arg13[%c3_112, %c0_113] : memref<8x256xf32, #tpu.memory_space<vmem>>, vector<1x256xf32>
    tpu.vector_store %arg13[%c3_112, %c0_113], %273 {strides = array<i32>} : memref<8x256xf32, #tpu.memory_space<vmem>>, vector<1x256xf32>,
    %c51_i32 = arith.constant 51 : i32
    %275 = tpu.dynamic_rotate %250 by %c51_i32 dim 1 : vector<1x256xf32>, i32 -> vector<1x256xf32>
    %cst_114 = arith.constant -3.000000e+00 : f32
    %276 = vector.broadcast %cst_114 : f32 to vector<1x256xf32>
    %277 = arith.addf %8, %276 : vector<1x256xf32>
    %cst_115 = arith.constant 0.000000e+00 : f32
    %278 = vector.broadcast %cst_115 : f32 to vector<1x256xf32>
    %279 = arith.cmpf oge, %277, %278 : vector<1x256xf32>
    %cst_116 = arith.constant -3.000000e+00 : f32
    %280 = vector.broadcast %cst_116 : f32 to vector<1x256xf32>
    %281 = arith.addf %8, %280 : vector<1x256xf32>
    %cst_117 = arith.constant 1.500000e+01 : f32
    %282 = vector.broadcast %cst_117 : f32 to vector<1x256xf32>
    %283 = arith.cmpf ole, %281, %282 : vector<1x256xf32>
    %284 = arith.andi %279, %283 : vector<1x256xi1>
    %cst_118 = arith.constant -3.000000e+00 : f32
    %285 = vector.broadcast %cst_118 : f32 to vector<1x256xf32>
    %286 = arith.addf %11, %285 : vector<1x256xf32>
    %cst_119 = arith.constant 0.000000e+00 : f32
    %287 = vector.broadcast %cst_119 : f32 to vector<1x256xf32>
    %288 = arith.cmpf oge, %286, %287 : vector<1x256xf32>
    %289 = arith.andi %284, %288 : vector<1x256xi1>
    %cst_120 = arith.constant -3.000000e+00 : f32
    %290 = vector.broadcast %cst_120 : f32 to vector<1x256xf32>
    %291 = arith.addf %11, %290 : vector<1x256xf32>
    %cst_121 = arith.constant 1.500000e+01 : f32
    %292 = vector.broadcast %cst_121 : f32 to vector<1x256xf32>
    %293 = arith.cmpf ole, %291, %292 : vector<1x256xf32>
    %294 = arith.andi %289, %293 : vector<1x256xi1>
    %295 = arith.extui %294 : vector<1x256xi1> to vector<1x256xi32>
    %296 = arith.sitofp %295 : vector<1x256xi32> to vector<1x256xf32>
    %297 = arith.mulf %275, %296 : vector<1x256xf32>
    %c4 = arith.constant 4 : index
    %c0_122 = arith.constant 0 : index
    %298 = vector.load %arg12[%c4, %c0_122] : memref<8x256xf32, #tpu.memory_space<vmem>>, vector<1x256xf32>
    tpu.vector_store %arg12[%c4, %c0_122], %297 {strides = array<i32>} : memref<8x256xf32, #tpu.memory_space<vmem>>, vector<1x256xf32>,
    %c205_i32 = arith.constant 205 : i32
    %299 = tpu.dynamic_rotate %250 by %c205_i32 dim 1 : vector<1x256xf32>, i32 -> vector<1x256xf32>
    %cst_123 = arith.constant 3.000000e+00 : f32
    %300 = vector.broadcast %cst_123 : f32 to vector<1x256xf32>
    %301 = arith.addf %8, %300 : vector<1x256xf32>
    %cst_124 = arith.constant 0.000000e+00 : f32
    %302 = vector.broadcast %cst_124 : f32 to vector<1x256xf32>
    %303 = arith.cmpf oge, %301, %302 : vector<1x256xf32>
    %cst_125 = arith.constant 3.000000e+00 : f32
    %304 = vector.broadcast %cst_125 : f32 to vector<1x256xf32>
    %305 = arith.addf %8, %304 : vector<1x256xf32>
    %cst_126 = arith.constant 1.500000e+01 : f32
    %306 = vector.broadcast %cst_126 : f32 to vector<1x256xf32>
    %307 = arith.cmpf ole, %305, %306 : vector<1x256xf32>
    %308 = arith.andi %303, %307 : vector<1x256xi1>
    %cst_127 = arith.constant 3.000000e+00 : f32
    %309 = vector.broadcast %cst_127 : f32 to vector<1x256xf32>
    %310 = arith.addf %11, %309 : vector<1x256xf32>
    %cst_128 = arith.constant 0.000000e+00 : f32
    %311 = vector.broadcast %cst_128 : f32 to vector<1x256xf32>
    %312 = arith.cmpf oge, %310, %311 : vector<1x256xf32>
    %313 = arith.andi %308, %312 : vector<1x256xi1>
    %cst_129 = arith.constant 3.000000e+00 : f32
    %314 = vector.broadcast %cst_129 : f32 to vector<1x256xf32>
    %315 = arith.addf %11, %314 : vector<1x256xf32>
    %cst_130 = arith.constant 1.500000e+01 : f32
    %316 = vector.broadcast %cst_130 : f32 to vector<1x256xf32>
    %317 = arith.cmpf ole, %315, %316 : vector<1x256xf32>
    %318 = arith.andi %313, %317 : vector<1x256xi1>
    %319 = arith.extui %318 : vector<1x256xi1> to vector<1x256xi32>
    %320 = arith.sitofp %319 : vector<1x256xi32> to vector<1x256xf32>
    %321 = arith.mulf %299, %320 : vector<1x256xf32>
    %c4_131 = arith.constant 4 : index
    %c0_132 = arith.constant 0 : index
    %322 = vector.load %arg13[%c4_131, %c0_132] : memref<8x256xf32, #tpu.memory_space<vmem>>, vector<1x256xf32>
    tpu.vector_store %arg13[%c4_131, %c0_132], %321 {strides = array<i32>} : memref<8x256xf32, #tpu.memory_space<vmem>>, vector<1x256xf32>,
    %c48_i32 = arith.constant 48 : i32
    %323 = tpu.dynamic_rotate %250 by %c48_i32 dim 1 : vector<1x256xf32>, i32 -> vector<1x256xf32>
    %cst_133 = arith.constant -3.000000e+00 : f32
    %324 = vector.broadcast %cst_133 : f32 to vector<1x256xf32>
    %325 = arith.addf %8, %324 : vector<1x256xf32>
    %cst_134 = arith.constant 0.000000e+00 : f32
    %326 = vector.broadcast %cst_134 : f32 to vector<1x256xf32>
    %327 = arith.cmpf oge, %325, %326 : vector<1x256xf32>
    %cst_135 = arith.constant -3.000000e+00 : f32
    %328 = vector.broadcast %cst_135 : f32 to vector<1x256xf32>
    %329 = arith.addf %8, %328 : vector<1x256xf32>
    %cst_136 = arith.constant 1.500000e+01 : f32
    %330 = vector.broadcast %cst_136 : f32 to vector<1x256xf32>
    %331 = arith.cmpf ole, %329, %330 : vector<1x256xf32>
    %332 = arith.andi %327, %331 : vector<1x256xi1>
    %cst_137 = arith.constant 0.000000e+00 : f32
    %333 = vector.broadcast %cst_137 : f32 to vector<1x256xf32>
    %334 = arith.addf %11, %333 : vector<1x256xf32>
    %cst_138 = arith.constant 0.000000e+00 : f32
    %335 = vector.broadcast %cst_138 : f32 to vector<1x256xf32>
    %336 = arith.cmpf oge, %334, %335 : vector<1x256xf32>
    %337 = arith.andi %332, %336 : vector<1x256xi1>
    %cst_139 = arith.constant 0.000000e+00 : f32
    %338 = vector.broadcast %cst_139 : f32 to vector<1x256xf32>
    %339 = arith.addf %11, %338 : vector<1x256xf32>
    %cst_140 = arith.constant 1.500000e+01 : f32
    %340 = vector.broadcast %cst_140 : f32 to vector<1x256xf32>
    %341 = arith.cmpf ole, %339, %340 : vector<1x256xf32>
    %342 = arith.andi %337, %341 : vector<1x256xi1>
    %343 = arith.extui %342 : vector<1x256xi1> to vector<1x256xi32>
    %344 = arith.sitofp %343 : vector<1x256xi32> to vector<1x256xf32>
    %345 = arith.mulf %323, %344 : vector<1x256xf32>
    %c5 = arith.constant 5 : index
    %c0_141 = arith.constant 0 : index
    %346 = vector.load %arg12[%c5, %c0_141] : memref<8x256xf32, #tpu.memory_space<vmem>>, vector<1x256xf32>
    tpu.vector_store %arg12[%c5, %c0_141], %345 {strides = array<i32>} : memref<8x256xf32, #tpu.memory_space<vmem>>, vector<1x256xf32>,
    %c208_i32 = arith.constant 208 : i32
    %347 = tpu.dynamic_rotate %250 by %c208_i32 dim 1 : vector<1x256xf32>, i32 -> vector<1x256xf32>
    %cst_142 = arith.constant 3.000000e+00 : f32
    %348 = vector.broadcast %cst_142 : f32 to vector<1x256xf32>
    %349 = arith.addf %8, %348 : vector<1x256xf32>
    %cst_143 = arith.constant 0.000000e+00 : f32
    %350 = vector.broadcast %cst_143 : f32 to vector<1x256xf32>
    %351 = arith.cmpf oge, %349, %350 : vector<1x256xf32>
    %cst_144 = arith.constant 3.000000e+00 : f32
    %352 = vector.broadcast %cst_144 : f32 to vector<1x256xf32>
    %353 = arith.addf %8, %352 : vector<1x256xf32>
    %cst_145 = arith.constant 1.500000e+01 : f32
    %354 = vector.broadcast %cst_145 : f32 to vector<1x256xf32>
    %355 = arith.cmpf ole, %353, %354 : vector<1x256xf32>
    %356 = arith.andi %351, %355 : vector<1x256xi1>
    %cst_146 = arith.constant 0.000000e+00 : f32
    %357 = vector.broadcast %cst_146 : f32 to vector<1x256xf32>
    %358 = arith.addf %11, %357 : vector<1x256xf32>
    %cst_147 = arith.constant 0.000000e+00 : f32
    %359 = vector.broadcast %cst_147 : f32 to vector<1x256xf32>
    %360 = arith.cmpf oge, %358, %359 : vector<1x256xf32>
    %361 = arith.andi %356, %360 : vector<1x256xi1>
    %cst_148 = arith.constant 0.000000e+00 : f32
    %362 = vector.broadcast %cst_148 : f32 to vector<1x256xf32>
    %363 = arith.addf %11, %362 : vector<1x256xf32>
    %cst_149 = arith.constant 1.500000e+01 : f32
    %364 = vector.broadcast %cst_149 : f32 to vector<1x256xf32>
    %365 = arith.cmpf ole, %363, %364 : vector<1x256xf32>
    %366 = arith.andi %361, %365 : vector<1x256xi1>
    %367 = arith.extui %366 : vector<1x256xi1> to vector<1x256xi32>
    %368 = arith.sitofp %367 : vector<1x256xi32> to vector<1x256xf32>
    %369 = arith.mulf %347, %368 : vector<1x256xf32>
    %c5_150 = arith.constant 5 : index
    %c0_151 = arith.constant 0 : index
    %370 = vector.load %arg13[%c5_150, %c0_151] : memref<8x256xf32, #tpu.memory_space<vmem>>, vector<1x256xf32>
    tpu.vector_store %arg13[%c5_150, %c0_151], %369 {strides = array<i32>} : memref<8x256xf32, #tpu.memory_space<vmem>>, vector<1x256xf32>,
    %c45_i32 = arith.constant 45 : i32
    %371 = tpu.dynamic_rotate %250 by %c45_i32 dim 1 : vector<1x256xf32>, i32 -> vector<1x256xf32>
    %cst_152 = arith.constant -3.000000e+00 : f32
    %372 = vector.broadcast %cst_152 : f32 to vector<1x256xf32>
    %373 = arith.addf %8, %372 : vector<1x256xf32>
    %cst_153 = arith.constant 0.000000e+00 : f32
    %374 = vector.broadcast %cst_153 : f32 to vector<1x256xf32>
    %375 = arith.cmpf oge, %373, %374 : vector<1x256xf32>
    %cst_154 = arith.constant -3.000000e+00 : f32
    %376 = vector.broadcast %cst_154 : f32 to vector<1x256xf32>
    %377 = arith.addf %8, %376 : vector<1x256xf32>
    %cst_155 = arith.constant 1.500000e+01 : f32
    %378 = vector.broadcast %cst_155 : f32 to vector<1x256xf32>
    %379 = arith.cmpf ole, %377, %378 : vector<1x256xf32>
    %380 = arith.andi %375, %379 : vector<1x256xi1>
    %cst_156 = arith.constant 3.000000e+00 : f32
    %381 = vector.broadcast %cst_156 : f32 to vector<1x256xf32>
    %382 = arith.addf %11, %381 : vector<1x256xf32>
    %cst_157 = arith.constant 0.000000e+00 : f32
    %383 = vector.broadcast %cst_157 : f32 to vector<1x256xf32>
    %384 = arith.cmpf oge, %382, %383 : vector<1x256xf32>
    %385 = arith.andi %380, %384 : vector<1x256xi1>
    %cst_158 = arith.constant 3.000000e+00 : f32
    %386 = vector.broadcast %cst_158 : f32 to vector<1x256xf32>
    %387 = arith.addf %11, %386 : vector<1x256xf32>
    %cst_159 = arith.constant 1.500000e+01 : f32
    %388 = vector.broadcast %cst_159 : f32 to vector<1x256xf32>
    %389 = arith.cmpf ole, %387, %388 : vector<1x256xf32>
    %390 = arith.andi %385, %389 : vector<1x256xi1>
    %391 = arith.extui %390 : vector<1x256xi1> to vector<1x256xi32>
    %392 = arith.sitofp %391 : vector<1x256xi32> to vector<1x256xf32>
    %393 = arith.mulf %371, %392 : vector<1x256xf32>
    %c6 = arith.constant 6 : index
    %c0_160 = arith.constant 0 : index
    %394 = vector.load %arg12[%c6, %c0_160] : memref<8x256xf32, #tpu.memory_space<vmem>>, vector<1x256xf32>
    tpu.vector_store %arg12[%c6, %c0_160], %393 {strides = array<i32>} : memref<8x256xf32, #tpu.memory_space<vmem>>, vector<1x256xf32>,
    %c211_i32 = arith.constant 211 : i32
    %395 = tpu.dynamic_rotate %250 by %c211_i32 dim 1 : vector<1x256xf32>, i32 -> vector<1x256xf32>
    %cst_161 = arith.constant 3.000000e+00 : f32
    %396 = vector.broadcast %cst_161 : f32 to vector<1x256xf32>
    %397 = arith.addf %8, %396 : vector<1x256xf32>
    %cst_162 = arith.constant 0.000000e+00 : f32
    %398 = vector.broadcast %cst_162 : f32 to vector<1x256xf32>
    %399 = arith.cmpf oge, %397, %398 : vector<1x256xf32>
    %cst_163 = arith.constant 3.000000e+00 : f32
    %400 = vector.broadcast %cst_163 : f32 to vector<1x256xf32>
    %401 = arith.addf %8, %400 : vector<1x256xf32>
    %cst_164 = arith.constant 1.500000e+01 : f32
    %402 = vector.broadcast %cst_164 : f32 to vector<1x256xf32>
    %403 = arith.cmpf ole, %401, %402 : vector<1x256xf32>
    %404 = arith.andi %399, %403 : vector<1x256xi1>
    %cst_165 = arith.constant -3.000000e+00 : f32
    %405 = vector.broadcast %cst_165 : f32 to vector<1x256xf32>
    %406 = arith.addf %11, %405 : vector<1x256xf32>
    %cst_166 = arith.constant 0.000000e+00 : f32
    %407 = vector.broadcast %cst_166 : f32 to vector<1x256xf32>
    %408 = arith.cmpf oge, %406, %407 : vector<1x256xf32>
    %409 = arith.andi %404, %408 : vector<1x256xi1>
    %cst_167 = arith.constant -3.000000e+00 : f32
    %410 = vector.broadcast %cst_167 : f32 to vector<1x256xf32>
    %411 = arith.addf %11, %410 : vector<1x256xf32>
    %cst_168 = arith.constant 1.500000e+01 : f32
    %412 = vector.broadcast %cst_168 : f32 to vector<1x256xf32>
    %413 = arith.cmpf ole, %411, %412 : vector<1x256xf32>
    %414 = arith.andi %409, %413 : vector<1x256xi1>
    %415 = arith.extui %414 : vector<1x256xi1> to vector<1x256xi32>
    %416 = arith.sitofp %415 : vector<1x256xi32> to vector<1x256xf32>
    %417 = arith.mulf %395, %416 : vector<1x256xf32>
    %c6_169 = arith.constant 6 : index
    %c0_170 = arith.constant 0 : index
    %418 = vector.load %arg13[%c6_169, %c0_170] : memref<8x256xf32, #tpu.memory_space<vmem>>, vector<1x256xf32>
    tpu.vector_store %arg13[%c6_169, %c0_170], %417 {strides = array<i32>} : memref<8x256xf32, #tpu.memory_space<vmem>>, vector<1x256xf32>,
    %c3_i32 = arith.constant 3 : i32
    %419 = tpu.dynamic_rotate %250 by %c3_i32 dim 1 : vector<1x256xf32>, i32 -> vector<1x256xf32>
    %cst_171 = arith.constant 0.000000e+00 : f32
    %420 = vector.broadcast %cst_171 : f32 to vector<1x256xf32>
    %421 = arith.addf %8, %420 : vector<1x256xf32>
    %cst_172 = arith.constant 0.000000e+00 : f32
    %422 = vector.broadcast %cst_172 : f32 to vector<1x256xf32>
    %423 = arith.cmpf oge, %421, %422 : vector<1x256xf32>
    %cst_173 = arith.constant 0.000000e+00 : f32
    %424 = vector.broadcast %cst_173 : f32 to vector<1x256xf32>
    %425 = arith.addf %8, %424 : vector<1x256xf32>
    %cst_174 = arith.constant 1.500000e+01 : f32
    %426 = vector.broadcast %cst_174 : f32 to vector<1x256xf32>
    %427 = arith.cmpf ole, %425, %426 : vector<1x256xf32>
    %428 = arith.andi %423, %427 : vector<1x256xi1>
    %cst_175 = arith.constant -3.000000e+00 : f32
    %429 = vector.broadcast %cst_175 : f32 to vector<1x256xf32>
    %430 = arith.addf %11, %429 : vector<1x256xf32>
    %cst_176 = arith.constant 0.000000e+00 : f32
    %431 = vector.broadcast %cst_176 : f32 to vector<1x256xf32>
    %432 = arith.cmpf oge, %430, %431 : vector<1x256xf32>
    %433 = arith.andi %428, %432 : vector<1x256xi1>
    %cst_177 = arith.constant -3.000000e+00 : f32
    %434 = vector.broadcast %cst_177 : f32 to vector<1x256xf32>
    %435 = arith.addf %11, %434 : vector<1x256xf32>
    %cst_178 = arith.constant 1.500000e+01 : f32
    %436 = vector.broadcast %cst_178 : f32 to vector<1x256xf32>
    %437 = arith.cmpf ole, %435, %436 : vector<1x256xf32>
    %438 = arith.andi %433, %437 : vector<1x256xi1>
    %439 = arith.extui %438 : vector<1x256xi1> to vector<1x256xi32>
    %440 = arith.sitofp %439 : vector<1x256xi32> to vector<1x256xf32>
    %441 = arith.mulf %419, %440 : vector<1x256xf32>
    %c7 = arith.constant 7 : index
    %c0_179 = arith.constant 0 : index
    %442 = vector.load %arg12[%c7, %c0_179] : memref<8x256xf32, #tpu.memory_space<vmem>>, vector<1x256xf32>
    tpu.vector_store %arg12[%c7, %c0_179], %441 {strides = array<i32>} : memref<8x256xf32, #tpu.memory_space<vmem>>, vector<1x256xf32>,
    %c253_i32 = arith.constant 253 : i32
    %443 = tpu.dynamic_rotate %250 by %c253_i32 dim 1 : vector<1x256xf32>, i32 -> vector<1x256xf32>
    %cst_180 = arith.constant 0.000000e+00 : f32
    %444 = vector.broadcast %cst_180 : f32 to vector<1x256xf32>
    %445 = arith.addf %8, %444 : vector<1x256xf32>
    %cst_181 = arith.constant 0.000000e+00 : f32
    %446 = vector.broadcast %cst_181 : f32 to vector<1x256xf32>
    %447 = arith.cmpf oge, %445, %446 : vector<1x256xf32>
    %cst_182 = arith.constant 0.000000e+00 : f32
    %448 = vector.broadcast %cst_182 : f32 to vector<1x256xf32>
    %449 = arith.addf %8, %448 : vector<1x256xf32>
    %cst_183 = arith.constant 1.500000e+01 : f32
    %450 = vector.broadcast %cst_183 : f32 to vector<1x256xf32>
    %451 = arith.cmpf ole, %449, %450 : vector<1x256xf32>
    %452 = arith.andi %447, %451 : vector<1x256xi1>
    %cst_184 = arith.constant 3.000000e+00 : f32
    %453 = vector.broadcast %cst_184 : f32 to vector<1x256xf32>
    %454 = arith.addf %11, %453 : vector<1x256xf32>
    %cst_185 = arith.constant 0.000000e+00 : f32
    %455 = vector.broadcast %cst_185 : f32 to vector<1x256xf32>
    %456 = arith.cmpf oge, %454, %455 : vector<1x256xf32>
    %457 = arith.andi %452, %456 : vector<1x256xi1>
    %cst_186 = arith.constant 3.000000e+00 : f32
    %458 = vector.broadcast %cst_186 : f32 to vector<1x256xf32>
    %459 = arith.addf %11, %458 : vector<1x256xf32>
    %cst_187 = arith.constant 1.500000e+01 : f32
    %460 = vector.broadcast %cst_187 : f32 to vector<1x256xf32>
    %461 = arith.cmpf ole, %459, %460 : vector<1x256xf32>
    %462 = arith.andi %457, %461 : vector<1x256xi1>
    %463 = arith.extui %462 : vector<1x256xi1> to vector<1x256xi32>
    %464 = arith.sitofp %463 : vector<1x256xi32> to vector<1x256xf32>
    %465 = arith.mulf %443, %464 : vector<1x256xf32>
    %c7_188 = arith.constant 7 : index
    %c0_189 = arith.constant 0 : index
    %466 = vector.load %arg13[%c7_188, %c0_189] : memref<8x256xf32, #tpu.memory_space<vmem>>, vector<1x256xf32>
    tpu.vector_store %arg13[%c7_188, %c0_189], %465 {strides = array<i32>} : memref<8x256xf32, #tpu.memory_space<vmem>>, vector<1x256xf32>,
    %c0_190 = arith.constant 0 : index
    %c0_191 = arith.constant 0 : index
    %467 = vector.load %arg12[%c0_190, %c0_191] : memref<8x256xf32, #tpu.memory_space<vmem>>, vector<4x256xf32>
    %c0_192 = arith.constant 0 : index
    %c0_193 = arith.constant 0 : index
    %468 = vector.load %arg13[%c0_192, %c0_193] : memref<8x256xf32, #tpu.memory_space<vmem>>, vector<4x256xf32>
    %469 = vector.broadcast %250 : vector<1x256xf32> to vector<4x256xf32>
    %470 = arith.subf %469, %467 : vector<4x256xf32>
    %471 = vector.broadcast %250 : vector<1x256xf32> to vector<4x256xf32>
    %472 = arith.subf %471, %468 : vector<4x256xf32>
    %473 = arith.mulf %470, %472 : vector<4x256xf32>
    %cst_194 = arith.constant dense<0x7F800000> : vector<256xf32>
    %474 = vector.multi_reduction <minimumf>, %473, %cst_194 [0] : vector<4x256xf32> to vector<256xf32>
    %475 = vector.shape_cast %474 : vector<256xf32> to vector<1x256xf32>
    %c4_195 = arith.constant 4 : index
    %c0_196 = arith.constant 0 : index
    %476 = vector.load %arg12[%c4_195, %c0_196] : memref<8x256xf32, #tpu.memory_space<vmem>>, vector<4x256xf32>
    %c4_197 = arith.constant 4 : index
    %c0_198 = arith.constant 0 : index
    %477 = vector.load %arg13[%c4_197, %c0_198] : memref<8x256xf32, #tpu.memory_space<vmem>>, vector<4x256xf32>
    %478 = vector.broadcast %250 : vector<1x256xf32> to vector<4x256xf32>
    %479 = arith.subf %478, %476 : vector<4x256xf32>
    %480 = vector.broadcast %250 : vector<1x256xf32> to vector<4x256xf32>
    %481 = arith.subf %480, %477 : vector<4x256xf32>
    %482 = arith.mulf %479, %481 : vector<4x256xf32>
    %cst_199 = arith.constant dense<0x7F800000> : vector<256xf32>
    %483 = vector.multi_reduction <minimumf>, %482, %cst_199 [0] : vector<4x256xf32> to vector<256xf32>
    %484 = vector.shape_cast %483 : vector<256xf32> to vector<1x256xf32>
    %485 = arith.maximumf %475, %484 : vector<1x256xf32>
    %486 = arith.addf %475, %484 : vector<1x256xf32>
    %cst_200 = arith.constant 5.000000e-01 : f32
    %487 = vector.broadcast %cst_200 : f32 to vector<1x256xf32>
    %488 = arith.mulf %486, %487 : vector<1x256xf32>
    %489 = arith.addf %485, %488 : vector<1x256xf32>
    %cst_201 = arith.constant 5.000000e-01 : f32
    %490 = vector.broadcast %cst_201 : f32 to vector<1x256xf32>
    %491 = arith.mulf %489, %490 : vector<1x256xf32>
    %cst_202 = arith.constant 0.000000e+00 : f32
    %492 = vector.broadcast %cst_202 : f32 to vector<1x256xf32>
    %493 = arith.maximumf %491, %492 : vector<1x256xf32>
    %494 = arith.negf %493 : vector<1x256xf32>
    %495 = math.exp %494 : vector<1x256xf32>
    %cst_203 = arith.constant 1.000000e+00 : f32
    %496 = vector.broadcast %cst_203 : f32 to vector<1x256xf32>
    %497 = arith.addf %496, %495 : vector<1x256xf32>
    %498 = arith.divf %496, %497 : vector<1x256xf32>
    %499 = vector.broadcast %498 : vector<1x256xf32> to vector<4x256xf32>
    %500 = arith.mulf %499, %1 : vector<4x256xf32>
    %c0_204 = arith.constant 0 : index
    %c0_205 = arith.constant 0 : index
    %501 = vector.load %arg6[%c0_204, %c0_205] : memref<2x4xf32, #tpu.memory_space<vmem>>, vector<2x4xf32>
    %502 = vector.extract_strided_slice %501 {offsets = [0, 0], sizes = [2, 1], strides = [1, 1]} : vector<2x4xf32> to vector<2x1xf32>
    %503 = vector.extract_strided_slice %500 {offsets = [0, 0], sizes = [1, 256], strides = [1, 1]} : vector<4x256xf32> to vector<1x256xf32>
    %504 = vector.broadcast %502 : vector<2x1xf32> to vector<2x256xf32>
    %505 = vector.broadcast %503 : vector<1x256xf32> to vector<2x256xf32>
    %506 = arith.mulf %504, %505 : vector<2x256xf32>
    %507 = vector.extract_strided_slice %501 {offsets = [0, 1], sizes = [2, 1], strides = [1, 1]} : vector<2x4xf32> to vector<2x1xf32>
    %508 = vector.extract_strided_slice %500 {offsets = [1, 0], sizes = [1, 256], strides = [1, 1]} : vector<4x256xf32> to vector<1x256xf32>
    %509 = vector.broadcast %507 : vector<2x1xf32> to vector<2x256xf32>
    %510 = vector.broadcast %508 : vector<1x256xf32> to vector<2x256xf32>
    %511 = arith.mulf %509, %510 : vector<2x256xf32>
    %512 = arith.addf %506, %511 : vector<2x256xf32>
    %513 = vector.extract_strided_slice %501 {offsets = [0, 2], sizes = [2, 1], strides = [1, 1]} : vector<2x4xf32> to vector<2x1xf32>
    %514 = vector.extract_strided_slice %500 {offsets = [2, 0], sizes = [1, 256], strides = [1, 1]} : vector<4x256xf32> to vector<1x256xf32>
    %515 = vector.broadcast %513 : vector<2x1xf32> to vector<2x256xf32>
    %516 = vector.broadcast %514 : vector<1x256xf32> to vector<2x256xf32>
    %517 = arith.mulf %515, %516 : vector<2x256xf32>
    %518 = arith.addf %512, %517 : vector<2x256xf32>
    %519 = vector.extract_strided_slice %501 {offsets = [0, 3], sizes = [2, 1], strides = [1, 1]} : vector<2x4xf32> to vector<2x1xf32>
    %520 = vector.extract_strided_slice %500 {offsets = [3, 0], sizes = [1, 256], strides = [1, 1]} : vector<4x256xf32> to vector<1x256xf32>
    %521 = vector.broadcast %519 : vector<2x1xf32> to vector<2x256xf32>
    %522 = vector.broadcast %520 : vector<1x256xf32> to vector<2x256xf32>
    %523 = arith.mulf %521, %522 : vector<2x256xf32>
    %524 = arith.addf %518, %523 : vector<2x256xf32>
    %c0_206 = arith.constant 0 : index
    %c0_207 = arith.constant 0 : index
    %525 = vector.load %arg7[%c0_206, %c0_207] : memref<2x1xf32, #tpu.memory_space<vmem>>, vector<2x1xf32>
    %526 = vector.broadcast %525 : vector<2x1xf32> to vector<2x256xf32>
    %527 = arith.addf %524, %526 : vector<2x256xf32>
    %528 = arith.negf %527 : vector<2x256xf32>
    %529 = math.exp %528 : vector<2x256xf32>
    %cst_208 = arith.constant 1.000000e+00 : f32
    %530 = vector.broadcast %cst_208 : f32 to vector<2x256xf32>
    %531 = arith.addf %530, %529 : vector<2x256xf32>
    %532 = arith.divf %530, %531 : vector<2x256xf32>
    %533 = arith.mulf %527, %532 : vector<2x256xf32>
    %c0_209 = arith.constant 0 : index
    %c0_210 = arith.constant 0 : index
    %534 = vector.load %arg8[%c0_209, %c0_210] : memref<4x2xf32, #tpu.memory_space<vmem>>, vector<4x2xf32>
    %535 = vector.extract_strided_slice %534 {offsets = [0, 0], sizes = [4, 1], strides = [1, 1]} : vector<4x2xf32> to vector<4x1xf32>
    %536 = vector.extract_strided_slice %533 {offsets = [0, 0], sizes = [1, 256], strides = [1, 1]} : vector<2x256xf32> to vector<1x256xf32>
    %537 = vector.broadcast %535 : vector<4x1xf32> to vector<4x256xf32>
    %538 = vector.broadcast %536 : vector<1x256xf32> to vector<4x256xf32>
    %539 = arith.mulf %537, %538 : vector<4x256xf32>
    %540 = vector.extract_strided_slice %534 {offsets = [0, 1], sizes = [4, 1], strides = [1, 1]} : vector<4x2xf32> to vector<4x1xf32>
    %541 = vector.extract_strided_slice %533 {offsets = [1, 0], sizes = [1, 256], strides = [1, 1]} : vector<2x256xf32> to vector<1x256xf32>
    %542 = vector.broadcast %540 : vector<4x1xf32> to vector<4x256xf32>
    %543 = vector.broadcast %541 : vector<1x256xf32> to vector<4x256xf32>
    %544 = arith.mulf %542, %543 : vector<4x256xf32>
    %545 = arith.addf %539, %544 : vector<4x256xf32>
    %c0_211 = arith.constant 0 : index
    %c0_212 = arith.constant 0 : index
    %546 = vector.load %arg9[%c0_211, %c0_212] : memref<4x1xf32, #tpu.memory_space<vmem>>, vector<4x1xf32>
    %547 = vector.broadcast %546 : vector<4x1xf32> to vector<4x256xf32>
    %548 = arith.addf %545, %547 : vector<4x256xf32>
    %549 = arith.negf %548 : vector<4x256xf32>
    %550 = math.exp %549 : vector<4x256xf32>
    %cst_213 = arith.constant 1.000000e+00 : f32
    %551 = vector.broadcast %cst_213 : f32 to vector<4x256xf32>
    %552 = arith.addf %551, %550 : vector<4x256xf32>
    %553 = arith.divf %551, %552 : vector<4x256xf32>
    %cst_214 = arith.constant 1.000000e+00 : f32
    %554 = vector.broadcast %cst_214 : f32 to vector<4x256xf32>
    %555 = arith.addf %553, %554 : vector<4x256xf32>
    %556 = arith.mulf %1, %555 : vector<4x256xf32>
    %c0_215 = arith.constant 0 : index
    %c0_216 = arith.constant 0 : index
    %c0_217 = arith.constant 0 : index
    %557 = vector.load %arg10[%c0_215, %c0_216, %c0_217] : memref<1x4x256xf32, #tpu.memory_space<vmem>>, vector<1x4x256xf32>
    %558 = vector.shape_cast %557 : vector<1x4x256xf32> to vector<4x256xf32>
    %559 = vector.shape_cast %556 : vector<4x256xf32> to vector<1x4x256xf32>
    tpu.vector_store %arg10[%c0_215, %c0_216, %c0_217], %559 {strides = array<i32>} : memref<1x4x256xf32, #tpu.memory_space<vmem>>, vector<1x4x256xf32>,
    return
  }
  func.func @transform_0(%arg0: i32) -> (i32, i32, i32) {
    %c0_i32 = arith.constant 0 : i32
    %c0_i32_0 = arith.constant 0 : i32
    %c0_i32_1 = arith.constant 0 : i32
    return %arg0, %c0_i32, %c0_i32_0 : i32, i32, i32
  }
  func.func @transform_1(%arg0: i32) -> (i32, i32) {
    %c0_i32 = arith.constant 0 : i32
    %c0_i32_0 = arith.constant 0 : i32
    %c0_i32_1 = arith.constant 0 : i32
    return %c0_i32, %c0_i32_0 : i32, i32
  }
  func.func @transform_2(%arg0: i32) -> (i32, i32) {
    %c0_i32 = arith.constant 0 : i32
    %c0_i32_0 = arith.constant 0 : i32
    %c0_i32_1 = arith.constant 0 : i32
    return %c0_i32, %c0_i32_0 : i32, i32
  }
  func.func @transform_3(%arg0: i32) -> (i32, i32) {
    %c0_i32 = arith.constant 0 : i32
    %c0_i32_0 = arith.constant 0 : i32
    %c0_i32_1 = arith.constant 0 : i32
    return %c0_i32, %c0_i32_0 : i32, i32
  }
  func.func @transform_4(%arg0: i32) -> (i32, i32) {
    %c0_i32 = arith.constant 0 : i32
    %c0_i32_0 = arith.constant 0 : i32
    %c0_i32_1 = arith.constant 0 : i32
    return %c0_i32, %c0_i32_0 : i32, i32
  }
  func.func @transform_5(%arg0: i32) -> (i32, i32) {
    %c0_i32 = arith.constant 0 : i32
    %c0_i32_0 = arith.constant 0 : i32
    %c0_i32_1 = arith.constant 0 : i32
    return %c0_i32, %c0_i32_0 : i32, i32
  }
  func.func @transform_6(%arg0: i32) -> (i32, i32) {
    %c0_i32 = arith.constant 0 : i32
    %c0_i32_0 = arith.constant 0 : i32
    %c0_i32_1 = arith.constant 0 : i32
    return %c0_i32, %c0_i32_0 : i32, i32
  }
  func.func @transform_7(%arg0: i32) -> (i32, i32) {
    %c0_i32 = arith.constant 0 : i32
    %c0_i32_0 = arith.constant 0 : i32
    %c0_i32_1 = arith.constant 0 : i32
    return %c0_i32, %c0_i32_0 : i32, i32
  }
  func.func @transform_8(%arg0: i32) -> (i32, i32) {
    %c0_i32 = arith.constant 0 : i32
    %c0_i32_0 = arith.constant 0 : i32
    %c0_i32_1 = arith.constant 0 : i32
    return %c0_i32, %c0_i32_0 : i32, i32
  }
  func.func @transform_9(%arg0: i32) -> (i32, i32, i32) {
    %c0_i32 = arith.constant 0 : i32
    %c0_i32_0 = arith.constant 0 : i32
    %c0_i32_1 = arith.constant 0 : i32
    return %arg0, %c0_i32, %c0_i32_0 : i32, i32, i32
  }
}

module attributes {stable_mosaic.version = 11 : i64} {
  func.func @kernel(%arg0: i32, %arg1: memref<1x4x256xf32, #tpu.memory_space<vmem>>, %arg2: memref<4x72xbf16, #tpu.memory_space<vmem>>, %arg3: memref<4x1xf32, #tpu.memory_space<vmem>>, %arg4: memref<1x4xf32, #tpu.memory_space<vmem>>, %arg5: memref<1x1xf32, #tpu.memory_space<vmem>>, %arg6: memref<2x4xf32, #tpu.memory_space<vmem>>, %arg7: memref<2x1xf32, #tpu.memory_space<vmem>>, %arg8: memref<4x2xf32, #tpu.memory_space<vmem>>, %arg9: memref<4x1xf32, #tpu.memory_space<vmem>>, %arg10: memref<1x4x256xf32, #tpu.memory_space<vmem>>, %arg11: memref<72x256xf32, #tpu.memory_space<vmem>>, %arg12: memref<8x256xf32, #tpu.memory_space<vmem>>, %arg13: memref<8x256xf32, #tpu.memory_space<vmem>>) attributes {dimension_semantics = [#tpu.dimension_semantics<parallel>], iteration_bounds = array<i64: 2>, scalar_prefetch = 0 : i64, scratch_operands = 3 : i64, tpu.core_type = #tpu.core_type<tc>, window_params = [{transform_indices = @transform_0, window_bounds = array<i64: 1, 4, 256>}, {pipeline_mode = #tpu.pipeline_mode<synchronous>, transform_indices = @transform_1, window_bounds = array<i64: 4, 72>}, {pipeline_mode = #tpu.pipeline_mode<synchronous>, transform_indices = @transform_2, window_bounds = array<i64: 4, 1>}, {pipeline_mode = #tpu.pipeline_mode<synchronous>, transform_indices = @transform_3, window_bounds = array<i64: 1, 4>}, {pipeline_mode = #tpu.pipeline_mode<synchronous>, transform_indices = @transform_4, window_bounds = array<i64: 1, 1>}, {pipeline_mode = #tpu.pipeline_mode<synchronous>, transform_indices = @transform_5, window_bounds = array<i64: 2, 4>}, {pipeline_mode = #tpu.pipeline_mode<synchronous>, transform_indices = @transform_6, window_bounds = array<i64: 2, 1>}, {pipeline_mode = #tpu.pipeline_mode<synchronous>, transform_indices = @transform_7, window_bounds = array<i64: 4, 2>}, {pipeline_mode = #tpu.pipeline_mode<synchronous>, transform_indices = @transform_8, window_bounds = array<i64: 4, 1>}, {transform_indices = @transform_9, window_bounds = array<i64: 1, 4, 256>}]} {
    %c0 = arith.constant 0 : index
    %c0_0 = arith.constant 0 : index
    %c0_1 = arith.constant 0 : index
    %0 = vector.load %arg1[%c0, %c0_0, %c0_1] : memref<1x4x256xf32, #tpu.memory_space<vmem>>, vector<1x4x256xf32>
    %1 = vector.shape_cast %0 : vector<1x4x256xf32> to vector<4x256xf32>
    %2 = tpu.iota {dimensions = array<i32: 1>} : vector<1x256xi32>
    %3 = arith.sitofp %2 : vector<1x256xi32> to vector<1x256xf32>
    %cst = arith.constant 5.000000e-01 : f32
    %4 = vector.broadcast %cst : f32 to vector<1x256xf32>
    %5 = arith.addf %3, %4 : vector<1x256xf32>
    %cst_2 = arith.constant 6.250000e-02 : f32
    %6 = vector.broadcast %cst_2 : f32 to vector<1x256xf32>
    %7 = arith.mulf %5, %6 : vector<1x256xf32>
    %8 = math.floor %7 : vector<1x256xf32>
    %cst_3 = arith.constant 1.600000e+01 : f32
    %9 = vector.broadcast %cst_3 : f32 to vector<1x256xf32>
    %10 = arith.mulf %8, %9 : vector<1x256xf32>
    %11 = arith.subf %3, %10 : vector<1x256xf32>
    %cst_4 = arith.constant 0.000000e+00 : f32
    %12 = vector.broadcast %cst_4 : f32 to vector<72x256xf32>
    %c0_5 = arith.constant 0 : index
    %c0_6 = arith.constant 0 : index
    %13 = vector.load %arg11[%c0_5, %c0_6] : memref<72x256xf32, #tpu.memory_space<vmem>>, vector<72x256xf32>
    tpu.vector_store %arg11[%c0_5, %c0_6], %12 {strides = array<i32>} : memref<72x256xf32, #tpu.memory_space<vmem>>, vector<72x256xf32>,
    %c17_i32 = arith.constant 17 : i32
    %14 = tpu.dynamic_rotate %1 by %c17_i32 dim 1 : vector<4x256xf32>, i32 -> vector<4x256xf32>
    %cst_7 = arith.constant -1.000000e+00 : f32
    %15 = vector.broadcast %cst_7 : f32 to vector<1x256xf32>
    %16 = arith.addf %8, %15 : vector<1x256xf32>
    %cst_8 = arith.constant 0.000000e+00 : f32
    %17 = vector.broadcast %cst_8 : f32 to vector<1x256xf32>
    %18 = arith.cmpf oge, %16, %17 : vector<1x256xf32>
    %cst_9 = arith.constant -1.000000e+00 : f32
    %19 = vector.broadcast %cst_9 : f32 to vector<1x256xf32>
    %20 = arith.addf %8, %19 : vector<1x256xf32>
    %cst_10 = arith.constant 1.500000e+01 : f32
    %21 = vector.broadcast %cst_10 : f32 to vector<1x256xf32>
    %22 = arith.cmpf ole, %20, %21 : vector<1x256xf32>
    %23 = arith.andi %18, %22 : vector<1x256xi1>
    %cst_11 = arith.constant -1.000000e+00 : f32
    %24 = vector.broadcast %cst_11 : f32 to vector<1x256xf32>
    %25 = arith.addf %11, %24 : vector<1x256xf32>
    %cst_12 = arith.constant 0.000000e+00 : f32
    %26 = vector.broadcast %cst_12 : f32 to vector<1x256xf32>
    %27 = arith.cmpf oge, %25, %26 : vector<1x256xf32>
    %28 = arith.andi %23, %27 : vector<1x256xi1>
    %cst_13 = arith.constant -1.000000e+00 : f32
    %29 = vector.broadcast %cst_13 : f32 to vector<1x256xf32>
    %30 = arith.addf %11, %29 : vector<1x256xf32>
    %cst_14 = arith.constant 1.500000e+01 : f32
    %31 = vector.broadcast %cst_14 : f32 to vector<1x256xf32>
    %32 = arith.cmpf ole, %30, %31 : vector<1x256xf32>
    %33 = arith.andi %28, %32 : vector<1x256xi1>
    %34 = arith.extui %33 : vector<1x256xi1> to vector<1x256xi32>
    %35 = arith.sitofp %34 : vector<1x256xi32> to vector<1x256xf32>
    %36 = vector.broadcast %35 : vector<1x256xf32> to vector<4x256xf32>
    %37 = arith.mulf %14, %36 : vector<4x256xf32>
    %c0_15 = arith.constant 0 : index
    %c0_16 = arith.constant 0 : index
    %38 = vector.load %arg11[%c0_15, %c0_16] : memref<72x256xf32, #tpu.memory_space<vmem>>, vector<4x256xf32>
    tpu.vector_store %arg11[%c0_15, %c0_16], %37 {strides = array<i32>} : memref<72x256xf32, #tpu.memory_space<vmem>>, vector<4x256xf32>,
    %c16_i32 = arith.constant 16 : i32
    %39 = tpu.dynamic_rotate %1 by %c16_i32 dim 1 : vector<4x256xf32>, i32 -> vector<4x256xf32>
    %cst_17 = arith.constant -1.000000e+00 : f32
    %40 = vector.broadcast %cst_17 : f32 to vector<1x256xf32>
    %41 = arith.addf %8, %40 : vector<1x256xf32>
    %cst_18 = arith.constant 0.000000e+00 : f32
    %42 = vector.broadcast %cst_18 : f32 to vector<1x256xf32>
    %43 = arith.cmpf oge, %41, %42 : vector<1x256xf32>
    %cst_19 = arith.constant -1.000000e+00 : f32
    %44 = vector.broadcast %cst_19 : f32 to vector<1x256xf32>
    %45 = arith.addf %8, %44 : vector<1x256xf32>
    %cst_20 = arith.constant 1.500000e+01 : f32
    %46 = vector.broadcast %cst_20 : f32 to vector<1x256xf32>
    %47 = arith.cmpf ole, %45, %46 : vector<1x256xf32>
    %48 = arith.andi %43, %47 : vector<1x256xi1>
    %cst_21 = arith.constant 0.000000e+00 : f32
    %49 = vector.broadcast %cst_21 : f32 to vector<1x256xf32>
    %50 = arith.addf %11, %49 : vector<1x256xf32>
    %cst_22 = arith.constant 0.000000e+00 : f32
    %51 = vector.broadcast %cst_22 : f32 to vector<1x256xf32>
    %52 = arith.cmpf oge, %50, %51 : vector<1x256xf32>
    %53 = arith.andi %48, %52 : vector<1x256xi1>
    %cst_23 = arith.constant 0.000000e+00 : f32
    %54 = vector.broadcast %cst_23 : f32 to vector<1x256xf32>
    %55 = arith.addf %11, %54 : vector<1x256xf32>
    %cst_24 = arith.constant 1.500000e+01 : f32
    %56 = vector.broadcast %cst_24 : f32 to vector<1x256xf32>
    %57 = arith.cmpf ole, %55, %56 : vector<1x256xf32>
    %58 = arith.andi %53, %57 : vector<1x256xi1>
    %59 = arith.extui %58 : vector<1x256xi1> to vector<1x256xi32>
    %60 = arith.sitofp %59 : vector<1x256xi32> to vector<1x256xf32>
    %61 = vector.broadcast %60 : vector<1x256xf32> to vector<4x256xf32>
    %62 = arith.mulf %39, %61 : vector<4x256xf32>
    %c8 = arith.constant 8 : index
    %c0_25 = arith.constant 0 : index
    %63 = vector.load %arg11[%c8, %c0_25] : memref<72x256xf32, #tpu.memory_space<vmem>>, vector<4x256xf32>
    tpu.vector_store %arg11[%c8, %c0_25], %62 {strides = array<i32>} : memref<72x256xf32, #tpu.memory_space<vmem>>, vector<4x256xf32>,
    %c15_i32 = arith.constant 15 : i32
    %64 = tpu.dynamic_rotate %1 by %c15_i32 dim 1 : vector<4x256xf32>, i32 -> vector<4x256xf32>
    %cst_26 = arith.constant -1.000000e+00 : f32
    %65 = vector.broadcast %cst_26 : f32 to vector<1x256xf32>
    %66 = arith.addf %8, %65 : vector<1x256xf32>
    %cst_27 = arith.constant 0.000000e+00 : f32
    %67 = vector.broadcast %cst_27 : f32 to vector<1x256xf32>
    %68 = arith.cmpf oge, %66, %67 : vector<1x256xf32>
    %cst_28 = arith.constant -1.000000e+00 : f32
    %69 = vector.broadcast %cst_28 : f32 to vector<1x256xf32>
    %70 = arith.addf %8, %69 : vector<1x256xf32>
    %cst_29 = arith.constant 1.500000e+01 : f32
    %71 = vector.broadcast %cst_29 : f32 to vector<1x256xf32>
    %72 = arith.cmpf ole, %70, %71 : vector<1x256xf32>
    %73 = arith.andi %68, %72 : vector<1x256xi1>
    %cst_30 = arith.constant 1.000000e+00 : f32
    %74 = vector.broadcast %cst_30 : f32 to vector<1x256xf32>
    %75 = arith.addf %11, %74 : vector<1x256xf32>
    %cst_31 = arith.constant 0.000000e+00 : f32
    %76 = vector.broadcast %cst_31 : f32 to vector<1x256xf32>
    %77 = arith.cmpf oge, %75, %76 : vector<1x256xf32>
    %78 = arith.andi %73, %77 : vector<1x256xi1>
    %cst_32 = arith.constant 1.000000e+00 : f32
    %79 = vector.broadcast %cst_32 : f32 to vector<1x256xf32>
    %80 = arith.addf %11, %79 : vector<1x256xf32>
    %cst_33 = arith.constant 1.500000e+01 : f32
    %81 = vector.broadcast %cst_33 : f32 to vector<1x256xf32>
    %82 = arith.cmpf ole, %80, %81 : vector<1x256xf32>
    %83 = arith.andi %78, %82 : vector<1x256xi1>
    %84 = arith.extui %83 : vector<1x256xi1> to vector<1x256xi32>
    %85 = arith.sitofp %84 : vector<1x256xi32> to vector<1x256xf32>
    %86 = vector.broadcast %85 : vector<1x256xf32> to vector<4x256xf32>
    %87 = arith.mulf %64, %86 : vector<4x256xf32>
    %c16 = arith.constant 16 : index
    %c0_34 = arith.constant 0 : index
    %88 = vector.load %arg11[%c16, %c0_34] : memref<72x256xf32, #tpu.memory_space<vmem>>, vector<4x256xf32>
    tpu.vector_store %arg11[%c16, %c0_34], %87 {strides = array<i32>} : memref<72x256xf32, #tpu.memory_space<vmem>>, vector<4x256xf32>,
    %c1_i32 = arith.constant 1 : i32
    %89 = tpu.dynamic_rotate %1 by %c1_i32 dim 1 : vector<4x256xf32>, i32 -> vector<4x256xf32>
    %cst_35 = arith.constant 0.000000e+00 : f32
    %90 = vector.broadcast %cst_35 : f32 to vector<1x256xf32>
    %91 = arith.addf %8, %90 : vector<1x256xf32>
    %cst_36 = arith.constant 0.000000e+00 : f32
    %92 = vector.broadcast %cst_36 : f32 to vector<1x256xf32>
    %93 = arith.cmpf oge, %91, %92 : vector<1x256xf32>
    %cst_37 = arith.constant 0.000000e+00 : f32
    %94 = vector.broadcast %cst_37 : f32 to vector<1x256xf32>
    %95 = arith.addf %8, %94 : vector<1x256xf32>
    %cst_38 = arith.constant 1.500000e+01 : f32
    %96 = vector.broadcast %cst_38 : f32 to vector<1x256xf32>
    %97 = arith.cmpf ole, %95, %96 : vector<1x256xf32>
    %98 = arith.andi %93, %97 : vector<1x256xi1>
    %cst_39 = arith.constant -1.000000e+00 : f32
    %99 = vector.broadcast %cst_39 : f32 to vector<1x256xf32>
    %100 = arith.addf %11, %99 : vector<1x256xf32>
    %cst_40 = arith.constant 0.000000e+00 : f32
    %101 = vector.broadcast %cst_40 : f32 to vector<1x256xf32>
    %102 = arith.cmpf oge, %100, %101 : vector<1x256xf32>
    %103 = arith.andi %98, %102 : vector<1x256xi1>
    %cst_41 = arith.constant -1.000000e+00 : f32
    %104 = vector.broadcast %cst_41 : f32 to vector<1x256xf32>
    %105 = arith.addf %11, %104 : vector<1x256xf32>
    %cst_42 = arith.constant 1.500000e+01 : f32
    %106 = vector.broadcast %cst_42 : f32 to vector<1x256xf32>
    %107 = arith.cmpf ole, %105, %106 : vector<1x256xf32>
    %108 = arith.andi %103, %107 : vector<1x256xi1>
    %109 = arith.extui %108 : vector<1x256xi1> to vector<1x256xi32>
    %110 = arith.sitofp %109 : vector<1x256xi32> to vector<1x256xf32>
    %111 = vector.broadcast %110 : vector<1x256xf32> to vector<4x256xf32>
    %112 = arith.mulf %89, %111 : vector<4x256xf32>
    %c24 = arith.constant 24 : index
    %c0_43 = arith.constant 0 : index
    %113 = vector.load %arg11[%c24, %c0_43] : memref<72x256xf32, #tpu.memory_space<vmem>>, vector<4x256xf32>
    tpu.vector_store %arg11[%c24, %c0_43], %112 {strides = array<i32>} : memref<72x256xf32, #tpu.memory_space<vmem>>, vector<4x256xf32>,
    %c32 = arith.constant 32 : index
    %c0_44 = arith.constant 0 : index
    %114 = vector.load %arg11[%c32, %c0_44] : memref<72x256xf32, #tpu.memory_space<vmem>>, vector<4x256xf32>
    tpu.vector_store %arg11[%c32, %c0_44], %1 {strides = array<i32>} : memref<72x256xf32, #tpu.memory_space<vmem>>, vector<4x256xf32>,
    %c255_i32 = arith.constant 255 : i32
    %115 = tpu.dynamic_rotate %1 by %c255_i32 dim 1 : vector<4x256xf32>, i32 -> vector<4x256xf32>
    %cst_45 = arith.constant 0.000000e+00 : f32
    %116 = vector.broadcast %cst_45 : f32 to vector<1x256xf32>
    %117 = arith.addf %8, %116 : vector<1x256xf32>
    %cst_46 = arith.constant 0.000000e+00 : f32
    %118 = vector.broadcast %cst_46 : f32 to vector<1x256xf32>
    %119 = arith.cmpf oge, %117, %118 : vector<1x256xf32>
    %cst_47 = arith.constant 0.000000e+00 : f32
    %120 = vector.broadcast %cst_47 : f32 to vector<1x256xf32>
    %121 = arith.addf %8, %120 : vector<1x256xf32>
    %cst_48 = arith.constant 1.500000e+01 : f32
    %122 = vector.broadcast %cst_48 : f32 to vector<1x256xf32>
    %123 = arith.cmpf ole, %121, %122 : vector<1x256xf32>
    %124 = arith.andi %119, %123 : vector<1x256xi1>
    %cst_49 = arith.constant 1.000000e+00 : f32
    %125 = vector.broadcast %cst_49 : f32 to vector<1x256xf32>
    %126 = arith.addf %11, %125 : vector<1x256xf32>
    %cst_50 = arith.constant 0.000000e+00 : f32
    %127 = vector.broadcast %cst_50 : f32 to vector<1x256xf32>
    %128 = arith.cmpf oge, %126, %127 : vector<1x256xf32>
    %129 = arith.andi %124, %128 : vector<1x256xi1>
    %cst_51 = arith.constant 1.000000e+00 : f32
    %130 = vector.broadcast %cst_51 : f32 to vector<1x256xf32>
    %131 = arith.addf %11, %130 : vector<1x256xf32>
    %cst_52 = arith.constant 1.500000e+01 : f32
    %132 = vector.broadcast %cst_52 : f32 to vector<1x256xf32>
    %133 = arith.cmpf ole, %131, %132 : vector<1x256xf32>
    %134 = arith.andi %129, %133 : vector<1x256xi1>
    %135 = arith.extui %134 : vector<1x256xi1> to vector<1x256xi32>
    %136 = arith.sitofp %135 : vector<1x256xi32> to vector<1x256xf32>
    %137 = vector.broadcast %136 : vector<1x256xf32> to vector<4x256xf32>
    %138 = arith.mulf %115, %137 : vector<4x256xf32>
    %c40 = arith.constant 40 : index
    %c0_53 = arith.constant 0 : index
    %139 = vector.load %arg11[%c40, %c0_53] : memref<72x256xf32, #tpu.memory_space<vmem>>, vector<4x256xf32>
    tpu.vector_store %arg11[%c40, %c0_53], %138 {strides = array<i32>} : memref<72x256xf32, #tpu.memory_space<vmem>>, vector<4x256xf32>,
    %c241_i32 = arith.constant 241 : i32
    %140 = tpu.dynamic_rotate %1 by %c241_i32 dim 1 : vector<4x256xf32>, i32 -> vector<4x256xf32>
    %cst_54 = arith.constant 1.000000e+00 : f32
    %141 = vector.broadcast %cst_54 : f32 to vector<1x256xf32>
    %142 = arith.addf %8, %141 : vector<1x256xf32>
    %cst_55 = arith.constant 0.000000e+00 : f32
    %143 = vector.broadcast %cst_55 : f32 to vector<1x256xf32>
    %144 = arith.cmpf oge, %142, %143 : vector<1x256xf32>
    %cst_56 = arith.constant 1.000000e+00 : f32
    %145 = vector.broadcast %cst_56 : f32 to vector<1x256xf32>
    %146 = arith.addf %8, %145 : vector<1x256xf32>
    %cst_57 = arith.constant 1.500000e+01 : f32
    %147 = vector.broadcast %cst_57 : f32 to vector<1x256xf32>
    %148 = arith.cmpf ole, %146, %147 : vector<1x256xf32>
    %149 = arith.andi %144, %148 : vector<1x256xi1>
    %cst_58 = arith.constant -1.000000e+00 : f32
    %150 = vector.broadcast %cst_58 : f32 to vector<1x256xf32>
    %151 = arith.addf %11, %150 : vector<1x256xf32>
    %cst_59 = arith.constant 0.000000e+00 : f32
    %152 = vector.broadcast %cst_59 : f32 to vector<1x256xf32>
    %153 = arith.cmpf oge, %151, %152 : vector<1x256xf32>
    %154 = arith.andi %149, %153 : vector<1x256xi1>
    %cst_60 = arith.constant -1.000000e+00 : f32
    %155 = vector.broadcast %cst_60 : f32 to vector<1x256xf32>
    %156 = arith.addf %11, %155 : vector<1x256xf32>
    %cst_61 = arith.constant 1.500000e+01 : f32
    %157 = vector.broadcast %cst_61 : f32 to vector<1x256xf32>
    %158 = arith.cmpf ole, %156, %157 : vector<1x256xf32>
    %159 = arith.andi %154, %158 : vector<1x256xi1>
    %160 = arith.extui %159 : vector<1x256xi1> to vector<1x256xi32>
    %161 = arith.sitofp %160 : vector<1x256xi32> to vector<1x256xf32>
    %162 = vector.broadcast %161 : vector<1x256xf32> to vector<4x256xf32>
    %163 = arith.mulf %140, %162 : vector<4x256xf32>
    %c48 = arith.constant 48 : index
    %c0_62 = arith.constant 0 : index
    %164 = vector.load %arg11[%c48, %c0_62] : memref<72x256xf32, #tpu.memory_space<vmem>>, vector<4x256xf32>
    tpu.vector_store %arg11[%c48, %c0_62], %163 {strides = array<i32>} : memref<72x256xf32, #tpu.memory_space<vmem>>, vector<4x256xf32>,
    %c240_i32 = arith.constant 240 : i32
    %165 = tpu.dynamic_rotate %1 by %c240_i32 dim 1 : vector<4x256xf32>, i32 -> vector<4x256xf32>
    %cst_63 = arith.constant 1.000000e+00 : f32
    %166 = vector.broadcast %cst_63 : f32 to vector<1x256xf32>
    %167 = arith.addf %8, %166 : vector<1x256xf32>
    %cst_64 = arith.constant 0.000000e+00 : f32
    %168 = vector.broadcast %cst_64 : f32 to vector<1x256xf32>
    %169 = arith.cmpf oge, %167, %168 : vector<1x256xf32>
    %cst_65 = arith.constant 1.000000e+00 : f32
    %170 = vector.broadcast %cst_65 : f32 to vector<1x256xf32>
    %171 = arith.addf %8, %170 : vector<1x256xf32>
    %cst_66 = arith.constant 1.500000e+01 : f32
    %172 = vector.broadcast %cst_66 : f32 to vector<1x256xf32>
    %173 = arith.cmpf ole, %171, %172 : vector<1x256xf32>
    %174 = arith.andi %169, %173 : vector<1x256xi1>
    %cst_67 = arith.constant 0.000000e+00 : f32
    %175 = vector.broadcast %cst_67 : f32 to vector<1x256xf32>
    %176 = arith.addf %11, %175 : vector<1x256xf32>
    %cst_68 = arith.constant 0.000000e+00 : f32
    %177 = vector.broadcast %cst_68 : f32 to vector<1x256xf32>
    %178 = arith.cmpf oge, %176, %177 : vector<1x256xf32>
    %179 = arith.andi %174, %178 : vector<1x256xi1>
    %cst_69 = arith.constant 0.000000e+00 : f32
    %180 = vector.broadcast %cst_69 : f32 to vector<1x256xf32>
    %181 = arith.addf %11, %180 : vector<1x256xf32>
    %cst_70 = arith.constant 1.500000e+01 : f32
    %182 = vector.broadcast %cst_70 : f32 to vector<1x256xf32>
    %183 = arith.cmpf ole, %181, %182 : vector<1x256xf32>
    %184 = arith.andi %179, %183 : vector<1x256xi1>
    %185 = arith.extui %184 : vector<1x256xi1> to vector<1x256xi32>
    %186 = arith.sitofp %185 : vector<1x256xi32> to vector<1x256xf32>
    %187 = vector.broadcast %186 : vector<1x256xf32> to vector<4x256xf32>
    %188 = arith.mulf %165, %187 : vector<4x256xf32>
    %c56 = arith.constant 56 : index
    %c0_71 = arith.constant 0 : index
    %189 = vector.load %arg11[%c56, %c0_71] : memref<72x256xf32, #tpu.memory_space<vmem>>, vector<4x256xf32>
    tpu.vector_store %arg11[%c56, %c0_71], %188 {strides = array<i32>} : memref<72x256xf32, #tpu.memory_space<vmem>>, vector<4x256xf32>,
    %c239_i32 = arith.constant 239 : i32
    %190 = tpu.dynamic_rotate %1 by %c239_i32 dim 1 : vector<4x256xf32>, i32 -> vector<4x256xf32>
    %cst_72 = arith.constant 1.000000e+00 : f32
    %191 = vector.broadcast %cst_72 : f32 to vector<1x256xf32>
    %192 = arith.addf %8, %191 : vector<1x256xf32>
    %cst_73 = arith.constant 0.000000e+00 : f32
    %193 = vector.broadcast %cst_73 : f32 to vector<1x256xf32>
    %194 = arith.cmpf oge, %192, %193 : vector<1x256xf32>
    %cst_74 = arith.constant 1.000000e+00 : f32
    %195 = vector.broadcast %cst_74 : f32 to vector<1x256xf32>
    %196 = arith.addf %8, %195 : vector<1x256xf32>
    %cst_75 = arith.constant 1.500000e+01 : f32
    %197 = vector.broadcast %cst_75 : f32 to vector<1x256xf32>
    %198 = arith.cmpf ole, %196, %197 : vector<1x256xf32>
    %199 = arith.andi %194, %198 : vector<1x256xi1>
    %cst_76 = arith.constant 1.000000e+00 : f32
    %200 = vector.broadcast %cst_76 : f32 to vector<1x256xf32>
    %201 = arith.addf %11, %200 : vector<1x256xf32>
    %cst_77 = arith.constant 0.000000e+00 : f32
    %202 = vector.broadcast %cst_77 : f32 to vector<1x256xf32>
    %203 = arith.cmpf oge, %201, %202 : vector<1x256xf32>
    %204 = arith.andi %199, %203 : vector<1x256xi1>
    %cst_78 = arith.constant 1.000000e+00 : f32
    %205 = vector.broadcast %cst_78 : f32 to vector<1x256xf32>
    %206 = arith.addf %11, %205 : vector<1x256xf32>
    %cst_79 = arith.constant 1.500000e+01 : f32
    %207 = vector.broadcast %cst_79 : f32 to vector<1x256xf32>
    %208 = arith.cmpf ole, %206, %207 : vector<1x256xf32>
    %209 = arith.andi %204, %208 : vector<1x256xi1>
    %210 = arith.extui %209 : vector<1x256xi1> to vector<1x256xi32>
    %211 = arith.sitofp %210 : vector<1x256xi32> to vector<1x256xf32>
    %212 = vector.broadcast %211 : vector<1x256xf32> to vector<4x256xf32>
    %213 = arith.mulf %190, %212 : vector<4x256xf32>
    %c64 = arith.constant 64 : index
    %c0_80 = arith.constant 0 : index
    %214 = vector.load %arg11[%c64, %c0_80] : memref<72x256xf32, #tpu.memory_space<vmem>>, vector<4x256xf32>
    tpu.vector_store %arg11[%c64, %c0_80], %213 {strides = array<i32>} : memref<72x256xf32, #tpu.memory_space<vmem>>, vector<4x256xf32>,
    %c0_81 = arith.constant 0 : index
    %c0_82 = arith.constant 0 : index
    %215 = vector.load %arg2[%c0_81, %c0_82] : memref<4x72xbf16, #tpu.memory_space<vmem>>, vector<4x72xbf16>
    %c0_83 = arith.constant 0 : index
    %c0_84 = arith.constant 0 : index
    %216 = vector.load %arg11[%c0_83, %c0_84] : memref<72x256xf32, #tpu.memory_space<vmem>>, vector<72x256xf32>
    %217 = arith.truncf %216 : vector<72x256xf32> to vector<72x256xbf16>
    %cst_85 = arith.constant dense<0.000000e+00> : vector<4x256xf32>
    %218 = tpu.matmul %215, %217, %cst_85 {dimension_numbers = #tpu.dot_dimension_numbers<[1], [0], [0], [1], [0, 0, 1, 1], [], []>} : vector<4x72xbf16>, vector<72x256xbf16>, vector<4x256xf32> -> vector<4x256xf32>
    %c0_86 = arith.constant 0 : index
    %c0_87 = arith.constant 0 : index
    %219 = vector.load %arg3[%c0_86, %c0_87] : memref<4x1xf32, #tpu.memory_space<vmem>>, vector<4x1xf32>
    %220 = vector.broadcast %219 : vector<4x1xf32> to vector<4x256xf32>
    %221 = arith.addf %218, %220 : vector<4x256xf32>
    %222 = arith.negf %221 : vector<4x256xf32>
    %223 = math.exp %222 : vector<4x256xf32>
    %cst_88 = arith.constant 1.000000e+00 : f32
    %224 = vector.broadcast %cst_88 : f32 to vector<4x256xf32>
    %225 = arith.addf %224, %223 : vector<4x256xf32>
    %226 = arith.divf %224, %225 : vector<4x256xf32>
    %227 = arith.mulf %221, %226 : vector<4x256xf32>
    %c0_89 = arith.constant 0 : index
    %c0_90 = arith.constant 0 : index
    %228 = vector.load %arg4[%c0_89, %c0_90] : memref<1x4xf32, #tpu.memory_space<vmem>>, vector<1x4xf32>
    %229 = vector.extract_strided_slice %228 {offsets = [0, 0], sizes = [1, 1], strides = [1, 1]} : vector<1x4xf32> to vector<1x1xf32>
    %230 = vector.extract_strided_slice %227 {offsets = [0, 0], sizes = [1, 256], strides = [1, 1]} : vector<4x256xf32> to vector<1x256xf32>
    %231 = vector.broadcast %229 : vector<1x1xf32> to vector<1x256xf32>
    %232 = arith.mulf %231, %230 : vector<1x256xf32>
    %233 = vector.extract_strided_slice %228 {offsets = [0, 1], sizes = [1, 1], strides = [1, 1]} : vector<1x4xf32> to vector<1x1xf32>
    %234 = vector.extract_strided_slice %227 {offsets = [1, 0], sizes = [1, 256], strides = [1, 1]} : vector<4x256xf32> to vector<1x256xf32>
    %235 = vector.broadcast %233 : vector<1x1xf32> to vector<1x256xf32>
    %236 = arith.mulf %235, %234 : vector<1x256xf32>
    %237 = arith.addf %232, %236 : vector<1x256xf32>
    %238 = vector.extract_strided_slice %228 {offsets = [0, 2], sizes = [1, 1], strides = [1, 1]} : vector<1x4xf32> to vector<1x1xf32>
    %239 = vector.extract_strided_slice %227 {offsets = [2, 0], sizes = [1, 256], strides = [1, 1]} : vector<4x256xf32> to vector<1x256xf32>
    %240 = vector.broadcast %238 : vector<1x1xf32> to vector<1x256xf32>
    %241 = arith.mulf %240, %239 : vector<1x256xf32>
    %242 = arith.addf %237, %241 : vector<1x256xf32>
    %243 = vector.extract_strided_slice %228 {offsets = [0, 3], sizes = [1, 1], strides = [1, 1]} : vector<1x4xf32> to vector<1x1xf32>
    %244 = vector.extract_strided_slice %227 {offsets = [3, 0], sizes = [1, 256], strides = [1, 1]} : vector<4x256xf32> to vector<1x256xf32>
    %245 = vector.broadcast %243 : vector<1x1xf32> to vector<1x256xf32>
    %246 = arith.mulf %245, %244 : vector<1x256xf32>
    %247 = arith.addf %242, %246 : vector<1x256xf32>
    %c0_91 = arith.constant 0 : index
    %c0_92 = arith.constant 0 : index
    %248 = vector.load %arg5[%c0_91, %c0_92] : memref<1x1xf32, #tpu.memory_space<vmem>>, vector<1x1xf32>
    %249 = vector.broadcast %248 : vector<1x1xf32> to vector<1x256xf32>
    %250 = arith.addf %247, %249 : vector<1x256xf32>
    %c17_i32_93 = arith.constant 17 : i32
    %251 = tpu.dynamic_rotate %250 by %c17_i32_93 dim 1 : vector<1x256xf32>, i32 -> vector<1x256xf32>
    %252 = arith.mulf %251, %35 : vector<1x256xf32>
    %c0_94 = arith.constant 0 : index
    %c0_95 = arith.constant 0 : index
    %253 = vector.load %arg12[%c0_94, %c0_95] : memref<8x256xf32, #tpu.memory_space<vmem>>, vector<1x256xf32>
    tpu.vector_store %arg12[%c0_94, %c0_95], %252 {strides = array<i32>} : memref<8x256xf32, #tpu.memory_space<vmem>>, vector<1x256xf32>,
    %c239_i32_96 = arith.constant 239 : i32
    %254 = tpu.dynamic_rotate %250 by %c239_i32_96 dim 1 : vector<1x256xf32>, i32 -> vector<1x256xf32>
    %255 = arith.mulf %254, %211 : vector<1x256xf32>
    %c0_97 = arith.constant 0 : index
    %c0_98 = arith.constant 0 : index
    %256 = vector.load %arg13[%c0_97, %c0_98] : memref<8x256xf32, #tpu.memory_space<vmem>>, vector<1x256xf32>
    tpu.vector_store %arg13[%c0_97, %c0_98], %255 {strides = array<i32>} : memref<8x256xf32, #tpu.memory_space<vmem>>, vector<1x256xf32>,
    %c16_i32_99 = arith.constant 16 : i32
    %257 = tpu.dynamic_rotate %250 by %c16_i32_99 dim 1 : vector<1x256xf32>, i32 -> vector<1x256xf32>
    %258 = arith.mulf %257, %60 : vector<1x256xf32>
    %c1 = arith.constant 1 : index
    %c0_100 = arith.constant 0 : index
    %259 = vector.load %arg12[%c1, %c0_100] : memref<8x256xf32, #tpu.memory_space<vmem>>, vector<1x256xf32>
    tpu.vector_store %arg12[%c1, %c0_100], %258 {strides = array<i32>} : memref<8x256xf32, #tpu.memory_space<vmem>>, vector<1x256xf32>,
    %c240_i32_101 = arith.constant 240 : i32
    %260 = tpu.dynamic_rotate %250 by %c240_i32_101 dim 1 : vector<1x256xf32>, i32 -> vector<1x256xf32>
    %261 = arith.mulf %260, %186 : vector<1x256xf32>
    %c1_102 = arith.constant 1 : index
    %c0_103 = arith.constant 0 : index
    %262 = vector.load %arg13[%c1_102, %c0_103] : memref<8x256xf32, #tpu.memory_space<vmem>>, vector<1x256xf32>
    tpu.vector_store %arg13[%c1_102, %c0_103], %261 {strides = array<i32>} : memref<8x256xf32, #tpu.memory_space<vmem>>, vector<1x256xf32>,
    %c15_i32_104 = arith.constant 15 : i32
    %263 = tpu.dynamic_rotate %250 by %c15_i32_104 dim 1 : vector<1x256xf32>, i32 -> vector<1x256xf32>
    %264 = arith.mulf %263, %85 : vector<1x256xf32>
    %c2 = arith.constant 2 : index
    %c0_105 = arith.constant 0 : index
    %265 = vector.load %arg12[%c2, %c0_105] : memref<8x256xf32, #tpu.memory_space<vmem>>, vector<1x256xf32>
    tpu.vector_store %arg12[%c2, %c0_105], %264 {strides = array<i32>} : memref<8x256xf32, #tpu.memory_space<vmem>>, vector<1x256xf32>,
    %c241_i32_106 = arith.constant 241 : i32
    %266 = tpu.dynamic_rotate %250 by %c241_i32_106 dim 1 : vector<1x256xf32>, i32 -> vector<1x256xf32>
    %267 = arith.mulf %266, %161 : vector<1x256xf32>
    %c2_107 = arith.constant 2 : index
    %c0_108 = arith.constant 0 : index
    %268 = vector.load %arg13[%c2_107, %c0_108] : memref<8x256xf32, #tpu.memory_space<vmem>>, vector<1x256xf32>
    tpu.vector_store %arg13[%c2_107, %c0_108], %267 {strides = array<i32>} : memref<8x256xf32, #tpu.memory_space<vmem>>, vector<1x256xf32>,
    %c1_i32_109 = arith.constant 1 : i32
    %269 = tpu.dynamic_rotate %250 by %c1_i32_109 dim 1 : vector<1x256xf32>, i32 -> vector<1x256xf32>
    %270 = arith.mulf %269, %110 : vector<1x256xf32>
    %c3 = arith.constant 3 : index
    %c0_110 = arith.constant 0 : index
    %271 = vector.load %arg12[%c3, %c0_110] : memref<8x256xf32, #tpu.memory_space<vmem>>, vector<1x256xf32>
    tpu.vector_store %arg12[%c3, %c0_110], %270 {strides = array<i32>} : memref<8x256xf32, #tpu.memory_space<vmem>>, vector<1x256xf32>,
    %c255_i32_111 = arith.constant 255 : i32
    %272 = tpu.dynamic_rotate %250 by %c255_i32_111 dim 1 : vector<1x256xf32>, i32 -> vector<1x256xf32>
    %273 = arith.mulf %272, %136 : vector<1x256xf32>
    %c3_112 = arith.constant 3 : index
    %c0_113 = arith.constant 0 : index
    %274 = vector.load %arg13[%c3_112, %c0_113] : memref<8x256xf32, #tpu.memory_space<vmem>>, vector<1x256xf32>
    tpu.vector_store %arg13[%c3_112, %c0_113], %273 {strides = array<i32>} : memref<8x256xf32, #tpu.memory_space<vmem>>, vector<1x256xf32>,
    %c51_i32 = arith.constant 51 : i32
    %275 = tpu.dynamic_rotate %250 by %c51_i32 dim 1 : vector<1x256xf32>, i32 -> vector<1x256xf32>
    %cst_114 = arith.constant -3.000000e+00 : f32
    %276 = vector.broadcast %cst_114 : f32 to vector<1x256xf32>
    %277 = arith.addf %8, %276 : vector<1x256xf32>
    %cst_115 = arith.constant 0.000000e+00 : f32
    %278 = vector.broadcast %cst_115 : f32 to vector<1x256xf32>
    %279 = arith.cmpf oge, %277, %278 : vector<1x256xf32>
    %cst_116 = arith.constant -3.000000e+00 : f32
    %280 = vector.broadcast %cst_116 : f32 to vector<1x256xf32>
    %281 = arith.addf %8, %280 : vector<1x256xf32>
    %cst_117 = arith.constant 1.500000e+01 : f32
    %282 = vector.broadcast %cst_117 : f32 to vector<1x256xf32>
    %283 = arith.cmpf ole, %281, %282 : vector<1x256xf32>
    %284 = arith.andi %279, %283 : vector<1x256xi1>
    %cst_118 = arith.constant -3.000000e+00 : f32
    %285 = vector.broadcast %cst_118 : f32 to vector<1x256xf32>
    %286 = arith.addf %11, %285 : vector<1x256xf32>
    %cst_119 = arith.constant 0.000000e+00 : f32
    %287 = vector.broadcast %cst_119 : f32 to vector<1x256xf32>
    %288 = arith.cmpf oge, %286, %287 : vector<1x256xf32>
    %289 = arith.andi %284, %288 : vector<1x256xi1>
    %cst_120 = arith.constant -3.000000e+00 : f32
    %290 = vector.broadcast %cst_120 : f32 to vector<1x256xf32>
    %291 = arith.addf %11, %290 : vector<1x256xf32>
    %cst_121 = arith.constant 1.500000e+01 : f32
    %292 = vector.broadcast %cst_121 : f32 to vector<1x256xf32>
    %293 = arith.cmpf ole, %291, %292 : vector<1x256xf32>
    %294 = arith.andi %289, %293 : vector<1x256xi1>
    %295 = arith.extui %294 : vector<1x256xi1> to vector<1x256xi32>
    %296 = arith.sitofp %295 : vector<1x256xi32> to vector<1x256xf32>
    %297 = arith.mulf %275, %296 : vector<1x256xf32>
    %c4 = arith.constant 4 : index
    %c0_122 = arith.constant 0 : index
    %298 = vector.load %arg12[%c4, %c0_122] : memref<8x256xf32, #tpu.memory_space<vmem>>, vector<1x256xf32>
    tpu.vector_store %arg12[%c4, %c0_122], %297 {strides = array<i32>} : memref<8x256xf32, #tpu.memory_space<vmem>>, vector<1x256xf32>,
    %c205_i32 = arith.constant 205 : i32
    %299 = tpu.dynamic_rotate %250 by %c205_i32 dim 1 : vector<1x256xf32>, i32 -> vector<1x256xf32>
    %cst_123 = arith.constant 3.000000e+00 : f32
    %300 = vector.broadcast %cst_123 : f32 to vector<1x256xf32>
    %301 = arith.addf %8, %300 : vector<1x256xf32>
    %cst_124 = arith.constant 0.000000e+00 : f32
    %302 = vector.broadcast %cst_124 : f32 to vector<1x256xf32>
    %303 = arith.cmpf oge, %301, %302 : vector<1x256xf32>
    %cst_125 = arith.constant 3.000000e+00 : f32
    %304 = vector.broadcast %cst_125 : f32 to vector<1x256xf32>
    %305 = arith.addf %8, %304 : vector<1x256xf32>
    %cst_126 = arith.constant 1.500000e+01 : f32
    %306 = vector.broadcast %cst_126 : f32 to vector<1x256xf32>
    %307 = arith.cmpf ole, %305, %306 : vector<1x256xf32>
    %308 = arith.andi %303, %307 : vector<1x256xi1>
    %cst_127 = arith.constant 3.000000e+00 : f32
    %309 = vector.broadcast %cst_127 : f32 to vector<1x256xf32>
    %310 = arith.addf %11, %309 : vector<1x256xf32>
    %cst_128 = arith.constant 0.000000e+00 : f32
    %311 = vector.broadcast %cst_128 : f32 to vector<1x256xf32>
    %312 = arith.cmpf oge, %310, %311 : vector<1x256xf32>
    %313 = arith.andi %308, %312 : vector<1x256xi1>
    %cst_129 = arith.constant 3.000000e+00 : f32
    %314 = vector.broadcast %cst_129 : f32 to vector<1x256xf32>
    %315 = arith.addf %11, %314 : vector<1x256xf32>
    %cst_130 = arith.constant 1.500000e+01 : f32
    %316 = vector.broadcast %cst_130 : f32 to vector<1x256xf32>
    %317 = arith.cmpf ole, %315, %316 : vector<1x256xf32>
    %318 = arith.andi %313, %317 : vector<1x256xi1>
    %319 = arith.extui %318 : vector<1x256xi1> to vector<1x256xi32>
    %320 = arith.sitofp %319 : vector<1x256xi32> to vector<1x256xf32>
    %321 = arith.mulf %299, %320 : vector<1x256xf32>
    %c4_131 = arith.constant 4 : index
    %c0_132 = arith.constant 0 : index
    %322 = vector.load %arg13[%c4_131, %c0_132] : memref<8x256xf32, #tpu.memory_space<vmem>>, vector<1x256xf32>
    tpu.vector_store %arg13[%c4_131, %c0_132], %321 {strides = array<i32>} : memref<8x256xf32, #tpu.memory_space<vmem>>, vector<1x256xf32>,
    %c48_i32 = arith.constant 48 : i32
    %323 = tpu.dynamic_rotate %250 by %c48_i32 dim 1 : vector<1x256xf32>, i32 -> vector<1x256xf32>
    %cst_133 = arith.constant -3.000000e+00 : f32
    %324 = vector.broadcast %cst_133 : f32 to vector<1x256xf32>
    %325 = arith.addf %8, %324 : vector<1x256xf32>
    %cst_134 = arith.constant 0.000000e+00 : f32
    %326 = vector.broadcast %cst_134 : f32 to vector<1x256xf32>
    %327 = arith.cmpf oge, %325, %326 : vector<1x256xf32>
    %cst_135 = arith.constant -3.000000e+00 : f32
    %328 = vector.broadcast %cst_135 : f32 to vector<1x256xf32>
    %329 = arith.addf %8, %328 : vector<1x256xf32>
    %cst_136 = arith.constant 1.500000e+01 : f32
    %330 = vector.broadcast %cst_136 : f32 to vector<1x256xf32>
    %331 = arith.cmpf ole, %329, %330 : vector<1x256xf32>
    %332 = arith.andi %327, %331 : vector<1x256xi1>
    %cst_137 = arith.constant 0.000000e+00 : f32
    %333 = vector.broadcast %cst_137 : f32 to vector<1x256xf32>
    %334 = arith.addf %11, %333 : vector<1x256xf32>
    %cst_138 = arith.constant 0.000000e+00 : f32
    %335 = vector.broadcast %cst_138 : f32 to vector<1x256xf32>
    %336 = arith.cmpf oge, %334, %335 : vector<1x256xf32>
    %337 = arith.andi %332, %336 : vector<1x256xi1>
    %cst_139 = arith.constant 0.000000e+00 : f32
    %338 = vector.broadcast %cst_139 : f32 to vector<1x256xf32>
    %339 = arith.addf %11, %338 : vector<1x256xf32>
    %cst_140 = arith.constant 1.500000e+01 : f32
    %340 = vector.broadcast %cst_140 : f32 to vector<1x256xf32>
    %341 = arith.cmpf ole, %339, %340 : vector<1x256xf32>
    %342 = arith.andi %337, %341 : vector<1x256xi1>
    %343 = arith.extui %342 : vector<1x256xi1> to vector<1x256xi32>
    %344 = arith.sitofp %343 : vector<1x256xi32> to vector<1x256xf32>
    %345 = arith.mulf %323, %344 : vector<1x256xf32>
    %c5 = arith.constant 5 : index
    %c0_141 = arith.constant 0 : index
    %346 = vector.load %arg12[%c5, %c0_141] : memref<8x256xf32, #tpu.memory_space<vmem>>, vector<1x256xf32>
    tpu.vector_store %arg12[%c5, %c0_141], %345 {strides = array<i32>} : memref<8x256xf32, #tpu.memory_space<vmem>>, vector<1x256xf32>,
    %c208_i32 = arith.constant 208 : i32
    %347 = tpu.dynamic_rotate %250 by %c208_i32 dim 1 : vector<1x256xf32>, i32 -> vector<1x256xf32>
    %cst_142 = arith.constant 3.000000e+00 : f32
    %348 = vector.broadcast %cst_142 : f32 to vector<1x256xf32>
    %349 = arith.addf %8, %348 : vector<1x256xf32>
    %cst_143 = arith.constant 0.000000e+00 : f32
    %350 = vector.broadcast %cst_143 : f32 to vector<1x256xf32>
    %351 = arith.cmpf oge, %349, %350 : vector<1x256xf32>
    %cst_144 = arith.constant 3.000000e+00 : f32
    %352 = vector.broadcast %cst_144 : f32 to vector<1x256xf32>
    %353 = arith.addf %8, %352 : vector<1x256xf32>
    %cst_145 = arith.constant 1.500000e+01 : f32
    %354 = vector.broadcast %cst_145 : f32 to vector<1x256xf32>
    %355 = arith.cmpf ole, %353, %354 : vector<1x256xf32>
    %356 = arith.andi %351, %355 : vector<1x256xi1>
    %cst_146 = arith.constant 0.000000e+00 : f32
    %357 = vector.broadcast %cst_146 : f32 to vector<1x256xf32>
    %358 = arith.addf %11, %357 : vector<1x256xf32>
    %cst_147 = arith.constant 0.000000e+00 : f32
    %359 = vector.broadcast %cst_147 : f32 to vector<1x256xf32>
    %360 = arith.cmpf oge, %358, %359 : vector<1x256xf32>
    %361 = arith.andi %356, %360 : vector<1x256xi1>
    %cst_148 = arith.constant 0.000000e+00 : f32
    %362 = vector.broadcast %cst_148 : f32 to vector<1x256xf32>
    %363 = arith.addf %11, %362 : vector<1x256xf32>
    %cst_149 = arith.constant 1.500000e+01 : f32
    %364 = vector.broadcast %cst_149 : f32 to vector<1x256xf32>
    %365 = arith.cmpf ole, %363, %364 : vector<1x256xf32>
    %366 = arith.andi %361, %365 : vector<1x256xi1>
    %367 = arith.extui %366 : vector<1x256xi1> to vector<1x256xi32>
    %368 = arith.sitofp %367 : vector<1x256xi32> to vector<1x256xf32>
    %369 = arith.mulf %347, %368 : vector<1x256xf32>
    %c5_150 = arith.constant 5 : index
    %c0_151 = arith.constant 0 : index
    %370 = vector.load %arg13[%c5_150, %c0_151] : memref<8x256xf32, #tpu.memory_space<vmem>>, vector<1x256xf32>
    tpu.vector_store %arg13[%c5_150, %c0_151], %369 {strides = array<i32>} : memref<8x256xf32, #tpu.memory_space<vmem>>, vector<1x256xf32>,
    %c45_i32 = arith.constant 45 : i32
    %371 = tpu.dynamic_rotate %250 by %c45_i32 dim 1 : vector<1x256xf32>, i32 -> vector<1x256xf32>
    %cst_152 = arith.constant -3.000000e+00 : f32
    %372 = vector.broadcast %cst_152 : f32 to vector<1x256xf32>
    %373 = arith.addf %8, %372 : vector<1x256xf32>
    %cst_153 = arith.constant 0.000000e+00 : f32
    %374 = vector.broadcast %cst_153 : f32 to vector<1x256xf32>
    %375 = arith.cmpf oge, %373, %374 : vector<1x256xf32>
    %cst_154 = arith.constant -3.000000e+00 : f32
    %376 = vector.broadcast %cst_154 : f32 to vector<1x256xf32>
    %377 = arith.addf %8, %376 : vector<1x256xf32>
    %cst_155 = arith.constant 1.500000e+01 : f32
    %378 = vector.broadcast %cst_155 : f32 to vector<1x256xf32>
    %379 = arith.cmpf ole, %377, %378 : vector<1x256xf32>
    %380 = arith.andi %375, %379 : vector<1x256xi1>
    %cst_156 = arith.constant 3.000000e+00 : f32
    %381 = vector.broadcast %cst_156 : f32 to vector<1x256xf32>
    %382 = arith.addf %11, %381 : vector<1x256xf32>
    %cst_157 = arith.constant 0.000000e+00 : f32
    %383 = vector.broadcast %cst_157 : f32 to vector<1x256xf32>
    %384 = arith.cmpf oge, %382, %383 : vector<1x256xf32>
    %385 = arith.andi %380, %384 : vector<1x256xi1>
    %cst_158 = arith.constant 3.000000e+00 : f32
    %386 = vector.broadcast %cst_158 : f32 to vector<1x256xf32>
    %387 = arith.addf %11, %386 : vector<1x256xf32>
    %cst_159 = arith.constant 1.500000e+01 : f32
    %388 = vector.broadcast %cst_159 : f32 to vector<1x256xf32>
    %389 = arith.cmpf ole, %387, %388 : vector<1x256xf32>
    %390 = arith.andi %385, %389 : vector<1x256xi1>
    %391 = arith.extui %390 : vector<1x256xi1> to vector<1x256xi32>
    %392 = arith.sitofp %391 : vector<1x256xi32> to vector<1x256xf32>
    %393 = arith.mulf %371, %392 : vector<1x256xf32>
    %c6 = arith.constant 6 : index
    %c0_160 = arith.constant 0 : index
    %394 = vector.load %arg12[%c6, %c0_160] : memref<8x256xf32, #tpu.memory_space<vmem>>, vector<1x256xf32>
    tpu.vector_store %arg12[%c6, %c0_160], %393 {strides = array<i32>} : memref<8x256xf32, #tpu.memory_space<vmem>>, vector<1x256xf32>,
    %c211_i32 = arith.constant 211 : i32
    %395 = tpu.dynamic_rotate %250 by %c211_i32 dim 1 : vector<1x256xf32>, i32 -> vector<1x256xf32>
    %cst_161 = arith.constant 3.000000e+00 : f32
    %396 = vector.broadcast %cst_161 : f32 to vector<1x256xf32>
    %397 = arith.addf %8, %396 : vector<1x256xf32>
    %cst_162 = arith.constant 0.000000e+00 : f32
    %398 = vector.broadcast %cst_162 : f32 to vector<1x256xf32>
    %399 = arith.cmpf oge, %397, %398 : vector<1x256xf32>
    %cst_163 = arith.constant 3.000000e+00 : f32
    %400 = vector.broadcast %cst_163 : f32 to vector<1x256xf32>
    %401 = arith.addf %8, %400 : vector<1x256xf32>
    %cst_164 = arith.constant 1.500000e+01 : f32
    %402 = vector.broadcast %cst_164 : f32 to vector<1x256xf32>
    %403 = arith.cmpf ole, %401, %402 : vector<1x256xf32>
    %404 = arith.andi %399, %403 : vector<1x256xi1>
    %cst_165 = arith.constant -3.000000e+00 : f32
    %405 = vector.broadcast %cst_165 : f32 to vector<1x256xf32>
    %406 = arith.addf %11, %405 : vector<1x256xf32>
    %cst_166 = arith.constant 0.000000e+00 : f32
    %407 = vector.broadcast %cst_166 : f32 to vector<1x256xf32>
    %408 = arith.cmpf oge, %406, %407 : vector<1x256xf32>
    %409 = arith.andi %404, %408 : vector<1x256xi1>
    %cst_167 = arith.constant -3.000000e+00 : f32
    %410 = vector.broadcast %cst_167 : f32 to vector<1x256xf32>
    %411 = arith.addf %11, %410 : vector<1x256xf32>
    %cst_168 = arith.constant 1.500000e+01 : f32
    %412 = vector.broadcast %cst_168 : f32 to vector<1x256xf32>
    %413 = arith.cmpf ole, %411, %412 : vector<1x256xf32>
    %414 = arith.andi %409, %413 : vector<1x256xi1>
    %415 = arith.extui %414 : vector<1x256xi1> to vector<1x256xi32>
    %416 = arith.sitofp %415 : vector<1x256xi32> to vector<1x256xf32>
    %417 = arith.mulf %395, %416 : vector<1x256xf32>
    %c6_169 = arith.constant 6 : index
    %c0_170 = arith.constant 0 : index
    %418 = vector.load %arg13[%c6_169, %c0_170] : memref<8x256xf32, #tpu.memory_space<vmem>>, vector<1x256xf32>
    tpu.vector_store %arg13[%c6_169, %c0_170], %417 {strides = array<i32>} : memref<8x256xf32, #tpu.memory_space<vmem>>, vector<1x256xf32>,
    %c3_i32 = arith.constant 3 : i32
    %419 = tpu.dynamic_rotate %250 by %c3_i32 dim 1 : vector<1x256xf32>, i32 -> vector<1x256xf32>
    %cst_171 = arith.constant 0.000000e+00 : f32
    %420 = vector.broadcast %cst_171 : f32 to vector<1x256xf32>
    %421 = arith.addf %8, %420 : vector<1x256xf32>
    %cst_172 = arith.constant 0.000000e+00 : f32
    %422 = vector.broadcast %cst_172 : f32 to vector<1x256xf32>
    %423 = arith.cmpf oge, %421, %422 : vector<1x256xf32>
    %cst_173 = arith.constant 0.000000e+00 : f32
    %424 = vector.broadcast %cst_173 : f32 to vector<1x256xf32>
    %425 = arith.addf %8, %424 : vector<1x256xf32>
    %cst_174 = arith.constant 1.500000e+01 : f32
    %426 = vector.broadcast %cst_174 : f32 to vector<1x256xf32>
    %427 = arith.cmpf ole, %425, %426 : vector<1x256xf32>
    %428 = arith.andi %423, %427 : vector<1x256xi1>
    %cst_175 = arith.constant -3.000000e+00 : f32
    %429 = vector.broadcast %cst_175 : f32 to vector<1x256xf32>
    %430 = arith.addf %11, %429 : vector<1x256xf32>
    %cst_176 = arith.constant 0.000000e+00 : f32
    %431 = vector.broadcast %cst_176 : f32 to vector<1x256xf32>
    %432 = arith.cmpf oge, %430, %431 : vector<1x256xf32>
    %433 = arith.andi %428, %432 : vector<1x256xi1>
    %cst_177 = arith.constant -3.000000e+00 : f32
    %434 = vector.broadcast %cst_177 : f32 to vector<1x256xf32>
    %435 = arith.addf %11, %434 : vector<1x256xf32>
    %cst_178 = arith.constant 1.500000e+01 : f32
    %436 = vector.broadcast %cst_178 : f32 to vector<1x256xf32>
    %437 = arith.cmpf ole, %435, %436 : vector<1x256xf32>
    %438 = arith.andi %433, %437 : vector<1x256xi1>
    %439 = arith.extui %438 : vector<1x256xi1> to vector<1x256xi32>
    %440 = arith.sitofp %439 : vector<1x256xi32> to vector<1x256xf32>
    %441 = arith.mulf %419, %440 : vector<1x256xf32>
    %c7 = arith.constant 7 : index
    %c0_179 = arith.constant 0 : index
    %442 = vector.load %arg12[%c7, %c0_179] : memref<8x256xf32, #tpu.memory_space<vmem>>, vector<1x256xf32>
    tpu.vector_store %arg12[%c7, %c0_179], %441 {strides = array<i32>} : memref<8x256xf32, #tpu.memory_space<vmem>>, vector<1x256xf32>,
    %c253_i32 = arith.constant 253 : i32
    %443 = tpu.dynamic_rotate %250 by %c253_i32 dim 1 : vector<1x256xf32>, i32 -> vector<1x256xf32>
    %cst_180 = arith.constant 0.000000e+00 : f32
    %444 = vector.broadcast %cst_180 : f32 to vector<1x256xf32>
    %445 = arith.addf %8, %444 : vector<1x256xf32>
    %cst_181 = arith.constant 0.000000e+00 : f32
    %446 = vector.broadcast %cst_181 : f32 to vector<1x256xf32>
    %447 = arith.cmpf oge, %445, %446 : vector<1x256xf32>
    %cst_182 = arith.constant 0.000000e+00 : f32
    %448 = vector.broadcast %cst_182 : f32 to vector<1x256xf32>
    %449 = arith.addf %8, %448 : vector<1x256xf32>
    %cst_183 = arith.constant 1.500000e+01 : f32
    %450 = vector.broadcast %cst_183 : f32 to vector<1x256xf32>
    %451 = arith.cmpf ole, %449, %450 : vector<1x256xf32>
    %452 = arith.andi %447, %451 : vector<1x256xi1>
    %cst_184 = arith.constant 3.000000e+00 : f32
    %453 = vector.broadcast %cst_184 : f32 to vector<1x256xf32>
    %454 = arith.addf %11, %453 : vector<1x256xf32>
    %cst_185 = arith.constant 0.000000e+00 : f32
    %455 = vector.broadcast %cst_185 : f32 to vector<1x256xf32>
    %456 = arith.cmpf oge, %454, %455 : vector<1x256xf32>
    %457 = arith.andi %452, %456 : vector<1x256xi1>
    %cst_186 = arith.constant 3.000000e+00 : f32
    %458 = vector.broadcast %cst_186 : f32 to vector<1x256xf32>
    %459 = arith.addf %11, %458 : vector<1x256xf32>
    %cst_187 = arith.constant 1.500000e+01 : f32
    %460 = vector.broadcast %cst_187 : f32 to vector<1x256xf32>
    %461 = arith.cmpf ole, %459, %460 : vector<1x256xf32>
    %462 = arith.andi %457, %461 : vector<1x256xi1>
    %463 = arith.extui %462 : vector<1x256xi1> to vector<1x256xi32>
    %464 = arith.sitofp %463 : vector<1x256xi32> to vector<1x256xf32>
    %465 = arith.mulf %443, %464 : vector<1x256xf32>
    %c7_188 = arith.constant 7 : index
    %c0_189 = arith.constant 0 : index
    %466 = vector.load %arg13[%c7_188, %c0_189] : memref<8x256xf32, #tpu.memory_space<vmem>>, vector<1x256xf32>
    tpu.vector_store %arg13[%c7_188, %c0_189], %465 {strides = array<i32>} : memref<8x256xf32, #tpu.memory_space<vmem>>, vector<1x256xf32>,
    %c0_190 = arith.constant 0 : index
    %c0_191 = arith.constant 0 : index
    %467 = vector.load %arg12[%c0_190, %c0_191] : memref<8x256xf32, #tpu.memory_space<vmem>>, vector<4x256xf32>
    %c0_192 = arith.constant 0 : index
    %c0_193 = arith.constant 0 : index
    %468 = vector.load %arg13[%c0_192, %c0_193] : memref<8x256xf32, #tpu.memory_space<vmem>>, vector<4x256xf32>
    %469 = vector.broadcast %250 : vector<1x256xf32> to vector<4x256xf32>
    %470 = arith.subf %469, %467 : vector<4x256xf32>
    %471 = vector.broadcast %250 : vector<1x256xf32> to vector<4x256xf32>
    %472 = arith.subf %471, %468 : vector<4x256xf32>
    %473 = arith.mulf %470, %472 : vector<4x256xf32>
    %cst_194 = arith.constant dense<0x7F800000> : vector<256xf32>
    %474 = vector.multi_reduction <minimumf>, %473, %cst_194 [0] : vector<4x256xf32> to vector<256xf32>
    %475 = vector.shape_cast %474 : vector<256xf32> to vector<1x256xf32>
    %c4_195 = arith.constant 4 : index
    %c0_196 = arith.constant 0 : index
    %476 = vector.load %arg12[%c4_195, %c0_196] : memref<8x256xf32, #tpu.memory_space<vmem>>, vector<4x256xf32>
    %c4_197 = arith.constant 4 : index
    %c0_198 = arith.constant 0 : index
    %477 = vector.load %arg13[%c4_197, %c0_198] : memref<8x256xf32, #tpu.memory_space<vmem>>, vector<4x256xf32>
    %478 = vector.broadcast %250 : vector<1x256xf32> to vector<4x256xf32>
    %479 = arith.subf %478, %476 : vector<4x256xf32>
    %480 = vector.broadcast %250 : vector<1x256xf32> to vector<4x256xf32>
    %481 = arith.subf %480, %477 : vector<4x256xf32>
    %482 = arith.mulf %479, %481 : vector<4x256xf32>
    %cst_199 = arith.constant dense<0x7F800000> : vector<256xf32>
    %483 = vector.multi_reduction <minimumf>, %482, %cst_199 [0] : vector<4x256xf32> to vector<256xf32>
    %484 = vector.shape_cast %483 : vector<256xf32> to vector<1x256xf32>
    %485 = arith.maximumf %475, %484 : vector<1x256xf32>
    %486 = arith.addf %475, %484 : vector<1x256xf32>
    %cst_200 = arith.constant 5.000000e-01 : f32
    %487 = vector.broadcast %cst_200 : f32 to vector<1x256xf32>
    %488 = arith.mulf %486, %487 : vector<1x256xf32>
    %489 = arith.addf %485, %488 : vector<1x256xf32>
    %cst_201 = arith.constant 5.000000e-01 : f32
    %490 = vector.broadcast %cst_201 : f32 to vector<1x256xf32>
    %491 = arith.mulf %489, %490 : vector<1x256xf32>
    %cst_202 = arith.constant 0.000000e+00 : f32
    %492 = vector.broadcast %cst_202 : f32 to vector<1x256xf32>
    %493 = arith.maximumf %491, %492 : vector<1x256xf32>
    %494 = arith.negf %493 : vector<1x256xf32>
    %495 = math.exp %494 : vector<1x256xf32>
    %cst_203 = arith.constant 1.000000e+00 : f32
    %496 = vector.broadcast %cst_203 : f32 to vector<1x256xf32>
    %497 = arith.addf %496, %495 : vector<1x256xf32>
    %498 = arith.divf %496, %497 : vector<1x256xf32>
    %499 = vector.broadcast %498 : vector<1x256xf32> to vector<4x256xf32>
    %500 = arith.mulf %499, %1 : vector<4x256xf32>
    %c0_204 = arith.constant 0 : index
    %c0_205 = arith.constant 0 : index
    %501 = vector.load %arg6[%c0_204, %c0_205] : memref<2x4xf32, #tpu.memory_space<vmem>>, vector<2x4xf32>
    %502 = vector.extract_strided_slice %501 {offsets = [0, 0], sizes = [2, 1], strides = [1, 1]} : vector<2x4xf32> to vector<2x1xf32>
    %503 = vector.extract_strided_slice %500 {offsets = [0, 0], sizes = [1, 256], strides = [1, 1]} : vector<4x256xf32> to vector<1x256xf32>
    %504 = vector.broadcast %502 : vector<2x1xf32> to vector<2x256xf32>
    %505 = vector.broadcast %503 : vector<1x256xf32> to vector<2x256xf32>
    %506 = arith.mulf %504, %505 : vector<2x256xf32>
    %507 = vector.extract_strided_slice %501 {offsets = [0, 1], sizes = [2, 1], strides = [1, 1]} : vector<2x4xf32> to vector<2x1xf32>
    %508 = vector.extract_strided_slice %500 {offsets = [1, 0], sizes = [1, 256], strides = [1, 1]} : vector<4x256xf32> to vector<1x256xf32>
    %509 = vector.broadcast %507 : vector<2x1xf32> to vector<2x256xf32>
    %510 = vector.broadcast %508 : vector<1x256xf32> to vector<2x256xf32>
    %511 = arith.mulf %509, %510 : vector<2x256xf32>
    %512 = arith.addf %506, %511 : vector<2x256xf32>
    %513 = vector.extract_strided_slice %501 {offsets = [0, 2], sizes = [2, 1], strides = [1, 1]} : vector<2x4xf32> to vector<2x1xf32>
    %514 = vector.extract_strided_slice %500 {offsets = [2, 0], sizes = [1, 256], strides = [1, 1]} : vector<4x256xf32> to vector<1x256xf32>
    %515 = vector.broadcast %513 : vector<2x1xf32> to vector<2x256xf32>
    %516 = vector.broadcast %514 : vector<1x256xf32> to vector<2x256xf32>
    %517 = arith.mulf %515, %516 : vector<2x256xf32>
    %518 = arith.addf %512, %517 : vector<2x256xf32>
    %519 = vector.extract_strided_slice %501 {offsets = [0, 3], sizes = [2, 1], strides = [1, 1]} : vector<2x4xf32> to vector<2x1xf32>
    %520 = vector.extract_strided_slice %500 {offsets = [3, 0], sizes = [1, 256], strides = [1, 1]} : vector<4x256xf32> to vector<1x256xf32>
    %521 = vector.broadcast %519 : vector<2x1xf32> to vector<2x256xf32>
    %522 = vector.broadcast %520 : vector<1x256xf32> to vector<2x256xf32>
    %523 = arith.mulf %521, %522 : vector<2x256xf32>
    %524 = arith.addf %518, %523 : vector<2x256xf32>
    %c0_206 = arith.constant 0 : index
    %c0_207 = arith.constant 0 : index
    %525 = vector.load %arg7[%c0_206, %c0_207] : memref<2x1xf32, #tpu.memory_space<vmem>>, vector<2x1xf32>
    %526 = vector.broadcast %525 : vector<2x1xf32> to vector<2x256xf32>
    %527 = arith.addf %524, %526 : vector<2x256xf32>
    %528 = arith.negf %527 : vector<2x256xf32>
    %529 = math.exp %528 : vector<2x256xf32>
    %cst_208 = arith.constant 1.000000e+00 : f32
    %530 = vector.broadcast %cst_208 : f32 to vector<2x256xf32>
    %531 = arith.addf %530, %529 : vector<2x256xf32>
    %532 = arith.divf %530, %531 : vector<2x256xf32>
    %533 = arith.mulf %527, %532 : vector<2x256xf32>
    %c0_209 = arith.constant 0 : index
    %c0_210 = arith.constant 0 : index
    %534 = vector.load %arg8[%c0_209, %c0_210] : memref<4x2xf32, #tpu.memory_space<vmem>>, vector<4x2xf32>
    %535 = vector.extract_strided_slice %534 {offsets = [0, 0], sizes = [4, 1], strides = [1, 1]} : vector<4x2xf32> to vector<4x1xf32>
    %536 = vector.extract_strided_slice %533 {offsets = [0, 0], sizes = [1, 256], strides = [1, 1]} : vector<2x256xf32> to vector<1x256xf32>
    %537 = vector.broadcast %535 : vector<4x1xf32> to vector<4x256xf32>
    %538 = vector.broadcast %536 : vector<1x256xf32> to vector<4x256xf32>
    %539 = arith.mulf %537, %538 : vector<4x256xf32>
    %540 = vector.extract_strided_slice %534 {offsets = [0, 1], sizes = [4, 1], strides = [1, 1]} : vector<4x2xf32> to vector<4x1xf32>
    %541 = vector.extract_strided_slice %533 {offsets = [1, 0], sizes = [1, 256], strides = [1, 1]} : vector<2x256xf32> to vector<1x256xf32>
    %542 = vector.broadcast %540 : vector<4x1xf32> to vector<4x256xf32>
    %543 = vector.broadcast %541 : vector<1x256xf32> to vector<4x256xf32>
    %544 = arith.mulf %542, %543 : vector<4x256xf32>
    %545 = arith.addf %539, %544 : vector<4x256xf32>
    %c0_211 = arith.constant 0 : index
    %c0_212 = arith.constant 0 : index
    %546 = vector.load %arg9[%c0_211, %c0_212] : memref<4x1xf32, #tpu.memory_space<vmem>>, vector<4x1xf32>
    %547 = vector.broadcast %546 : vector<4x1xf32> to vector<4x256xf32>
    %548 = arith.addf %545, %547 : vector<4x256xf32>
    %549 = arith.negf %548 : vector<4x256xf32>
    %550 = math.exp %549 : vector<4x256xf32>
    %cst_213 = arith.constant 1.000000e+00 : f32
    %551 = vector.broadcast %cst_213 : f32 to vector<4x256xf32>
    %552 = arith.addf %551, %550 : vector<4x256xf32>
    %553 = arith.divf %551, %552 : vector<4x256xf32>
    %cst_214 = arith.constant 1.000000e+00 : f32
    %554 = vector.broadcast %cst_214 : f32 to vector<4x256xf32>
    %555 = arith.addf %553, %554 : vector<4x256xf32>
    %556 = arith.mulf %1, %555 : vector<4x256xf32>
    %c0_215 = arith.constant 0 : index
    %c0_216 = arith.constant 0 : index
    %c0_217 = arith.constant 0 : index
    %557 = vector.load %arg10[%c0_215, %c0_216, %c0_217] : memref<1x4x256xf32, #tpu.memory_space<vmem>>, vector<1x4x256xf32>
    %558 = vector.shape_cast %557 : vector<1x4x256xf32> to vector<4x256xf32>
    %559 = vector.shape_cast %556 : vector<4x256xf32> to vector<1x4x256xf32>
    tpu.vector_store %arg10[%c0_215, %c0_216, %c0_217], %559 {strides = array<i32>} : memref<1x4x256xf32, #tpu.memory_space<vmem>>, vector<1x4x256xf32>,
    return
  }
  func.func @transform_0(%arg0: i32) -> (i32, i32, i32) {
    %c0_i32 = arith.constant 0 : i32
    %c0_i32_0 = arith.constant 0 : i32
    %c0_i32_1 = arith.constant 0 : i32
    return %arg0, %c0_i32, %c0_i32_0 : i32, i32, i32
  }
  func.func @transform_1(%arg0: i32) -> (i32, i32) {
    %c0_i32 = arith.constant 0 : i32
    %c0_i32_0 = arith.constant 0 : i32
    %c0_i32_1 = arith.constant 0 : i32
    return %c0_i32, %c0_i32_0 : i32, i32
  }
  func.func @transform_2(%arg0: i32) -> (i32, i32) {
    %c0_i32 = arith.constant 0 : i32
    %c0_i32_0 = arith.constant 0 : i32
    %c0_i32_1 = arith.constant 0 : i32
    return %c0_i32, %c0_i32_0 : i32, i32
  }
  func.func @transform_3(%arg0: i32) -> (i32, i32) {
    %c0_i32 = arith.constant 0 : i32
    %c0_i32_0 = arith.constant 0 : i32
    %c0_i32_1 = arith.constant 0 : i32
    return %c0_i32, %c0_i32_0 : i32, i32
  }
  func.func @transform_4(%arg0: i32) -> (i32, i32) {
    %c0_i32 = arith.constant 0 : i32
    %c0_i32_0 = arith.constant 0 : i32
    %c0_i32_1 = arith.constant 0 : i32
    return %c0_i32, %c0_i32_0 : i32, i32
  }
  func.func @transform_5(%arg0: i32) -> (i32, i32) {
    %c0_i32 = arith.constant 0 : i32
    %c0_i32_0 = arith.constant 0 : i32
    %c0_i32_1 = arith.constant 0 : i32
    return %c0_i32, %c0_i32_0 : i32, i32
  }
  func.func @transform_6(%arg0: i32) -> (i32, i32) {
    %c0_i32 = arith.constant 0 : i32
    %c0_i32_0 = arith.constant 0 : i32
    %c0_i32_1 = arith.constant 0 : i32
    return %c0_i32, %c0_i32_0 : i32, i32
  }
  func.func @transform_7(%arg0: i32) -> (i32, i32) {
    %c0_i32 = arith.constant 0 : i32
    %c0_i32_0 = arith.constant 0 : i32
    %c0_i32_1 = arith.constant 0 : i32
    return %c0_i32, %c0_i32_0 : i32, i32
  }
  func.func @transform_8(%arg0: i32) -> (i32, i32) {
    %c0_i32 = arith.constant 0 : i32
    %c0_i32_0 = arith.constant 0 : i32
    %c0_i32_1 = arith.constant 0 : i32
    return %c0_i32, %c0_i32_0 : i32, i32
  }
  func.func @transform_9(%arg0: i32) -> (i32, i32, i32) {
    %c0_i32 = arith.constant 0 : i32
    %c0_i32_0 = arith.constant 0 : i32
    %c0_i32_1 = arith.constant 0 : i32
    return %arg0, %c0_i32, %c0_i32_0 : i32, i32, i32
  }
}

</mosaic_0001>

<bundles_post_ra>
// kernel: mlc_forward.1
= control target key start
LH: loop header
LB: loop body
LE: loop exit
PB: predicated region body
PF: predicated region fallthrough
CT: control target
= control target key end

     0   :  { %s1812_s11 = smov 0   ;;  %s2772_s0 = inlined_call_operand.vmem [shape: f32[2,4,256], index: 0, kind: input, shape index: {}]   ;;  %s2773_s1 = inlined_call_operand.vmem [shape: bf16[4,72], index: 1, kind: input, shape index: {}]   ;;  %s2774_s2 = inlined_call_operand.vmem [shape: f32[4,1], index: 2, kind: input, shape index: {}]   ;;  %s2775_s3 = inlined_call_operand.vmem [shape: f32[1,4], index: 3, kind: input, shape index: {}]   ;;  %s2776_s4 = inlined_call_operand.<no memory space> [shape: f32[1,1], index: 4, kind: input, shape index: {}]   ;;  %s2777_s5 = inlined_call_operand.vmem [shape: f32[2,4], index: 5, kind: input, shape index: {}]   ;;  %s2778_s6 = inlined_call_operand.vmem [shape: f32[2,1], index: 6, kind: input, shape index: {}]   ;;  %s2779_s7 = inlined_call_operand.vmem [shape: f32[4,2], index: 7, kind: input, shape index: {}]   ;;  %s2780_s8 = inlined_call_operand.vmem [shape: f32[4,1], index: 8, kind: input, shape index: {}]   ;;  %s2781_s9 = inlined_call_operand.vmem [shape: f32[2,4,256], index: 9, kind: output, shape index: {}]  }
   0x1   :  { %v14_v0 = vstv %s2776_s4 }
   0x2   :  { %15 = vst [vmem:[#allocation5] sm:$0x1] %v14_v0 }
   0x3 LB: > { %s1598_s12 = sadd.s32 4294967295, %s1735_s11   ;;  %p1602_p0 = scmp.ge.s32.totalorder %s1735_s11, 1  ;;  %s1735_s11 = sphi %s1812_s11, %s21_s11  }
   0x4   : > { %p289_p1 = scmp.lt.s32.totalorder %s1735_s11, 3 }
   0x6   : > { %p290_p2 = pnand %p1602_p0, %p289_p1 }
   0x7   : > { %p1820_p3 = scmp.lt.s32.totalorder (!%p290_p2), %s1598_s12, 1  ;;  %v1737_v1 = vmov (!%p290_p2), 0.0   ;;  %s1738_s17 = smov (!%p290_p2), 16   ;;  %v1746_v4 = vmov (!%p290_p2), 0   ;;  %v598_v5 = vld [vmem:[%s2774_s2] sm:$0xf] (!%p290_p2)  ;;  %v337_v11 = vlaneseq (!%p290_p2) }
   0x8   : > { %293 = sbr.rel (%p290_p2) target bundleno = 763 (0x2fb), region = 56  ;;  %354 = vst [vmem:[#allocation2 + $0x10] sm:$0xff] (!%p290_p2), %v1737_v1  ;;  %355 = vst [vmem:[#allocation2 + $0x18] sm:$0xff] (!%p290_p2), %v1737_v1  ;;  %s1739_s18 = smov (!%p290_p2), 17   ;;  %647 = vmatprep.mubr.bf16.mxu0 (!%p290_p2), %v1746_v4  ;;  %1683 = vset.pattern.permute.xlu0 (!%p290_p2), %v1746_v4  ;;  %v670_v6 = vld [vmem:[%s2775_s3] sm:$0x1] (!%p290_p2) }
   0x9   : > { %352 = vst [vmem:[#allocation2] sm:$0xff] (!%p290_p2), %v1737_v1  ;;  %353 = vst [vmem:[#allocation2 + $0x8] sm:$0xff] (!%p290_p2), %v1737_v1  ;;  %s1740_s19 = smov (!%p290_p2), 15   ;;  %s1741_s20 = smov (!%p290_p2), 1   ;;  %v1747_v7 = vmov (!%p290_p2), 1   ;;  %v1748_v8 = vmov (!%p290_p2), 2  }
   0xa   : > { %356 = vst [vmem:[#allocation2 + $0x20] sm:$0xff] (!%p290_p2), %v1737_v1  ;;  %357 = vst [vmem:[#allocation2 + $0x28] sm:$0xff] (!%p290_p2), %v1737_v1  ;;  %s1742_s21 = smov (!%p290_p2), 127   ;;  %s1743_s22 = smov (!%p290_p2), 113   ;;  %1684 = vset.pattern.permute.xlu1 (!%p290_p2), %v1747_v7  ;;  %v1749_v9 = vmov (!%p290_p2), 3   ;;  %v1908_v12 = vand.u32 (!%p290_p2), 127, %v337_v11 }
   0xb   : > { %358 = vst [vmem:[#allocation2 + $0x30] sm:$0xff] (!%p290_p2), %v1737_v1  ;;  %359 = vst [vmem:[#allocation2 + $0x38] sm:$0xff] (!%p290_p2), %v1737_v1  ;;  %s1744_s23 = smov (!%p290_p2), 112   ;;  %s1745_s24 = smov (!%p290_p2), 111   ;;  %v736_v10 = vld [vmem:[#allocation5] sm:$0x1] (!%p290_p2) }
   0xc   : > { %360 = vst [vmem:[#allocation2 + $0x40] sm:$0xff] (!%p290_p2), %v1737_v1  ;;  %361 = vst [vmem:[#allocation2 + $0x48] sm:$0xff] (!%p290_p2), %v1737_v1  ;;  %v339_v13 = vadd.s32 (!%p290_p2), 128, %v1908_v12  ;;  %v340_v14 = vcvt.s32.f32 (!%p290_p2), %v1908_v12  ;;  %v2810_v36 = vmov (!%p290_p2), 0  ;;  %v2819_v39 = vmov (!%p290_p2), 0  ;;  %s1750_s10 = smov (!%p290_p2), 51  }
   0xd   : > { %362 = vst [vmem:[#allocation2 + $0x50] sm:$0xff] (!%p290_p2), %v1737_v1  ;;  %363 = vst [vmem:[#allocation2 + $0x58] sm:$0xff] (!%p290_p2), %v1737_v1  ;;  %s1751_s13 = smov (!%p290_p2), 77   ;;  %s1752_s14 = smov (!%p290_p2), 48  }
   0xe   : > { %364 = vst [vmem:[#allocation2 + $0x60] sm:$0xff] (!%p290_p2), %v1737_v1  ;;  %365 = vst [vmem:[#allocation2 + $0x68] sm:$0xff] (!%p290_p2), %v1737_v1  ;;  %v341_v15 = vcvt.s32.f32 (!%p290_p2), %v339_v13  ;;  %v342_v16 = vadd.f32 (!%p290_p2), 0.5, %v340_v14  ;;  %s1753_s15 = smov (!%p290_p2), 80  }
   0xf   : > { %366 = vst [vmem:[#allocation2 + $0x70] sm:$0xff] %v1737_v1  ;;  %367 = vst [vmem:[#allocation2 + $0x78] sm:$0xff] %v1737_v1  ;;  %s2959_s12 = smov (!%p1820_p3, %s1598_s12), 1 }
  0x10   : > { %368 = vst [vmem:[#allocation2 + $0x80] sm:$0xff] %v1737_v1  ;;  %369 = vst [vmem:[#allocation2 + $0x88] sm:$0xff] %v1737_v1  ;;  %s1651_s4 = sshll.u32 %s2959_s12, 3  ;;  %v343_v17 = vadd.f32 0.5, %v341_v15  ;;  %v344_v18 = vmul.f32 0.0625, %v342_v16 }
  0x11   : > { %s329_s16 = scalar_lea.vmem %s2772_s0, %s1651_s4  ;;  %s334_s30 = scalar_lea.vmem %s2781_s9, %s1651_s4 }
  0x12   : > { %v1852_v2 = vld [vmem:[%s329_s16] sm:$0xff]  ;;  %v345_v19 = vmul.f32 0.0625, %v343_v17  ;;  %v1912_v20 = vfloor.f32 %v344_v18  ;;  %s1754_s16 = smov 45  }
  0x13   : > { %406 = vrot.lane.b32.xlu1 %v1852_v2, %s1738_s17  ;;  %373 = vrot.lane.b32.xlu0 %v1852_v2, %s1739_s18  ;;  %v1860_v3 = vcombine.high %v1852_v2, %v1852_v2  ;;  %483 = vst [vmem:[#allocation2 + $0x40] sm:$0xf] %v1852_v2 }
  0x14   : > { %v1914_v21 = vfloor.f32 %v345_v19  ;;  %v348_v22 = vmul.f32 16.0, %v1912_v20  ;;  %v380_v24 = vadd.f32 -1.0, %v1912_v20  ;;  %vm465_vm4 = vcmp.ge.f32.partialorder %v1912_v20, 0.0 }
  0x15   : > { %484 = vst [vmem:[#allocation2 + $0x48] sm:$0xf] %v1860_v3  ;;  %vm467_vm5 = vcmp.le.f32.partialorder %v1912_v20, 15.0  ;;  %v511_v43 = vadd.f32 1.0, %v1912_v20 }
  0x16   : > { %v349_v23 = vmul.f32 16.0, %v1914_v21  ;;  %v381_v25 = vadd.f32 -1.0, %v1914_v21  ;;  %v1920_v26 = vsub.f32 %v340_v14, %v348_v22  ;;  %vm382_vm0 = vcmp.ge.f32.partialorder %v380_v24, 0.0  ;;  %vm1946_vm11 = vmand %vm465_vm4, %vm467_vm5 }
  0x17   : > { %431 = vrot.lane.b32.xlu0 %v1852_v2, %s1740_s19  ;;  %408 = vrot.lane.b32.xlu1 %v1860_v3, %s1738_s17  ;;  %vm384_vm1 = vcmp.le.f32.partialorder %v380_v24, 15.0  ;;  %vm468_vm4 = vcmp.le.f32.partialorder %v1914_v21, 15.0  ;;  %v512_v45 = vadd.f32 1.0, %v1914_v21 }
  0x18   : > { %v1922_v27 = vsub.f32 %v341_v15, %v349_v23  ;;  %vm383_vm2 = vcmp.ge.f32.partialorder %v381_v25, 0.0  ;;  %vm385_vm3 = vcmp.le.f32.partialorder %v381_v25, 15.0  ;;  %v1925_v28 = vadd.f32 1.0, %v1920_v26  ;;  %vm1932_vm6 = vmand %vm382_vm0, %vm384_vm1 }
  0x19   : > { %vm2783_vm7 = vcmp.ge.f32.partialorder %v1920_v26, 0.0  ;;  %vm1937_vm8 = vmand %vm383_vm2, %vm385_vm3  ;;  %v1944_v32 = vadd.f32 -1.0, %v1920_v26  ;;  %vm2786_vm15 = vcmp.le.f32.partialorder %v1920_v26, 15.0 }
  0x1a   : > { %v1928_v29 = vadd.f32 1.0, %v1922_v27  ;;  %vm2782_vm9 = vcmp.ge.f32.partialorder %v1922_v27, 0.0  ;;  %vm2784_vm10 = vcmp.ge.f32.partialorder %v1925_v28, 0.0  ;;  %vm417_vm12 = vmand %vm1932_vm6, %vm2783_vm7  ;;  %v1956_v34 = vadd.f32 -1.0, %v1922_v27 }
  0x1b   : > { %433 = vrot.lane.b32.xlu1 %v1860_v3, %s1740_s19  ;;  %375 = vrot.lane.b32.xlu0 %v1860_v3, %s1739_s18  ;;  %vm418_vm14 = vmand %vm1937_vm8, %vm2782_vm9  ;;  %vm2787_vm0 = vcmp.le.f32.partialorder %v1922_v27, 15.0  ;;  %vm2788_vm3 = vcmp.le.f32.partialorder %v1925_v28, 15.0  ;;  %vm2789_vm7 = vcmp.le.f32.partialorder %v1944_v32, 15.0 }
  0x1c   : > { %vm2785_vm13 = vcmp.ge.f32.partialorder %v1928_v29, 0.0  ;;  %vm442_vm1 = vmand %vm1932_vm6, %vm2784_vm10 }
  0x1d   : > { %vm443_vm2 = vmand %vm1937_vm8, %vm2785_vm13  ;;  %vm466_vm13 = vcmp.ge.f32.partialorder %v1914_v21, 0.0 }
  0x1e   : > { %vm1977_vm9 = vmand %vm417_vm12, %vm2786_vm15  ;;  %vm2814_vm12 = vcmp.le.f32.partialorder %v1928_v29, 15.0 }
  0x1f   : > { %458 = vrot.lane.b32.xlu1 %v1860_v3, %s1741_s20  ;;  %456 = vrot.lane.b32.xlu0 %v1852_v2, %s1741_s20  ;;  %vm1984_vm10 = vmand %vm418_vm14, %vm2787_vm0  ;;  %vm2817_vm14 = vcmp.ge.f32.partialorder %v1944_v32, 0.0  ;;  %v2042_v46 = vsel %vm1977_vm9, 1.0, %v1737_v1  ;;  %vm513_vm9 = vcmp.ge.f32.partialorder %v511_v43, 0.0 }
  0x20   : > { %v2811_v36 = vsel %vm1984_vm10, 4294967295, %v2810_v36  ;;  %vm1992_vm5 = vmand %vm442_vm1, %vm2788_vm3  ;;  %vm2818_vm10 = vcmp.ge.f32.partialorder %v1956_v34, 0.0 }
  0x21   : > { %vm1998_vm15 = vmand %vm443_vm2, %vm2814_vm12  ;;  %vm2790_vm2 = vcmp.le.f32.partialorder %v1956_v34, 15.0  ;;  %v2088_v58 = vsel %vm1992_vm5, 1.0, %v1737_v1  ;;  %vm2840_vm5 = vcmp.le.f32.partialorder %v1925_v28, 15.0 }
  0x22   : > { %vm392_vm0 = vmand %vm1932_vm6, %vm2817_vm14  ;;  %v2093_v59 = vsel %vm1998_vm15, 1.0, %v1737_v1 }
  0x23   : > { %487 = vrot.lane.b32.xlu1 %v1860_v3, %s1742_s21  ;;  %485 = vrot.lane.b32.xlu0 %v1852_v2, %s1742_s21  ;;  %vm393_vm1 = vmand %vm1937_vm8, %vm2818_vm10 }
  0x24   : > { %vm2011_vm3 = vmand %vm466_vm13, %vm468_vm4  ;;  %vm2791_vm13 = vcmp.lt.s32.totalorder %v1908_v12, 16  ;;  %vm2827_vm4 = vnez %v2811_v36 }
  0x25   : > { %v2820_v39 = vsel %vm2011_vm3, 4294967295, %v2819_v39  ;;  %vm2018_vm12 = vmand %vm392_vm0, %vm2789_vm7  ;;  %v2047_v47 = vsel %vm2827_vm4, 1.0, %v1737_v1  ;;  %vm514_vm4 = vcmp.ge.f32.partialorder %v512_v45, 0.0 }
  0x26   : > { %vm2823_vm6 = vmmov %vm2817_vm14  ;;  %v2098_v60 = vsel %vm2018_vm12, 1.0, %v1737_v1  ;;  %vm2843_vm12 = vcmp.lt.s32.totalorder %v1908_v12, 15 }
  0x27   : > { %506 = vrot.lane.b32.xlu1 %v1860_v3, %s1743_s22  ;;  %504 = vrot.lane.b32.xlu0 %v1852_v2, %s1743_s22  ;;  %vm471_vm14 = vmand %vm1946_vm11, %vm2823_vm6 }
  0x28   : > { %vm2824_vm8 = vmmov %vm2818_vm10 }
  0x29   : > { %vm472_vm10 = vmand %vm2011_vm3, %vm2824_vm8  ;;  %vm515_vm8 = vcmp.le.f32.partialorder %v511_v43, 15.0 }
  0x2a   : > { %vm2034_vm0 = vmand %vm393_vm1, %vm2790_vm2 }
  0x2b   : > { %533 = vrot.lane.b32.xlu1 %v1860_v3, %s1744_s23  ;;  %531 = vrot.lane.b32.xlu0 %v1852_v2, %s1744_s23  ;;  %vm2051_vm6 = vmand %vm471_vm14, %vm2789_vm7  ;;  %vm2832_vm7 = vcmp.ge.f32.partialorder %v1925_v28, 0.0  ;;  %vm516_vm14 = vcmp.le.f32.partialorder %v512_v45, 15.0  ;;  %v2103_v61 = vsel %vm2034_vm0, 1.0, %v1737_v1 }
  0x2c   : > { %vm2057_vm1 = vmand %vm472_vm10, %vm2790_vm2  ;;  %vm2835_vm2 = vcmp.ge.f32.partialorder %v1928_v29, 0.0  ;;  %v2145_v22 = vsel %vm2051_vm6, 1.0, %v1737_v1  ;;  %vm2853_vm6 = vcmp.ge.f32.partialorder %v1956_v34, 0.0 }
  0x2d   : > { %vm2071_vm10 = vmand %vm1946_vm11, %vm2832_vm7  ;;  %v2150_v23 = vsel %vm2057_vm1, 1.0, %v1737_v1 }
  0x2e   : > { %vm2107_vm7 = vmand %vm513_vm9, %vm515_vm8  ;;  %vm2845_vm9 = vcmp.lt.s32.totalorder %v1908_v12, 17 }
  0x2f   : > { %552 = vrot.lane.b32.xlu1 %v1860_v3, %s1745_s24  ;;  %550 = vrot.lane.b32.xlu0 %v1852_v2, %s1745_s24  ;;  %vm2844_vm0 = vmmov %vm2843_vm12 }
  0x30   : > { %vm2846_vm8 = vmmov %vm2845_vm9 }
  0x31   : > { %vm2130_vm15 = vmand %vm514_vm4, %vm516_vm14  ;;  %vm2850_vm14 = vcmp.le.f32.partialorder %v1928_v29, 15.0 }
  0x32   : > { %vm520_vm1 = vmand %vm2130_vm15, %vm2853_vm6 }
  0x33   : > { %601 = vperm.xlu0 %1683, %v598_v5   ;;  %683 = vperm.xlu1 %1684, %v670_v6  }
  0x37   : > { %1686 = vset.pattern.permute.xlu0 %v1748_v8  ;;  %1685 = vset.pattern.permute.xlu1 %v1746_v4 }
  0x38   : > { %701 = vperm.xlu0 %1686, %v670_v6   ;;  %673 = vperm.xlu1 %1685, %v670_v6  }
  0x3c   : > { %1689 = vset.pattern.permute.xlu0 %v1746_v4  ;;  %1687 = vset.pattern.permute.xlu1 %v1749_v9 }
  0x3d   : > { %719 = vperm.xlu1 %1687, %v670_v6  }
  0x41   : > { %1688 = vset.pattern.permute.xlu1 %v1746_v4 }
  0x42   : > { %739 = vperm.xlu1 %1688, %v736_v10  }
  0x46   : > { %1690 = vset.pattern.permute.xlu1 %v1747_v7 }
  0x85   : > { %v407_v41 = vpop.permute.xlu1 %406  ;;  %v374_v42 = vpop.permute.xlu0 %373 }
  0x89   : > { %v432_v49 = vpop.permute.xlu0 %431  ;;  %v409_v50 = vpop.permute.xlu1 %408 }
  0x8a   : > { %v411_v52 = vsel %vm2791_vm13, %v407_v41, %v409_v50  ;;  %v412_v53 = vsel %vm2791_vm13, %v409_v50, %v407_v41  ;;  %vm2081_vm13 = vmand %vm2011_vm3, %vm2835_vm2 }
  0x8b   : > { %v427_v55 = vmul.f32 %v2042_v46, %v412_v53  ;;  %v428_v56 = vmul.f32 %v2047_v47, %v411_v52  ;;  %vm2116_vm2 = vmand %vm2071_vm10, %vm2840_vm5  ;;  %vm2849_vm10 = vcmp.ge.f32.partialorder %v1944_v32, 0.0 }
  0x8c   : > { %vm519_vm5 = vmand %vm2107_vm7, %vm2849_vm10  ;;  %vm2859_vm10 = vcmp.ge.f32.partialorder %v1920_v26, 0.0  ;;  %v2184_v40 = vsel %vm2116_vm2, 1.0, %v1737_v1  ;;  %vm2864_vm2 = vcmp.le.f32.partialorder %v1920_v26, 15.0 }
  0x8d   : > { %429 = vst [vmem:[#allocation2 + $0x10] sm:$0xf] %v427_v55  ;;  %430 = vst [vmem:[#allocation2 + $0x18] sm:$0xf] %v428_v56  ;;  %v434_v63 = vpop.permute.xlu1 %433  ;;  %v376_v0 = vpop.permute.xlu0 %375 }
  0x8e   : > { %v436_v6 = vsel %vm2843_vm12, %v432_v49, %v434_v63  ;;  %v437_v10 = vsel %vm2844_vm0, %v434_v63, %v432_v49  ;;  %v378_v13 = vsel %vm2845_vm9, %v374_v42, %v376_v0  ;;  %v379_v14 = vsel %vm2846_vm8, %v376_v0, %v374_v42  ;;  %vm2156_vm4 = vmand %vm2081_vm13, %vm2850_vm14 }
  0x8f   : > { %v452_v16 = vmul.f32 %v2088_v58, %v437_v10  ;;  %v453_v17 = vmul.f32 %v2093_v59, %v436_v6  ;;  %v402_v18 = vmul.f32 %v2098_v60, %v379_v14  ;;  %v403_v19 = vmul.f32 %v2103_v61, %v378_v13  ;;  %vm538_vm14 = vmand %vm2107_vm7, %vm2859_vm10 }
  0x90   : > { %vm2854_vm12 = vcmp.lt.s32.totalorder %v1908_v12, 1  ;;  %vm2856_vm13 = vcmp.le.f32.partialorder %v1944_v32, 15.0  ;;  %vm2794_vm8 = vcmp.lt.s32.totalorder %v1908_v12, 127  ;;  %v2189_v32 = vsel %vm2156_vm4, 1.0, %v1737_v1  ;;  %vm2207_vm4 = vmand %vm538_vm14, %vm2864_vm2 }
  0x91   : > { %454 = vst [vmem:[#allocation2 + $0x20] sm:$0xf] %v452_v16  ;;  %455 = vst [vmem:[#allocation2 + $0x28] sm:$0xf] %v453_v17  ;;  %v459_v25 = vpop.permute.xlu1 %458  ;;  %v457_v30 = vpop.permute.xlu0 %456  ;;  %v2260_v15 = vsel %vm2207_vm4, 1.0, %v1737_v1  ;;  %vm554_vm4 = vcmp.lt.s32.totalorder %v1908_v12, 111 }
  0x92   : > { %404 = vst [vmem:[#allocation2] sm:$0xf] %v402_v18  ;;  %405 = vst [vmem:[#allocation2 + $0x8] sm:$0xf] %v403_v19  ;;  %v461_v31 = vsel %vm2854_vm12, %v457_v30, %v459_v25 }
  0x93   : > { %vm2855_vm0 = vmmov %vm2854_vm12  ;;  %v480_v38 = vmul.f32 %v2150_v23, %v461_v31  ;;  %vm2861_vm12 = vcmp.ge.f32.partialorder %v1922_v27, 0.0 }
  0x94   : > { %v462_v35 = vsel %vm2855_vm0, %v459_v25, %v457_v30  ;;  %vm2170_vm9 = vmand %vm519_vm5, %vm2856_vm13  ;;  %vm2860_vm5 = vcmp.le.f32.partialorder %v1956_v34, 15.0  ;;  %v573_v50 = vld [vmem:[#allocation2 + $0x18] sm:$0xff]  ;;  %vm2867_vm13 = vcmp.ge.f32.partialorder %v1925_v28, 0.0  ;;  %v572_v56 = vld [vmem:[#allocation2 + $0x10] sm:$0xff] }
  0x95   : > { %v479_v37 = vmul.f32 %v2145_v22, %v462_v35  ;;  %vm522_vm6 = vmand %vm520_vm1, %vm2860_vm5  ;;  %482 = vst [vmem:[#allocation2 + $0x38] sm:$0xf] %v480_v38  ;;  %v488_v41 = vpop.permute.xlu1 %487  ;;  %v486_v42 = vpop.permute.xlu0 %485  ;;  %vm508_vm1 = vcmp.lt.s32.totalorder %v1908_v12, 113  ;;  %v2225_v52 = vsel %vm2170_vm9, 1.0, %v1737_v1  ;;  %vm2871_vm9 = vcmp.ge.f32.partialorder %v1928_v29, 0.0  ;;  %v579_v38 = vld [vmem:[#allocation2 + $0x48] sm:$0xff] }
  0x96   : > { %vm2197_vm0 = vmand %vm2130_vm15, %vm2861_vm12  ;;  %v490_v44 = vsel %vm2794_vm8, %v486_v42, %v488_v41  ;;  %v491_v45 = vsel %vm2794_vm8, %v488_v41, %v486_v42  ;;  %v2228_v53 = vsel %vm522_vm6, 1.0, %v1737_v1  ;;  %vm535_vm6 = vcmp.lt.s32.totalorder %v1908_v12, 112  ;;  %v578_v41 = vld [vmem:[#allocation2 + $0x40] sm:$0xff] }
  0x97   : > { %481 = vst [vmem:[#allocation2 + $0x30] sm:$0xf] %v479_v37  ;;  %v500_v48 = vmul.f32 %v2184_v40, %v490_v44  ;;  %v501_v49 = vmul.f32 %v2189_v32, %v491_v45  ;;  %vm2218_vm10 = vmand %vm2107_vm7, %vm2867_vm13  ;;  %vm2870_vm7 = vcmp.le.f32.partialorder %v1922_v27, 15.0  ;;  %vm2874_vm12 = vcmp.le.f32.partialorder %v1925_v28, 15.0 }
  0x98   : > { %vm541_vm14 = vmand %vm2197_vm0, %vm2870_vm7  ;;  %v575_v16 = vld [vmem:[#allocation2 + $0x28] sm:$0xff]  ;;  %v574_v24 = vld [vmem:[#allocation2 + $0x20] sm:$0xff]  ;;  %vm2792_vm13 = vcmask 1043456   ;;  %vm2878_vm7 = vcmp.lt.s32.totalorder %v1908_v12, 17 }
  0x99   : > { %v571_v54 = vld [vmem:[#allocation2 + $0x8] sm:$0xff]  ;;  %v570_v55 = vld [vmem:[#allocation2] sm:$0xff]  ;;  %502 = vst [vmem:[#allocation2 + $0x50] sm:$0xf] %v500_v48  ;;  %503 = vst [vmem:[#allocation2 + $0x58] sm:$0xf] %v501_v49  ;;  %v507_v57 = vpop.permute.xlu1 %506  ;;  %v505_v63 = vpop.permute.xlu0 %504 }
  0x9a   : > { %v589_v62 = vpack.c.bf16 %v573_v50, %v571_v54  ;;  %v588_v0 = vpack.c.bf16 %v572_v56, %v570_v55  ;;  %v509_v5 = vsel %vm508_vm1, %v505_v63, %v507_v57  ;;  %v510_v6 = vsel %vm508_vm1, %v507_v57, %v505_v63  ;;  %vm2242_vm5 = vmand %vm2130_vm15, %vm2871_vm9 }
  0x9b   : > { %v527_v13 = vmul.f32 %v2225_v52, %v509_v5  ;;  %v528_v14 = vmul.f32 %v2228_v53, %v510_v6  ;;  %vm2253_vm0 = vmand %vm2218_vm10, %vm2874_vm12  ;;  %v2263_v18 = vsel %vm541_vm14, 1.0, %v1737_v1  ;;  %vm2877_vm15 = vcmp.le.f32.partialorder %v1928_v29, 15.0 }
  0x9c   : > { %615 = vmatprep.subr.bf16.mxu0 %v589_v62  ;;  %v577_v19 = vld [vmem:[#allocation2 + $0x38] sm:$0xff]  ;;  %vm560_vm2 = vmand %vm2242_vm5, %vm2877_vm15  ;;  %v2279_v29 = vsel %vm2253_vm0, 1.0, %v1737_v1  ;;  %vm604_vm10 = vcmask 588800   ;;  %vm2392_vm9 = vcmp.lt.s32.totalorder %v337_v11, 256  ;;  %vm2882_vm5 = vcmp.lt.s32.totalorder %v1908_v12, 16 }
  0x9d   : > { %616 = vmatpush1.bf16.msra.mxu0 %v588_v0  ;;  %529 = vst [vmem:[#allocation2 + $0x60] sm:$0xf] %v527_v13  ;;  %530 = vst [vmem:[#allocation2 + $0x68] sm:$0xf] %v528_v14  ;;  %v534_v28 = vpop.permute.xlu1 %533  ;;  %v532_v30 = vpop.permute.xlu0 %531  ;;  %v591_v31 = vpack.c.bf16 %v577_v19, %v575_v16  ;;  %v2282_v44 = vsel %vm560_vm2, 1.0, %v1737_v1 }
  0x9e   : > { %v576_v25 = vld [vmem:[#allocation2 + $0x30] sm:$0xff]  ;;  %v536_v36 = vsel %vm535_vm6, %v532_v30, %v534_v28  ;;  %v537_v37 = vsel %vm535_vm6, %v534_v28, %v532_v30  ;;  %vm2879_vm14 = vmmov %vm2878_vm7 }
  0x9f   : > { %v590_v35 = vpack.c.bf16 %v576_v25, %v574_v24  ;;  %v546_v42 = vmul.f32 %v2260_v15, %v536_v36  ;;  %v547_v43 = vmul.f32 %v2263_v18, %v537_v37  ;;  %617 = vmatprep.subr.bf16.mxu0 %v591_v31  ;;  %v569_v24 = vld [vmem:[%s2773_s1] sm:$0x3]  ;;  %vm2883_vm12 = vmmov %vm2882_vm5 }
  0xa0   : > { %v581_v45 = vld [vmem:[#allocation2 + $0x58] sm:$0xff]  ;;  %v580_v34 = vld [vmem:[#allocation2 + $0x50] sm:$0xff] }
  0xa1   : > { %618 = vmatpush1.bf16.msra.mxu0 %v590_v35  ;;  %548 = vst [vmem:[#allocation2 + $0x70] sm:$0xf] %v546_v42  ;;  %549 = vst [vmem:[#allocation2 + $0x78] sm:$0xf] %v547_v43  ;;  %v553_v48 = vpop.permute.xlu1 %552  ;;  %v551_v49 = vpop.permute.xlu0 %550  ;;  %v593_v50 = vpack.c.bf16 %v581_v45, %v579_v38  ;;  %v592_v51 = vpack.c.bf16 %v580_v34, %v578_v41 }
  0xa2   : > { %v555_v54 = vsel %vm554_vm4, %v551_v49, %v553_v48  ;;  %v556_v55 = vsel %vm554_vm4, %v553_v48, %v551_v49 }
  0xa3   : > { %v565_v56 = vmul.f32 %v2279_v29, %v555_v54  ;;  %v566_v57 = vmul.f32 %v2282_v44, %v556_v55  ;;  %619 = vmatprep.subr.bf16.mxu0 %v593_v50  ;;  %v2296_v50 = vshrl.u32 %v337_v11, 7 }
  0xa4   : > { %v583_v63 = vld [vmem:[#allocation2 + $0x68] sm:$0xff]  ;;  %v582_v0 = vld [vmem:[#allocation2 + $0x60] sm:$0xff] }
  0xa5   : > { %620 = vmatpush1.bf16.msra.mxu0 %v592_v51  ;;  %567 = vst [vmem:[#allocation2 + $0x80] sm:$0xf] %v565_v56  ;;  %568 = vst [vmem:[#allocation2 + $0x88] sm:$0xf] %v566_v57  ;;  %v2299_v54 = vsub.s32 0, %v2296_v50 }
  0xa8   : > { %v585_v62 = vld [vmem:[#allocation2 + $0x78] sm:$0xff]  ;;  %v584_v5 = vld [vmem:[#allocation2 + $0x70] sm:$0xff] }
  0xa9   : > { %v595_v6 = vpack.c.bf16 %v585_v62, %v583_v63  ;;  %v594_v10 = vpack.c.bf16 %v584_v5, %v582_v0 }
  0xab   : > { %621 = vmatprep.subr.bf16.mxu0 %v595_v6 }
  0xac   : > { %622 = vmatpush1.bf16.msra.mxu0 %v594_v10  ;;  %v587_v13 = vld [vmem:[#allocation2 + $0x88] sm:$0xff]  ;;  %v586_v14 = vld [vmem:[#allocation2 + $0x80] sm:$0xff] }
  0xad   : > { %v597_v16 = vpack.c.bf16 %v587_v13, %v587_v13  ;;  %v596_v17 = vpack.c.bf16 %v586_v14, %v586_v14 }
  0xaf   : > { %1623 = vmatprep.subr.msk.bf16.mxu0 %vm2792_vm13, %v597_v16  ;;  %v610_v19 = vsel %vm2792_vm13, %v596_v17, 0 }
  0xb0   : > { %624 = vmatpush1.bf16.msra.mxu0 %v610_v19 }
  0xb2   : > { %v602_v25 = vpop.permute.xlu0 %601  ;;  %v684_v42 = vpop.permute.xlu1 %683 }
  0xb3   : > { %1624 = vmatmul.mubr.msk.bf16.vlgmr.msra.gmra.mrb[0].mxu0 %vm604_vm10, %v569_v24  ;;  %v689_v0 = vrot.slane %v684_v42, %v2299_v54 }
  0xb7   : > { %v674_v49 = vpop.permute.xlu1 %673  ;;  %v702_v51 = vpop.permute.xlu0 %701 }
  0xb8   : > { %v707_v56 = vrot.slane %v702_v51, %v2299_v54  ;;  %v679_v5 = vrot.slane %v674_v49, %v2299_v54 }
  0xbc   : > { %v720_v55 = vpop.permute.xlu1 %719 }
  0xbd   : > { %v725_v6 = vrot.slane %v720_v55, %v2299_v54 }
 0x186   : > { %v649_v28 = vpop.f32.mrb[0].mxu0 }
 0x187   : > { %v650_v30 = vadd.f32 %v649_v28, %v602_v25  ;;  %v651_v31 = vpop.f32.mrb[1].mxu0 }
 0x188   : > { %v652_v35 = vadd.f32 %v651_v31, %v602_v25  ;;  %v653_v36 = vpop.f32.mrb[2].mxu0 }
 0x189   : > { %v1625_v37 = vmul.f32 -1.442695, %v650_v30  ;;  %v654_v38 = vpop.f32.mrb[3].mxu0 }
 0x18a   : > { %v1626_v41 = vmul.f32 -1.442695, %v652_v35 }
 0x18b   : > { %1697 = vpow2.f32 %v1625_v37  ;;  %v740_v37 = vpop.permute.xlu1 %739 }
 0x18c   : > { %1699 = vpow2.f32 %v1626_v41 }
 0x195   : > { %v1698_v43 = vpop.eup %1697 }
 0x196   : > { %v1700_v45 = vpop.eup %1699  ;;  %v662_v34 = vadd.f32 1.0, %v1698_v43 }
 0x197   : > { %v663_v48 = vadd.f32 1.0, %v1700_v45 }
 0x198   : > { %1701 = vrcp.f32 %v662_v34  ;;  %v745_v34 = vrot.slane %v740_v37, %v2299_v54 }
 0x199   : > { %1703 = vrcp.f32 %v663_v48 }
 0x1a2   : > { %v1702_v57 = vpop.eup %1701 }
 0x1a3   : > { %v1704_v63 = vpop.eup %1703  ;;  %v668_v62 = vmul.f32 %v1702_v57, %v650_v30  ;;  %v1397_v57 = vld [vmem:[%s2777_s5] sm:$0x3] }
 0x1a4   : > { %v669_v10 = vmul.f32 %v1704_v63, %v652_v35  ;;  %v1461_v63 = vld [vmem:[%s2778_s6] sm:$0x3] }
 0x1a5   : > { %v690_v13 = vmul.f32 %v689_v0, %v668_v62  ;;  %v708_v14 = vmul.f32 %v707_v56, %v668_v62  ;;  %v680_v24 = vmul.f32 %v679_v5, %v668_v62  ;;  %v726_v25 = vmul.f32 %v725_v6, %v668_v62  ;;  %v1483_v62 = vld [vmem:[%s2779_s7] sm:$0xf] }
 0x1a6   : > { %v691_v16 = vmul.f32 %v689_v0, %v669_v10  ;;  %v709_v17 = vmul.f32 %v707_v56, %v669_v10  ;;  %v681_v31 = vmul.f32 %v679_v5, %v669_v10  ;;  %v727_v36 = vmul.f32 %v725_v6, %v669_v10 }
 0x1a7   : > { %v694_v19 = vrot.slane %v690_v13, 1  ;;  %v712_v30 = vrot.slane %v708_v14, 2  ;;  %v730_v43 = vrot.slane %v726_v25, 3 }
 0x1a8   : > { %v695_v28 = vrot.slane %v691_v16, 1  ;;  %v713_v42 = vrot.slane %v709_v17, 2  ;;  %v731_v35 = vrot.slane %v727_v36, 3 }
 0x1a9   : > { %v698_v38 = vadd.f32 %v694_v19, %v680_v24 }
 0x1aa   : > { %v699_v41 = vadd.f32 %v695_v28, %v681_v31 }
 0x1ab   : > { %v716_v45 = vadd.f32 %v712_v30, %v698_v38 }
 0x1ac   : > { %v717_v48 = vadd.f32 %v713_v42, %v699_v41 }
 0x1ad   : > { %v734_v49 = vadd.f32 %v730_v43, %v716_v45 }
 0x1ae   : > { %v735_v51 = vadd.f32 %v731_v35, %v717_v48  ;;  %v990_v35 = vadd.f32 -3.0, %v1914_v21 }
 0x1af   : > { %v2306_v55 = vadd.f32 %v745_v34, %v734_v49 }
 0x1b0   : > { %v2308_v56 = vadd.f32 %v745_v34, %v735_v51  ;;  %v989_v34 = vadd.f32 -3.0, %v1912_v20  ;;  %vm992_vm15 = vcmp.ge.f32.partialorder %v990_v35, 0.0 }
 0x1b1   : > { %748 = vrot.lane.b32.xlu0 %v2306_v55, %s1739_s18 }
 0x1b2   : > { %750 = vrot.lane.b32.xlu1 %v2308_v56, %s1739_s18  ;;  %s1756_s18 = smov 3   ;;  %vm991_vm0 = vcmp.ge.f32.partialorder %v989_v34, 0.0  ;;  %vm993_vm2 = vcmp.le.f32.partialorder %v989_v34, 15.0 }
 0x1b5   : > { %780 = vrot.lane.b32.xlu0 %v2306_v55, %s1745_s24 }
 0x1b6   : > { %782 = vrot.lane.b32.xlu1 %v2308_v56, %s1745_s24 }
 0x1b9   : > { %808 = vrot.lane.b32.xlu0 %v2306_v55, %s1738_s17 }
 0x1ba   : > { %810 = vrot.lane.b32.xlu1 %v2308_v56, %s1738_s17  ;;  %s1755_s17 = smov 83  }
 0x1bd   : > { %837 = vrot.lane.b32.xlu0 %v2306_v55, %s1744_s23 }
 0x1be   : > { %839 = vrot.lane.b32.xlu1 %v2308_v56, %s1744_s23 }
 0x1c1   : > { %866 = vrot.lane.b32.xlu0 %v2306_v55, %s1740_s19 }
 0x1c2   : > { %868 = vrot.lane.b32.xlu1 %v2308_v56, %s1740_s19  ;;  %s1757_s19 = smov 125  }
 0x1c5   : > { %895 = vrot.lane.b32.xlu0 %v2306_v55, %s1743_s22 }
 0x1c6   : > { %897 = vrot.lane.b32.xlu1 %v2308_v56, %s1743_s22 }
 0x1c9   : > { %924 = vrot.lane.b32.xlu0 %v2306_v55, %s1741_s20 }
 0x1ca   : > { %926 = vrot.lane.b32.xlu1 %v2308_v56, %s1741_s20 }
 0x1cd   : > { %953 = vrot.lane.b32.xlu0 %v2306_v55, %s1742_s21 }
 0x1ce   : > { %955 = vrot.lane.b32.xlu1 %v2308_v56, %s1742_s21 }
 0x1d1   : > { %982 = vrot.lane.b32.xlu0 %v2306_v55, %s1750_s10 }
 0x1d2   : > { %984 = vrot.lane.b32.xlu1 %v2308_v56, %s1750_s10 }
 0x1d5   : > { %1034 = vrot.lane.b32.xlu0 %v2306_v55, %s1751_s13 }
 0x1d6   : > { %1036 = vrot.lane.b32.xlu1 %v2308_v56, %s1751_s13 }
 0x1d9   : > { %1086 = vrot.lane.b32.xlu0 %v2306_v55, %s1752_s14 }
 0x1da   : > { %1088 = vrot.lane.b32.xlu1 %v2308_v56, %s1752_s14 }
 0x1dd   : > { %1124 = vrot.lane.b32.xlu0 %v2306_v55, %s1753_s15 }
 0x1de   : > { %1126 = vrot.lane.b32.xlu1 %v2308_v56, %s1753_s15 }
 0x1e1   : > { %1162 = vrot.lane.b32.xlu0 %v2306_v55, %s1754_s16 }
 0x1e2   : > { %1164 = vrot.lane.b32.xlu1 %v2308_v56, %s1754_s16 }
 0x1e5   : > { %1200 = vrot.lane.b32.xlu0 %v2306_v55, %s1755_s17 }
 0x1e6   : > { %1202 = vrot.lane.b32.xlu1 %v2308_v56, %s1755_s17 }
 0x1e9   : > { %1238 = vrot.lane.b32.xlu0 %v2306_v55, %s1756_s18 }
 0x1ea   : > { %1240 = vrot.lane.b32.xlu1 %v2308_v56, %s1756_s18 }
 0x1ed   : > { %1276 = vrot.lane.b32.xlu0 %v2306_v55, %s1757_s19 }
 0x1ee   : > { %1278 = vrot.lane.b32.xlu1 %v2308_v56, %s1757_s19 }
 0x1f1   : > { %1400 = vperm.xlu0 %1689, %v1397_v57  }
 0x1f2   : > { %1414 = vperm.xlu1 %1690, %v1397_v57  }
 0x1f5   : > { %1692 = vset.pattern.permute.xlu0 %v1749_v9  ;;  %v1758_v9 = vmov 1966171168  }
 0x1f6   : > { %1691 = vset.pattern.permute.xlu1 %v1748_v8  ;;  %1446 = vperm.xlu0 %1692, %v1397_v57   ;;  %v1515_v8 = vld [vmem:[%s2780_s8] sm:$0xf]  ;;  %v760_v0 = vunpack.c.l.s4 %v1758_v9 }
 0x1f7   : > { %1430 = vperm.xlu1 %1691, %v1397_v57  }
 0x1f8   : > { %v761_v5 = vunpack.c.0.s8 %v760_v0  ;;  %v2422_v0 = vadd.f32 -3.0, %v1922_v27 }
 0x1fa   : > { %1694 = vset.pattern.permute.xlu0 %v1747_v7  ;;  %v2380_v14 = vsub.s32 %v761_v5, %v2296_v50 }
 0x1fb   : > { %1693 = vset.pattern.permute.xlu1 %v1746_v4  ;;  %1500 = vperm.xlu0 %1694, %v1483_v62  }
 0x1fc   : > { %1464 = vperm.xlu1 %1693, %v1461_v63  }
 0x1ff   : > { %1695 = vset.pattern.permute.xlu0 %v1746_v4 }
 0x200   : > { %1486 = vperm.xlu1 %1693, %v1483_v62  }
 0x204   : > { %1518 = vperm.xlu1 %1693, %v1515_v8   ;;  %v2419_v8 = vadd.f32 -3.0, %v1920_v26 }
 0x223   : > { %v749_v6 = vpop.permute.xlu0 %748 }
 0x224   : > { %v751_v10 = vpop.permute.xlu1 %750 }
 0x225   : > { %v752_v7 = vsel %vm2878_vm7, %v749_v6, %v751_v10  ;;  %v753_v13 = vsel %vm2879_vm14, %v751_v10, %v749_v6  ;;  %vm2437_vm7 = vmand %vm991_vm0, %vm993_vm2  ;;  %vm2793_vm14 = vcmp.ge.f32.partialorder %v2419_v8, 0.0 }
 0x226   : > { %v754_v4 = vmul.f32 %v2098_v60, %v753_v13  ;;  %v755_v16 = vmul.f32 %v2103_v61, %v752_v7  ;;  %v1041_v7 = vadd.f32 3.0, %v1912_v20  ;;  %v1042_v13 = vadd.f32 3.0, %v1914_v21 }
 0x227   : > { %v781_v17 = vpop.permute.xlu0 %780 }
 0x228   : > { %v758_v19 = vcombine.low %v754_v4, %v755_v16  ;;  %v783_v24 = vpop.permute.xlu1 %782  ;;  %vm1043_vm0 = vcmp.ge.f32.partialorder %v1041_v7, 0.0  ;;  %vm1045_vm2 = vcmp.le.f32.partialorder %v1041_v7, 15.0 }
 0x229   : > { %v784_v25 = vsel %vm554_vm4, %v781_v17, %v783_v24  ;;  %v785_v28 = vsel %vm554_vm4, %v783_v24, %v781_v17  ;;  %vm2884_vm4 = vcmp.lt.s32.totalorder %v1908_v12, 15  ;;  %vm2481_vm13 = vmand %vm1043_vm0, %vm1045_vm2  ;;  %vm2898_vm0 = vcmp.lt.s32.totalorder %v1908_v12, 1 }
 0x22a   : > { %v765_v31 = vrot.slane %v758_v19, %v2380_v14  ;;  %v786_v36 = vmul.f32 %v2279_v29, %v784_v25  ;;  %v787_v37 = vmul.f32 %v2282_v44, %v785_v28  ;;  %vm2885_vm10 = vmmov %vm2884_vm4 }
 0x22b   : > { %v809_v61 = vpop.permute.xlu0 %808  ;;  %vm2899_vm2 = vmmov %vm2898_vm0 }
 0x22c   : > { %v772_v38 = vrot.slane %v765_v31, %v2380_v14  ;;  %v790_v30 = vcombine.low %v786_v36, %v787_v37  ;;  %v811_v41 = vpop.permute.xlu1 %810  ;;  %v2466_v37 = vadd.f32 3.0, %v1922_v27 }
 0x22d   : > { %v812_v42 = vsel %vm2882_vm5, %v809_v61, %v811_v41  ;;  %v813_v43 = vsel %vm2883_vm12, %v811_v41, %v809_v61  ;;  %vm2795_vm12 = vcmp.ge.f32.partialorder %v2422_v0, 0.0 }
 0x22e   : > { %778 = vst.msk [vmem:[#allocation3] ss:$8 sm:$0x3] %vm2392_vm9, %v772_v38  ;;  %v797_v29 = vrot.slane %v790_v30, %v2380_v14  ;;  %v814_v11 = vmul.f32 %v2042_v46, %v813_v43  ;;  %v815_v44 = vmul.f32 %v2047_v47, %v812_v42  ;;  %vm2799_vm8 = vcmp.ge.f32.partialorder %v2466_v37, 0.0 }
 0x22f   : > { %v838_v45 = vpop.permute.xlu0 %837 }
 0x230   : > { %v804_v48 = vrot.slane %v797_v29, %v2380_v14  ;;  %v818_v49 = vcombine.low %v814_v11, %v815_v44  ;;  %v840_v51 = vpop.permute.xlu1 %839 }
 0x231   : > { %v841_v57 = vsel %vm535_vm6, %v838_v45, %v840_v51  ;;  %v842_v63 = vsel %vm535_vm6, %v840_v51, %v838_v45  ;;  %vm994_vm6 = vcmp.le.f32.partialorder %v990_v35, 15.0 }
 0x232   : > { %806 = vst.msk [vmem:[#allocation4] ss:$8 sm:$0x3] %vm2392_vm9, %v804_v48  ;;  %v825_v46 = vrot.slane %v818_v49, %v2380_v14  ;;  %v843_v47 = vmul.f32 %v2260_v15, %v841_v57  ;;  %v844_v62 = vmul.f32 %v2263_v18, %v842_v63  ;;  %vm2443_vm5 = vmand %vm992_vm15, %vm994_vm6  ;;  %vm1044_vm6 = vcmp.ge.f32.partialorder %v1042_v13, 0.0 }
 0x233   : > { %v867_v9 = vpop.permute.xlu0 %866  ;;  %vm2461_vm15 = vmand %vm2437_vm7, %vm2793_vm14 }
 0x234   : > { %v832_v5 = vrot.slane %v825_v46, %v2380_v14  ;;  %v847_v6 = vcombine.low %v843_v47, %v844_v62  ;;  %v869_v10 = vpop.permute.xlu1 %868 }
 0x235   : > { %v870_v15 = vsel %vm2884_vm4, %v867_v9, %v869_v10  ;;  %v871_v18 = vsel %vm2885_vm10, %v869_v10, %v867_v9  ;;  %vm2796_vm4 = vcmp.le.f32.partialorder %v2419_v8, 15.0  ;;  %vm1046_vm10 = vcmp.le.f32.partialorder %v1042_v13, 15.0 }
 0x236   : > { %835 = vst.msk [vmem:[#allocation3 + $0x1] ss:$8 sm:$0x3] %vm2392_vm9, %v832_v5  ;;  %v854_v4 = vrot.slane %v847_v6, %v2380_v14  ;;  %v872_v16 = vmul.f32 %v2088_v58, %v871_v18  ;;  %v873_v17 = vmul.f32 %v2093_v59, %v870_v15  ;;  %v2450_v58 = vadd.f32 3.0, %v1920_v26  ;;  %vm2501_vm14 = vmand %vm1044_vm6, %vm1046_vm10 }
 0x237   : > { %v896_v19 = vpop.permute.xlu0 %895  ;;  %vm2903_vm10 = vcmp.le.f32.partialorder %v2422_v0, 15.0  ;;  %vm2906_vm6 = vcmp.lt.s32.totalorder %v1908_v12, 127 }
 0x238   : > { %v861_v59 = vrot.slane %v854_v4, %v2380_v14  ;;  %v876_v24 = vcombine.low %v872_v16, %v873_v17  ;;  %v898_v25 = vpop.permute.xlu1 %897  ;;  %vm2907_vm3 = vmmov %vm2906_vm6 }
 0x239   : > { %v899_v28 = vsel %vm508_vm1, %v896_v19, %v898_v25  ;;  %v900_v31 = vsel %vm508_vm1, %v898_v25, %v896_v19  ;;  %vm2477_vm1 = vmand %vm2443_vm5, %vm2795_vm12 }
 0x23a   : > { %864 = vst.msk [vmem:[#allocation4 + $0x1] ss:$8 sm:$0x3] %vm2392_vm9, %v861_v59  ;;  %v883_v61 = vrot.slane %v876_v24, %v2380_v14  ;;  %v901_v38 = vmul.f32 %v2225_v52, %v899_v28  ;;  %v902_v30 = vmul.f32 %v2228_v53, %v900_v31  ;;  %vm2492_vm12 = vmand %vm2461_vm15, %vm2796_vm4  ;;  %vm2902_vm15 = vcmp.ge.f32.partialorder %v2450_v58, 0.0 }
 0x23b   : > { %v925_v42 = vpop.permute.xlu0 %924  ;;  %vm2800_vm4 = vcmp.le.f32.partialorder %v2466_v37, 15.0  ;;  %v1627_v7 = vsel %vm2492_vm12, 1.0, %v1737_v1  ;;  %vm2915_vm12 = vcmp.le.f32.partialorder %v1920_v26, 15.0 }
 0x23c   : > { %v890_v52 = vrot.slane %v883_v61, %v2380_v14  ;;  %v905_v29 = vcombine.low %v901_v38, %v902_v30  ;;  %v927_v53 = vpop.permute.xlu1 %926 }
 0x23d   : > { %v928_v44 = vsel %vm2898_vm0, %v925_v42, %v927_v53  ;;  %v929_v45 = vsel %vm2899_vm2, %v927_v53, %v925_v42  ;;  %vm1053_vm0 = vmand %vm2481_vm13, %vm2902_vm15 }
 0x23e   : > { %893 = vst.msk [vmem:[#allocation3 + $0x2] ss:$8 sm:$0x3] %vm2392_vm9, %v890_v52  ;;  %v912_v35 = vrot.slane %v905_v29, %v2380_v14  ;;  %v930_v48 = vmul.f32 %v2145_v22, %v929_v45  ;;  %v931_v49 = vmul.f32 %v2150_v23, %v928_v44  ;;  %vm2520_vm2 = vmand %vm2477_vm1, %vm2903_vm10  ;;  %vm2908_vm1 = vcmp.le.f32.partialorder %v2450_v58, 15.0 }
 0x23f   : > { %v954_v51 = vpop.permute.xlu0 %953  ;;  %vm1054_vm15 = vmand %vm2501_vm14, %vm2799_vm8  ;;  %vm2911_vm8 = vcmp.ge.f32.partialorder %v1920_v26, 0.0  ;;  %v1628_v15 = vsel %vm2520_vm2, 1.0, %v1737_v1 }
 0x240   : > { %v919_v22 = vrot.slane %v912_v35, %v2380_v14  ;;  %v934_v63 = vcombine.low %v930_v48, %v931_v49  ;;  %v956_v23 = vpop.permute.xlu1 %955  ;;  %vm2536_vm10 = vmand %vm1053_vm0, %vm2908_vm1 }
 0x241   : > { %v957_v46 = vsel %vm2906_vm6, %v954_v51, %v956_v23  ;;  %v958_v47 = vsel %vm2907_vm3, %v956_v23, %v954_v51  ;;  %vm986_vm6 = vcmp.lt.s32.totalorder %v1908_v12, 51  ;;  %vm1093_vm3 = vmand %vm2437_vm7, %vm2911_vm8  ;;  %vm2914_vm8 = vcmp.ge.f32.partialorder %v1922_v27, 0.0 }
 0x242   : > { %922 = vst.msk [vmem:[#allocation4 + $0x2] ss:$8 sm:$0x3] %vm2392_vm9, %v919_v22  ;;  %v941_v9 = vrot.slane %v934_v63, %v2380_v14  ;;  %v959_v5 = vmul.f32 %v2184_v40, %v957_v46  ;;  %v960_v6 = vmul.f32 %v2189_v32, %v958_v47  ;;  %vm2558_vm0 = vmand %vm1054_vm15, %vm2800_vm4  ;;  %vm1038_vm15 = vcmp.lt.s32.totalorder %v1908_v12, 77 }
 0x243   : > { %v983_v10 = vpop.permute.xlu0 %982  ;;  %vm1094_vm1 = vmand %vm2443_vm5, %vm2914_vm8  ;;  %vm2918_vm4 = vcmp.ge.f32.partialorder %v1920_v26, 0.0  ;;  %v1629_v28 = vsel %vm2536_vm10, 1.0, %v1737_v1  ;;  %v1630_v31 = vsel %vm2558_vm0, 1.0, %v1737_v1  ;;  %vm2923_vm10 = vcmp.le.f32.partialorder %v1920_v26, 15.0 }
 0x244   : > { %v948_v32 = vrot.slane %v941_v9, %v2380_v14  ;;  %v963_v18 = vcombine.low %v959_v5, %v960_v6  ;;  %v985_v13 = vpop.permute.xlu1 %984  ;;  %vm2569_vm2 = vmand %vm1093_vm3, %vm2915_vm12  ;;  %vm2919_vm3 = vcmp.le.f32.partialorder %v1922_v27, 15.0 }
 0x245   : > { %v987_v4 = vsel %vm986_vm6, %v983_v10, %v985_v13  ;;  %v988_v16 = vsel %vm986_vm6, %v985_v13, %v983_v10  ;;  %vm1131_vm6 = vmand %vm2481_vm13, %vm2918_vm4  ;;  %vm2922_vm4 = vcmp.ge.f32.partialorder %v1922_v27, 0.0  ;;  %v1631_v26 = vsel %vm2569_vm2, 1.0, %v1737_v1 }
 0x246   : > { %951 = vst.msk [vmem:[#allocation3 + $0x3] ss:$8 sm:$0x3] %vm2392_vm9, %v948_v32  ;;  %v970_v19 = vrot.slane %v963_v18, %v2380_v14  ;;  %v1011_v59 = vmul.f32 %v1627_v7, %v988_v16  ;;  %v1012_v24 = vmul.f32 %v1628_v15, %v987_v4  ;;  %vm2589_vm8 = vmand %vm1094_vm1, %vm2919_vm3  ;;  %vm1090_vm1 = vcmp.lt.s32.totalorder %v1908_v12, 48 }
 0x247   : > { %v1035_v25 = vpop.permute.xlu0 %1034  ;;  %vm1132_vm12 = vmand %vm2501_vm14, %vm2922_vm4  ;;  %vm2926_vm3 = vcmp.ge.f32.partialorder %v2450_v58, 0.0  ;;  %v1632_v45 = vsel %vm2589_vm8, 1.0, %v1737_v1  ;;  %vm2933_vm2 = vcmp.le.f32.partialorder %v2450_v58, 15.0 }
 0x248   : > { %v977_v61 = vrot.slane %v970_v19, %v2380_v14  ;;  %v1015_v38 = vcombine.low %v1011_v59, %v1012_v24  ;;  %v1037_v30 = vpop.permute.xlu1 %1036  ;;  %vm2600_vm0 = vmand %vm1131_vm6, %vm2923_vm10  ;;  %vm2927_vm6 = vcmp.le.f32.partialorder %v1922_v27, 15.0 }
 0x249   : > { %v1039_v41 = vsel %vm1038_vm15, %v1035_v25, %v1037_v30  ;;  %v1040_v42 = vsel %vm1038_vm15, %v1037_v30, %v1035_v25  ;;  %vm1169_vm15 = vmand %vm2437_vm7, %vm2926_vm3  ;;  %vm2930_vm7 = vcmp.ge.f32.partialorder %v2466_v37, 0.0  ;;  %v1633_v47 = vsel %vm2600_vm0, 1.0, %v1737_v1 }
 0x24a   : > { %980 = vst.msk [vmem:[#allocation4 + $0x3] ss:$8 sm:$0x3] %vm2392_vm9, %v977_v61  ;;  %v1022_v29 = vrot.slane %v1015_v38, %v2380_v14  ;;  %v1063_v53 = vmul.f32 %v1629_v28, %v1039_v41  ;;  %v1064_v11 = vmul.f32 %v1630_v31, %v1040_v42  ;;  %vm2620_vm4 = vmand %vm1132_vm12, %vm2927_vm6  ;;  %vm2936_vm12 = vcmp.ge.f32.partialorder %v2419_v8, 0.0 }
 0x24b   : > { %v1087_v44 = vpop.permute.xlu0 %1086  ;;  %vm2629_vm10 = vmand %vm2443_vm5, %vm2930_vm7  ;;  %vm1128_vm5 = vcmp.lt.s32.totalorder %v1908_v12, 80  ;;  %v1634_v62 = vsel %vm2620_vm4, 1.0, %v1737_v1  ;;  %vm2937_vm3 = vcmp.ge.f32.partialorder %v2422_v0, 0.0  ;;  %vm2939_vm0 = vcmp.le.f32.partialorder %v2419_v8, 15.0 }
 0x24c   : > { %v1029_v48 = vrot.slane %v1022_v29, %v2380_v14  ;;  %v1067_v49 = vcombine.low %v1063_v53, %v1064_v11  ;;  %v1089_v20 = vpop.permute.xlu1 %1088  ;;  %vm2635_vm8 = vmand %vm1169_vm15, %vm2933_vm2  ;;  %vm2942_vm4 = vcmp.le.f32.partialorder %v2422_v0, 15.0 }
 0x24d   : > { %v1091_v57 = vsel %vm1090_vm1, %v1087_v44, %v1089_v20  ;;  %v1092_v22 = vsel %vm1090_vm1, %v1089_v20, %v1087_v44  ;;  %vm1207_vm1 = vmand %vm2481_vm13, %vm2936_vm12  ;;  %vm2938_vm13 = vcmp.le.f32.partialorder %v2466_v37, 15.0  ;;  %v1635_v13 = vsel %vm2635_vm8, 1.0, %v1737_v1 }
 0x24e   : > { %1032 = vst.msk [vmem:[#allocation3 + $0x4] ss:$8 sm:$0x3] %vm2392_vm9, %v1029_v48  ;;  %v1074_v63 = vrot.slane %v1067_v49, %v2380_v14  ;;  %v1101_v23 = vmul.f32 %v1631_v26, %v1092_v22  ;;  %v1102_v46 = vmul.f32 %v1632_v45, %v1091_v57  ;;  %vm1208_vm15 = vmand %vm2501_vm14, %vm2937_vm3  ;;  %vm1166_vm14 = vcmp.lt.s32.totalorder %v1908_v12, 45 }
 0x24f   : > { %v1125_v21 = vpop.permute.xlu0 %1124  ;;  %vm1172_vm6 = vmand %vm2629_vm10, %vm2938_vm13  ;;  %vm1204_vm8 = vcmp.lt.s32.totalorder %v1908_v12, 83 }
 0x250   : > { %v1081_v9 = vrot.slane %v1074_v63, %v2380_v14  ;;  %v1105_v5 = vcombine.low %v1101_v23, %v1102_v46  ;;  %v1127_v6 = vpop.permute.xlu1 %1126  ;;  %vm2664_vm7 = vmand %vm1207_vm1, %vm2939_vm0  ;;  %v1636_v4 = vsel %vm1172_vm6, 1.0, %v1737_v1  ;;  %vm2947_vm1 = vnez %v2820_v39 }
 0x251   : > { %v1129_v43 = vsel %vm1128_vm5, %v1125_v21, %v1127_v6  ;;  %v1130_v10 = vsel %vm1128_vm5, %v1127_v6, %v1125_v21  ;;  %vm2674_vm10 = vmand %vm1208_vm15, %vm2942_vm4  ;;  %v1637_v38 = vsel %vm2664_vm7, 1.0, %v1737_v1  ;;  %vm2953_vm7 = vcmp.ge.f32.partialorder %v2466_v37, 0.0  ;;  %v1317_v23 = vld [vmem:[#allocation4 + $0x8] sm:$0xf]  ;;  %v1315_v6 = vld [vmem:[#allocation3 + $0x8] sm:$0xf] }
 0x252   : > { %1084 = vst.msk [vmem:[#allocation4 + $0x4] ss:$8 sm:$0x3] %vm2392_vm9, %v1081_v9  ;;  %v1112_v34 = vrot.slane %v1105_v5, %v2380_v14  ;;  %v1139_v15 = vmul.f32 %v1633_v47, %v1129_v43  ;;  %v1140_v40 = vmul.f32 %v1634_v62, %v1130_v10  ;;  %vm2945_vm2 = vmmov %vm2936_vm12  ;;  %v1638_v30 = vsel %vm2674_vm10, 1.0, %v1737_v1 }
 0x253   : > { %v1163_v18 = vpop.permute.xlu0 %1162  ;;  %vm1245_vm5 = vmand %vm1946_vm11, %vm2945_vm2  ;;  %vm1242_vm10 = vcmp.lt.s32.totalorder %v1908_v12, 3  ;;  %v1325_v62 = vrot.slane %v2308_v56, %v2299_v54 }
 0x254   : > { %v1119_v16 = vrot.slane %v1112_v34, %v2380_v14  ;;  %v1143_v17 = vcombine.low %v1139_v15, %v1140_v40  ;;  %v1165_v19 = vpop.permute.xlu1 %1164  ;;  %vm2946_vm12 = vmmov %vm2937_vm3 }
 0x255   : > { %vm1246_vm3 = vmand %vm2947_vm1, %vm2946_vm12  ;;  %v1167_v59 = vsel %vm1166_vm14, %v1163_v18, %v1165_v19  ;;  %v1168_v24 = vsel %vm1166_vm14, %v1165_v19, %v1163_v18  ;;  %vm2952_vm14 = vcmp.ge.f32.partialorder %v2450_v58, 0.0  ;;  %vm2955_vm12 = vcmp.le.f32.partialorder %v2466_v37, 15.0 }
 0x256   : > { %1122 = vst.msk [vmem:[#allocation3 + $0x5] ss:$8 sm:$0x3] %vm2392_vm9, %v1119_v16  ;;  %v1150_v25 = vrot.slane %v1143_v17, %v2380_v14  ;;  %v1177_v28 = vmul.f32 %v1635_v13, %v1168_v24  ;;  %v1178_v31 = vmul.f32 %v1636_v4, %v1167_v59  ;;  %vm2948_vm15 = vmmov %vm2939_vm0  ;;  %v1321_v37 = vrot.slane %v2306_v55, %v2299_v54 }
 0x257   : > { %vm2697_vm13 = vmand %vm1245_vm5, %vm2948_vm15  ;;  %v1201_v61 = vpop.permute.xlu0 %1200  ;;  %v1329_v55 = vsub.f32 %v1325_v62, %v1317_v23  ;;  %v1327_v32 = vsub.f32 %v1325_v62, %v1315_v6 }
 0x258   : > { %vm2951_vm6 = vmmov %vm2942_vm4  ;;  %v1157_v41 = vrot.slane %v1150_v25, %v2380_v14  ;;  %v1181_v42 = vcombine.low %v1177_v28, %v1178_v31  ;;  %v1203_v8 = vpop.permute.xlu1 %1202  ;;  %v1639_v33 = vsel %vm2697_vm13, 1.0, %v1737_v1  ;;  %vm1356_vm13 = vcmask 1047556  }
 0x259   : > { %vm1248_vm0 = vmand %vm1246_vm3, %vm2951_vm6  ;;  %v1205_v52 = vsel %vm1204_vm8, %v1201_v61, %v1203_v8  ;;  %v1206_v29 = vsel %vm1204_vm8, %v1203_v8, %v1201_v61  ;;  %vm1280_vm3 = vcmp.lt.s32.totalorder %v1908_v12, 125  ;;  %v1314_v12 = vld [vmem:[#allocation3] sm:$0xf]  ;;  %v1331_v13 = vmul.f32 %v1329_v55, %v1327_v32 }
 0x25a   : > { %vm1283_vm4 = vmand %vm1946_vm11, %vm2952_vm14  ;;  %1160 = vst.msk [vmem:[#allocation4 + $0x5] ss:$8 sm:$0x3] %vm2392_vm9, %v1157_v41  ;;  %v1188_v0 = vrot.slane %v1181_v42, %v2380_v14  ;;  %v1215_v53 = vmul.f32 %v1637_v38, %v1205_v52  ;;  %v1216_v11 = vmul.f32 %v1638_v30, %v1206_v29  ;;  %v1640_v26 = vsel %vm1248_vm0, 1.0, %v1737_v1 }
 0x25b   : > { %vm1284_vm2 = vmand %vm2947_vm1, %vm2953_vm7  ;;  %v1239_v44 = vpop.permute.xlu0 %1238  ;;  %vm2954_vm11 = vcmp.le.f32.partialorder %v2450_v58, 15.0  ;;  %v1316_v58 = vld [vmem:[#allocation4] sm:$0xf]  ;;  %v1326_v40 = vsub.f32 %v1321_v37, %v1314_v12  ;;  %vm2956_vm8 = vcmask 1043456  }
 0x25c   : > { %vm1285_vm5 = vmand %vm1283_vm4, %vm2954_vm11  ;;  %v1195_v39 = vrot.slane %v1188_v0, %v2380_v14  ;;  %v1219_v45 = vcombine.low %v1215_v53, %v1216_v11  ;;  %v1241_v35 = vpop.permute.xlu1 %1240  ;;  %v1328_v43 = vsub.f32 %v1321_v37, %v1316_v58 }
 0x25d   : > { %vm1286_vm1 = vmand %vm1284_vm2, %vm2955_vm12  ;;  %v1243_v48 = vsel %vm1242_vm10, %v1239_v44, %v1241_v35  ;;  %v1244_v49 = vsel %vm1242_vm10, %v1241_v35, %v1239_v44  ;;  %v1641_v27 = vsel %vm1285_vm5, 1.0, %v1737_v1 }
 0x25e   : > { %1198 = vst.msk [vmem:[#allocation3 + $0x6] ss:$8 sm:$0x3] %vm2392_vm9, %v1195_v39  ;;  %v1226_v20 = vrot.slane %v1219_v45, %v2380_v14  ;;  %v1253_v51 = vmul.f32 %v1639_v33, %v1244_v49  ;;  %v1254_v57 = vmul.f32 %v1640_v26, %v1243_v48  ;;  %v1642_v63 = vsel %vm1286_vm1, 1.0, %v1737_v1  ;;  %vm2957_vm15 = vmmov %vm2956_vm8 }
 0x25f   : > { %v1277_v22 = vpop.permute.xlu0 %1276  ;;  %v1330_v18 = vmul.f32 %v1328_v43, %v1326_v40  ;;  %v1339_v17 = vsel %vm2957_vm15, %v1331_v13, inf }
 0x260   : > { %v1233_v46 = vrot.slane %v1226_v20, %v2380_v14  ;;  %v1257_v21 = vcombine.low %v1253_v51, %v1254_v57  ;;  %v1279_v47 = vpop.permute.xlu1 %1278  ;;  %v1340_v59 = vrot.slane %v1339_v17, 4 }
 0x261   : > { %v1281_v9 = vsel %vm1280_vm3, %v1277_v22, %v1279_v47  ;;  %v1282_v5 = vsel %vm1280_vm3, %v1279_v47, %v1277_v22  ;;  %v1332_v16 = vsel %vm2956_vm8, %v1330_v18, inf  ;;  %v1435_v18 = vsub.s32 2, %v2296_v50 }
 0x262   : > { %1236 = vst.msk [vmem:[#allocation4 + $0x6] ss:$8 sm:$0x3] %vm2392_vm9, %v1233_v46  ;;  %v1264_v1 = vrot.slane %v1257_v21, %v2380_v14  ;;  %v1291_v10 = vmul.f32 %v1641_v27, %v1281_v9  ;;  %v1292_v7 = vmul.f32 %v1642_v63, %v1282_v5  ;;  %v1333_v19 = vrot.slane %v1332_v16, 4 }
 0x263   : > { %v1341_v31 = vmin.f32 %v1339_v17, %v1340_v59  ;;  %v1451_v59 = vsub.s32 3, %v2296_v50 }
 0x264   : > { %v1271_v34 = vrot.slane %v1264_v1, %v2380_v14  ;;  %v1295_v15 = vcombine.low %v1291_v10, %v1292_v7  ;;  %v1334_v28 = vmin.f32 %v1332_v16, %v1333_v19 }
 0x265   : > { %v1342_v52 = vrot.slane %v1341_v31, 2 }
 0x266   : > { %1274 = vst.msk [vmem:[#allocation3 + $0x7] ss:$8 sm:$0x3] %vm2392_vm9, %v1271_v34  ;;  %v1302_v56 = vrot.slane %v1295_v15, %v2380_v14  ;;  %v1335_v8 = vrot.slane %v1334_v28, 2 }
 0x267   : > { %v1343_v33 = vmin.f32 %v1341_v31, %v1342_v52 }
 0x268   : > { %v1309_v4 = vrot.slane %v1302_v56, %v2380_v14  ;;  %v1336_v44 = vmin.f32 %v1334_v28, %v1335_v8  ;;  %v1419_v56 = vsub.s32 1, %v2296_v50 }
 0x269   : > { %v1344_v49 = vrot.slane %v1343_v33, 1 }
 0x26a   : > { %1312 = vst.msk [vmem:[#allocation4 + $0x7] ss:$8 sm:$0x3] %vm2392_vm9, %v1309_v4  ;;  %v1337_v48 = vrot.slane %v1336_v44, 1 }
 0x26b   : > { %v1345_v27 = vmin.f32 %v1343_v33, %v1344_v49 }
 0x26c   : > { %v1338_v22 = vmin.f32 %v1336_v44, %v1337_v48 }
 0x26d   : > { %v1346_v24 = vld [vmem:[#allocation3] sm:$0xf0]  ;;  %v1347_v25 = vld [vmem:[#allocation3 + $0x8] sm:$0xf0] }
 0x26e   : > { %v1350_v38 = vsub.f32 %v1321_v37, %v1346_v24  ;;  %v1351_v30 = vsub.f32 %v1325_v62, %v1347_v25 }
 0x270   : > { %v1401_v16 = vpop.permute.xlu0 %1400 }
 0x271   : > { %v1348_v36 = vld [vmem:[#allocation4] sm:$0xf0]  ;;  %v1349_v61 = vld [vmem:[#allocation4 + $0x8] sm:$0xf0]  ;;  %v1415_v4 = vpop.permute.xlu1 %1414 }
 0x272   : > { %v1352_v41 = vsub.f32 %v1321_v37, %v1348_v36  ;;  %v1353_v42 = vsub.f32 %v1325_v62, %v1349_v61 }
 0x274   : > { %v1354_v14 = vmul.f32 %v1352_v41, %v1350_v38  ;;  %v1355_v60 = vmul.f32 %v1353_v42, %v1351_v30 }
 0x276   : > { %v1357_v29 = vsel %vm1356_vm13, %v1354_v14, inf  ;;  %v1364_v0 = vsel %vm1356_vm13, %v1355_v60, inf  ;;  %v1431_v60 = vpop.permute.xlu1 %1430 }
 0x277   : > { %v1358_v53 = vrot.slane %v1357_v29, 4  ;;  %v1365_v11 = vrot.slane %v1364_v0, 4 }
 0x279   : > { %v1359_v26 = vmin.f32 %v1357_v29, %v1358_v53  ;;  %v1366_v39 = vmin.f32 %v1364_v0, %v1365_v11  ;;  %v1447_v29 = vpop.permute.xlu0 %1446 }
 0x27b   : > { %v1360_v45 = vrot.slane %v1359_v26, 2  ;;  %v1367_v35 = vrot.slane %v1366_v39, 2 }
 0x27d   : > { %v1361_v20 = vmin.f32 %v1359_v26, %v1360_v45  ;;  %v1368_v51 = vmin.f32 %v1366_v39, %v1367_v35  ;;  %v1465_v45 = vpop.permute.xlu1 %1464 }
 0x27f   : > { %v1362_v57 = vrot.slane %v1361_v20, 1  ;;  %v1369_v58 = vrot.slane %v1368_v51, 1 }
 0x281   : > { %v1363_v63 = vmin.f32 %v1361_v20, %v1362_v57  ;;  %v1370_v23 = vmin.f32 %v1368_v51, %v1369_v58 }
 0x283   : > { %v1373_v37 = vadd.f32 %v1363_v63, %v1338_v22  ;;  %v1374_v46 = vadd.f32 %v1370_v23, %v1345_v27  ;;  %v1371_v21 = vmax.f32 %v1338_v22, %v1363_v63  ;;  %v1372_v47 = vmax.f32 %v1345_v27, %v1370_v23 }
 0x285   : > { %v1375_v62 = vmul.f32 0.5, %v1373_v37  ;;  %v1376_v9 = vmul.f32 0.5, %v1374_v46  ;;  %v1487_v46 = vpop.permute.xlu1 %1486 }
 0x287   : > { %v1377_v5 = vadd.f32 %v1375_v62, %v1371_v21  ;;  %v1378_v12 = vadd.f32 %v1376_v9, %v1372_v47  ;;  %v1501_v47 = vpop.permute.xlu0 %1500 }
 0x289   : > { %v1379_v6 = vmul.f32 0.5, %v1377_v5  ;;  %v1380_v43 = vmul.f32 0.5, %v1378_v12 }
 0x28b   : > { %v1381_v1 = vmax.f32 %v1379_v6, 0.0  ;;  %v1382_v10 = vmax.f32 %v1380_v43, 0.0 }
 0x28d   : > { %v1643_v7 = vmul.f32 -1.442695, %v1381_v1  ;;  %v1644_v55 = vmul.f32 -1.442695, %v1382_v10 }
 0x28f   : > { %1705 = vpow2.f32 %v1643_v7 }
 0x290   : > { %1707 = vpow2.f32 %v1644_v55  ;;  %v1519_v55 = vpop.permute.xlu1 %1518 }
 0x299   : > { %v1706_v34 = vpop.eup %1705 }
 0x29a   : > { %v1708_v15 = vpop.eup %1707  ;;  %v1389_v40 = vadd.f32 1.0, %v1706_v34 }
 0x29b   : > { %v1390_v32 = vadd.f32 1.0, %v1708_v15 }
 0x29c   : > { %1709 = vrcp.f32 %v1389_v40 }
 0x29d   : > { %1711 = vrcp.f32 %v1390_v32 }
 0x2a6   : > { %v1710_v13 = vpop.eup %1709 }
 0x2a7   : > { %v1712_v17 = vpop.eup %1711  ;;  %v1395_v19 = vmul.f32 %v1710_v13, %v1852_v2 }
 0x2a8   : > { %v1396_v24 = vmul.f32 %v1712_v17, %v1860_v3 }
 0x2a9   : > { %v1420_v25 = vrot.slane %v1395_v19, %v1419_v56  ;;  %v1436_v28 = vrot.slane %v1395_v19, %v1435_v18  ;;  %v1406_v31 = vrot.slane %v1395_v19, %v2299_v54  ;;  %v1452_v42 = vrot.slane %v1395_v19, %v1451_v59 }
 0x2aa   : > { %v1424_v36 = vrot.slane %v1396_v24, %v1419_v56  ;;  %v1440_v61 = vrot.slane %v1396_v24, %v1435_v18  ;;  %v1410_v38 = vrot.slane %v1396_v24, %v2299_v54  ;;  %v1456_v52 = vrot.slane %v1396_v24, %v1451_v59 }
 0x2ab   : > { %v1425_v30 = vmul.f32 %v1420_v25, %v1415_v4  ;;  %v1411_v41 = vmul.f32 %v1406_v31, %v1401_v16  ;;  %v1441_v0 = vmul.f32 %v1436_v28, %v1431_v60  ;;  %v1457_v44 = vmul.f32 %v1452_v42, %v1447_v29 }
 0x2ac   : > { %v1426_v14 = vmul.f32 %v1424_v36, %v1415_v4  ;;  %v1412_v8 = vmul.f32 %v1410_v38, %v1401_v16  ;;  %v1442_v53 = vmul.f32 %v1440_v61, %v1431_v60  ;;  %v1458_v26 = vmul.f32 %v1456_v52, %v1447_v29 }
 0x2ad   : > { %v1427_v50 = vadd.f32 %v1425_v30, %v1411_v41 }
 0x2ae   : > { %v1428_v3 = vadd.f32 %v1426_v14, %v1412_v8 }
 0x2af   : > { %v1443_v11 = vadd.f32 %v1441_v0, %v1427_v50 }
 0x2b0   : > { %v1444_v33 = vadd.f32 %v1442_v53, %v1428_v3 }
 0x2b1   : > { %v1459_v39 = vadd.f32 %v1457_v44, %v1443_v11 }
 0x2b2   : > { %v1460_v35 = vadd.f32 %v1458_v26, %v1444_v33 }
 0x2b3   : > { %v1467_v48 = vadd.f32 %v1465_v45, %v1459_v39 }
 0x2b4   : > { %v1468_v49 = vadd.f32 %v1465_v45, %v1460_v35 }
 0x2b5   : > { %v1645_v20 = vmul.f32 -1.442695, %v1467_v48 }
 0x2b6   : > { %v1646_v51 = vmul.f32 -1.442695, %v1468_v49 }
 0x2b7   : > { %1713 = vpow2.f32 %v1645_v20 }
 0x2b8   : > { %1715 = vpow2.f32 %v1646_v51 }
 0x2c1   : > { %v1714_v57 = vpop.eup %1713 }
 0x2c2   : > { %v1716_v58 = vpop.eup %1715  ;;  %v1475_v22 = vadd.f32 1.0, %v1714_v57 }
 0x2c3   : > { %v1476_v27 = vadd.f32 1.0, %v1716_v58 }
 0x2c4   : > { %1717 = vrcp.f32 %v1475_v22 }
 0x2c5   : > { %1719 = vrcp.f32 %v1476_v27 }
 0x2ce   : > { %v1718_v63 = vpop.eup %1717 }
 0x2cf   : > { %v1720_v23 = vpop.eup %1719  ;;  %v1481_v37 = vmul.f32 %v1718_v63, %v1467_v48 }
 0x2d0   : > { %v1482_v21 = vmul.f32 %v1720_v23, %v1468_v49 }
 0x2d1   : > { %v1492_v62 = vrot.slane %v1481_v37, %v2299_v54  ;;  %v1506_v9 = vrot.slane %v1481_v37, %v1419_v56 }
 0x2d2   : > { %v1496_v5 = vrot.slane %v1482_v21, %v2299_v54  ;;  %v1510_v12 = vrot.slane %v1482_v21, %v1419_v56 }
 0x2d3   : > { %v1497_v6 = vmul.f32 %v1492_v62, %v1487_v46  ;;  %v1511_v43 = vmul.f32 %v1506_v9, %v1501_v47 }
 0x2d4   : > { %v1498_v1 = vmul.f32 %v1496_v5, %v1487_v46  ;;  %v1512_v10 = vmul.f32 %v1510_v12, %v1501_v47 }
 0x2d5   : > { %v1513_v7 = vadd.f32 %v1511_v43, %v1497_v6 }
 0x2d6   : > { %v1514_v34 = vadd.f32 %v1512_v10, %v1498_v1 }
 0x2d7   : > { %v1521_v15 = vadd.f32 %v1519_v55, %v1513_v7 }
 0x2d8   : > { %v1522_v40 = vadd.f32 %v1519_v55, %v1514_v34 }
 0x2d9   : > { %v1647_v32 = vmul.f32 -1.442695, %v1521_v15 }
 0x2da   : > { %v1648_v18 = vmul.f32 -1.442695, %v1522_v40 }
 0x2db   : > { %1721 = vpow2.f32 %v1647_v32 }
 0x2dc   : > { %1723 = vpow2.f32 %v1648_v18 }
 0x2e5   : > { %v1722_v13 = vpop.eup %1721 }
 0x2e6   : > { %v1724_v4 = vpop.eup %1723  ;;  %v1529_v16 = vadd.f32 1.0, %v1722_v13 }
 0x2e7   : > { %v1530_v17 = vadd.f32 1.0, %v1724_v4 }
 0x2e8   : > { %1725 = vrcp.f32 %v1529_v16 }
 0x2e9   : > { %1727 = vrcp.f32 %v1530_v17 }
 0x2f2   : > { %v1726_v54 = vpop.eup %1725 }
 0x2f3   : > { %v1728_v56 = vpop.eup %1727  ;;  %v1535_v19 = vadd.f32 1.0, %v1726_v54 }
 0x2f4   : > { %v1536_v59 = vadd.f32 1.0, %v1728_v56 }
 0x2f6   : > { %v1539_v24 = vcombine.low %v1535_v19, %v1536_v59 }
 0x2f8   : > { %v1541_v25 = vmul.f32 %v1539_v24, %v1852_v2 }
 0x2fa   : > { %1542 = vst [vmem:[%s334_s30] sm:$0xff] %v1541_v25 }
 0x2fb PF: > { %s21_s11 = sadd.s32 1, %s1735_s11  }
 0x2fc   : > { %p18_p4 = scmp.ge.s32.totalorder %s21_s11, 4  }
 0x2fe   :  { %20 = sbr.rel (!%p18_p4) target bundleno = 3 (0x3), region = 100 }

// kernel: mlc_forward.1
= control target key start
LH: loop header
LB: loop body
LE: loop exit
PB: predicated region body
PF: predicated region fallthrough
CT: control target
= control target key end

     0   :  { %s1812_s11 = smov 0   ;;  %s2772_s0 = inlined_call_operand.vmem [shape: f32[2,4,256], index: 0, kind: input, shape index: {}]   ;;  %s2773_s1 = inlined_call_operand.vmem [shape: bf16[4,72], index: 1, kind: input, shape index: {}]   ;;  %s2774_s2 = inlined_call_operand.vmem [shape: f32[4,1], index: 2, kind: input, shape index: {}]   ;;  %s2775_s3 = inlined_call_operand.vmem [shape: f32[1,4], index: 3, kind: input, shape index: {}]   ;;  %s2776_s4 = inlined_call_operand.<no memory space> [shape: f32[1,1], index: 4, kind: input, shape index: {}]   ;;  %s2777_s5 = inlined_call_operand.vmem [shape: f32[2,4], index: 5, kind: input, shape index: {}]   ;;  %s2778_s6 = inlined_call_operand.vmem [shape: f32[2,1], index: 6, kind: input, shape index: {}]   ;;  %s2779_s7 = inlined_call_operand.vmem [shape: f32[4,2], index: 7, kind: input, shape index: {}]   ;;  %s2780_s8 = inlined_call_operand.vmem [shape: f32[4,1], index: 8, kind: input, shape index: {}]   ;;  %s2781_s9 = inlined_call_operand.vmem [shape: f32[2,4,256], index: 9, kind: output, shape index: {}]  }
   0x1   :  { %v14_v0 = vstv %s2776_s4 }
   0x2   :  { %15 = vst [vmem:[#allocation5] sm:$0x1] %v14_v0 }
   0x3 LB: > { %s1598_s12 = sadd.s32 4294967295, %s1735_s11   ;;  %p1602_p0 = scmp.ge.s32.totalorder %s1735_s11, 1  ;;  %s1735_s11 = sphi %s1812_s11, %s21_s11  }
   0x4   : > { %p289_p1 = scmp.lt.s32.totalorder %s1735_s11, 3 }
   0x6   : > { %p290_p2 = pnand %p1602_p0, %p289_p1 }
   0x7   : > { %p1820_p3 = scmp.lt.s32.totalorder (!%p290_p2), %s1598_s12, 1  ;;  %v1737_v1 = vmov (!%p290_p2), 0.0   ;;  %s1738_s17 = smov (!%p290_p2), 16   ;;  %v1746_v4 = vmov (!%p290_p2), 0   ;;  %v598_v5 = vld [vmem:[%s2774_s2] sm:$0xf] (!%p290_p2)  ;;  %v337_v11 = vlaneseq (!%p290_p2) }
   0x8   : > { %293 = sbr.rel (%p290_p2) target bundleno = 763 (0x2fb), region = 56  ;;  %354 = vst [vmem:[#allocation2 + $0x10] sm:$0xff] (!%p290_p2), %v1737_v1  ;;  %355 = vst [vmem:[#allocation2 + $0x18] sm:$0xff] (!%p290_p2), %v1737_v1  ;;  %s1739_s18 = smov (!%p290_p2), 17   ;;  %647 = vmatprep.mubr.bf16.mxu0 (!%p290_p2), %v1746_v4  ;;  %1683 = vset.pattern.permute.xlu0 (!%p290_p2), %v1746_v4  ;;  %v670_v6 = vld [vmem:[%s2775_s3] sm:$0x1] (!%p290_p2) }
   0x9   : > { %352 = vst [vmem:[#allocation2] sm:$0xff] (!%p290_p2), %v1737_v1  ;;  %353 = vst [vmem:[#allocation2 + $0x8] sm:$0xff] (!%p290_p2), %v1737_v1  ;;  %s1740_s19 = smov (!%p290_p2), 15   ;;  %s1741_s20 = smov (!%p290_p2), 1   ;;  %v1747_v7 = vmov (!%p290_p2), 1   ;;  %v1748_v8 = vmov (!%p290_p2), 2  }
   0xa   : > { %356 = vst [vmem:[#allocation2 + $0x20] sm:$0xff] (!%p290_p2), %v1737_v1  ;;  %357 = vst [vmem:[#allocation2 + $0x28] sm:$0xff] (!%p290_p2), %v1737_v1  ;;  %s1742_s21 = smov (!%p290_p2), 127   ;;  %s1743_s22 = smov (!%p290_p2), 113   ;;  %1684 = vset.pattern.permute.xlu1 (!%p290_p2), %v1747_v7  ;;  %v1749_v9 = vmov (!%p290_p2), 3   ;;  %v1908_v12 = vand.u32 (!%p290_p2), 127, %v337_v11 }
   0xb   : > { %358 = vst [vmem:[#allocation2 + $0x30] sm:$0xff] (!%p290_p2), %v1737_v1  ;;  %359 = vst [vmem:[#allocation2 + $0x38] sm:$0xff] (!%p290_p2), %v1737_v1  ;;  %s1744_s23 = smov (!%p290_p2), 112   ;;  %s1745_s24 = smov (!%p290_p2), 111   ;;  %v736_v10 = vld [vmem:[#allocation5] sm:$0x1] (!%p290_p2) }
   0xc   : > { %360 = vst [vmem:[#allocation2 + $0x40] sm:$0xff] (!%p290_p2), %v1737_v1  ;;  %361 = vst [vmem:[#allocation2 + $0x48] sm:$0xff] (!%p290_p2), %v1737_v1  ;;  %v339_v13 = vadd.s32 (!%p290_p2), 128, %v1908_v12  ;;  %v340_v14 = vcvt.s32.f32 (!%p290_p2), %v1908_v12  ;;  %v2810_v36 = vmov (!%p290_p2), 0  ;;  %v2819_v39 = vmov (!%p290_p2), 0  ;;  %s1750_s10 = smov (!%p290_p2), 51  }
   0xd   : > { %362 = vst [vmem:[#allocation2 + $0x50] sm:$0xff] (!%p290_p2), %v1737_v1  ;;  %363 = vst [vmem:[#allocation2 + $0x58] sm:$0xff] (!%p290_p2), %v1737_v1  ;;  %s1751_s13 = smov (!%p290_p2), 77   ;;  %s1752_s14 = smov (!%p290_p2), 48  }
   0xe   : > { %364 = vst [vmem:[#allocation2 + $0x60] sm:$0xff] (!%p290_p2), %v1737_v1  ;;  %365 = vst [vmem:[#allocation2 + $0x68] sm:$0xff] (!%p290_p2), %v1737_v1  ;;  %v341_v15 = vcvt.s32.f32 (!%p290_p2), %v339_v13  ;;  %v342_v16 = vadd.f32 (!%p290_p2), 0.5, %v340_v14  ;;  %s1753_s15 = smov (!%p290_p2), 80  }
   0xf   : > { %366 = vst [vmem:[#allocation2 + $0x70] sm:$0xff] %v1737_v1  ;;  %367 = vst [vmem:[#allocation2 + $0x78] sm:$0xff] %v1737_v1  ;;  %s2959_s12 = smov (!%p1820_p3, %s1598_s12), 1 }
  0x10   : > { %368 = vst [vmem:[#allocation2 + $0x80] sm:$0xff] %v1737_v1  ;;  %369 = vst [vmem:[#allocation2 + $0x88] sm:$0xff] %v1737_v1  ;;  %s1651_s4 = sshll.u32 %s2959_s12, 3  ;;  %v343_v17 = vadd.f32 0.5, %v341_v15  ;;  %v344_v18 = vmul.f32 0.0625, %v342_v16 }
  0x11   : > { %s329_s16 = scalar_lea.vmem %s2772_s0, %s1651_s4  ;;  %s334_s30 = scalar_lea.vmem %s2781_s9, %s1651_s4 }
  0x12   : > { %v1852_v2 = vld [vmem:[%s329_s16] sm:$0xff]  ;;  %v345_v19 = vmul.f32 0.0625, %v343_v17  ;;  %v1912_v20 = vfloor.f32 %v344_v18  ;;  %s1754_s16 = smov 45  }
  0x13   : > { %406 = vrot.lane.b32.xlu1 %v1852_v2, %s1738_s17  ;;  %373 = vrot.lane.b32.xlu0 %v1852_v2, %s1739_s18  ;;  %v1860_v3 = vcombine.high %v1852_v2, %v1852_v2  ;;  %483 = vst [vmem:[#allocation2 + $0x40] sm:$0xf] %v1852_v2 }
  0x14   : > { %v1914_v21 = vfloor.f32 %v345_v19  ;;  %v348_v22 = vmul.f32 16.0, %v1912_v20  ;;  %v380_v24 = vadd.f32 -1.0, %v1912_v20  ;;  %vm465_vm4 = vcmp.ge.f32.partialorder %v1912_v20, 0.0 }
  0x15   : > { %484 = vst [vmem:[#allocation2 + $0x48] sm:$0xf] %v1860_v3  ;;  %vm467_vm5 = vcmp.le.f32.partialorder %v1912_v20, 15.0  ;;  %v511_v43 = vadd.f32 1.0, %v1912_v20 }
  0x16   : > { %v349_v23 = vmul.f32 16.0, %v1914_v21  ;;  %v381_v25 = vadd.f32 -1.0, %v1914_v21  ;;  %v1920_v26 = vsub.f32 %v340_v14, %v348_v22  ;;  %vm382_vm0 = vcmp.ge.f32.partialorder %v380_v24, 0.0  ;;  %vm1946_vm11 = vmand %vm465_vm4, %vm467_vm5 }
  0x17   : > { %431 = vrot.lane.b32.xlu0 %v1852_v2, %s1740_s19  ;;  %408 = vrot.lane.b32.xlu1 %v1860_v3, %s1738_s17  ;;  %vm384_vm1 = vcmp.le.f32.partialorder %v380_v24, 15.0  ;;  %vm468_vm4 = vcmp.le.f32.partialorder %v1914_v21, 15.0  ;;  %v512_v45 = vadd.f32 1.0, %v1914_v21 }
  0x18   : > { %v1922_v27 = vsub.f32 %v341_v15, %v349_v23  ;;  %vm383_vm2 = vcmp.ge.f32.partialorder %v381_v25, 0.0  ;;  %vm385_vm3 = vcmp.le.f32.partialorder %v381_v25, 15.0  ;;  %v1925_v28 = vadd.f32 1.0, %v1920_v26  ;;  %vm1932_vm6 = vmand %vm382_vm0, %vm384_vm1 }
  0x19   : > { %vm2783_vm7 = vcmp.ge.f32.partialorder %v1920_v26, 0.0  ;;  %vm1937_vm8 = vmand %vm383_vm2, %vm385_vm3  ;;  %v1944_v32 = vadd.f32 -1.0, %v1920_v26  ;;  %vm2786_vm15 = vcmp.le.f32.partialorder %v1920_v26, 15.0 }
  0x1a   : > { %v1928_v29 = vadd.f32 1.0, %v1922_v27  ;;  %vm2782_vm9 = vcmp.ge.f32.partialorder %v1922_v27, 0.0  ;;  %vm2784_vm10 = vcmp.ge.f32.partialorder %v1925_v28, 0.0  ;;  %vm417_vm12 = vmand %vm1932_vm6, %vm2783_vm7  ;;  %v1956_v34 = vadd.f32 -1.0, %v1922_v27 }
  0x1b   : > { %433 = vrot.lane.b32.xlu1 %v1860_v3, %s1740_s19  ;;  %375 = vrot.lane.b32.xlu0 %v1860_v3, %s1739_s18  ;;  %vm418_vm14 = vmand %vm1937_vm8, %vm2782_vm9  ;;  %vm2787_vm0 = vcmp.le.f32.partialorder %v1922_v27, 15.0  ;;  %vm2788_vm3 = vcmp.le.f32.partialorder %v1925_v28, 15.0  ;;  %vm2789_vm7 = vcmp.le.f32.partialorder %v1944_v32, 15.0 }
  0x1c   : > { %vm2785_vm13 = vcmp.ge.f32.partialorder %v1928_v29, 0.0  ;;  %vm442_vm1 = vmand %vm1932_vm6, %vm2784_vm10 }
  0x1d   : > { %vm443_vm2 = vmand %vm1937_vm8, %vm2785_vm13  ;;  %vm466_vm13 = vcmp.ge.f32.partialorder %v1914_v21, 0.0 }
  0x1e   : > { %vm1977_vm9 = vmand %vm417_vm12, %vm2786_vm15  ;;  %vm2814_vm12 = vcmp.le.f32.partialorder %v1928_v29, 15.0 }
  0x1f   : > { %458 = vrot.lane.b32.xlu1 %v1860_v3, %s1741_s20  ;;  %456 = vrot.lane.b32.xlu0 %v1852_v2, %s1741_s20  ;;  %vm1984_vm10 = vmand %vm418_vm14, %vm2787_vm0  ;;  %vm2817_vm14 = vcmp.ge.f32.partialorder %v1944_v32, 0.0  ;;  %v2042_v46 = vsel %vm1977_vm9, 1.0, %v1737_v1  ;;  %vm513_vm9 = vcmp.ge.f32.partialorder %v511_v43, 0.0 }
  0x20   : > { %v2811_v36 = vsel %vm1984_vm10, 4294967295, %v2810_v36  ;;  %vm1992_vm5 = vmand %vm442_vm1, %vm2788_vm3  ;;  %vm2818_vm10 = vcmp.ge.f32.partialorder %v1956_v34, 0.0 }
  0x21   : > { %vm1998_vm15 = vmand %vm443_vm2, %vm2814_vm12  ;;  %vm2790_vm2 = vcmp.le.f32.partialorder %v1956_v34, 15.0  ;;  %v2088_v58 = vsel %vm1992_vm5, 1.0, %v1737_v1  ;;  %vm2840_vm5 = vcmp.le.f32.partialorder %v1925_v28, 15.0 }
  0x22   : > { %vm392_vm0 = vmand %vm1932_vm6, %vm2817_vm14  ;;  %v2093_v59 = vsel %vm1998_vm15, 1.0, %v1737_v1 }
  0x23   : > { %487 = vrot.lane.b32.xlu1 %v1860_v3, %s1742_s21  ;;  %485 = vrot.lane.b32.xlu0 %v1852_v2, %s1742_s21  ;;  %vm393_vm1 = vmand %vm1937_vm8, %vm2818_vm10 }
  0x24   : > { %vm2011_vm3 = vmand %vm466_vm13, %vm468_vm4  ;;  %vm2791_vm13 = vcmp.lt.s32.totalorder %v1908_v12, 16  ;;  %vm2827_vm4 = vnez %v2811_v36 }
  0x25   : > { %v2820_v39 = vsel %vm2011_vm3, 4294967295, %v2819_v39  ;;  %vm2018_vm12 = vmand %vm392_vm0, %vm2789_vm7  ;;  %v2047_v47 = vsel %vm2827_vm4, 1.0, %v1737_v1  ;;  %vm514_vm4 = vcmp.ge.f32.partialorder %v512_v45, 0.0 }
  0x26   : > { %vm2823_vm6 = vmmov %vm2817_vm14  ;;  %v2098_v60 = vsel %vm2018_vm12, 1.0, %v1737_v1  ;;  %vm2843_vm12 = vcmp.lt.s32.totalorder %v1908_v12, 15 }
  0x27   : > { %506 = vrot.lane.b32.xlu1 %v1860_v3, %s1743_s22  ;;  %504 = vrot.lane.b32.xlu0 %v1852_v2, %s1743_s22  ;;  %vm471_vm14 = vmand %vm1946_vm11, %vm2823_vm6 }
  0x28   : > { %vm2824_vm8 = vmmov %vm2818_vm10 }
  0x29   : > { %vm472_vm10 = vmand %vm2011_vm3, %vm2824_vm8  ;;  %vm515_vm8 = vcmp.le.f32.partialorder %v511_v43, 15.0 }
  0x2a   : > { %vm2034_vm0 = vmand %vm393_vm1, %vm2790_vm2 }
  0x2b   : > { %533 = vrot.lane.b32.xlu1 %v1860_v3, %s1744_s23  ;;  %531 = vrot.lane.b32.xlu0 %v1852_v2, %s1744_s23  ;;  %vm2051_vm6 = vmand %vm471_vm14, %vm2789_vm7  ;;  %vm2832_vm7 = vcmp.ge.f32.partialorder %v1925_v28, 0.0  ;;  %vm516_vm14 = vcmp.le.f32.partialorder %v512_v45, 15.0  ;;  %v2103_v61 = vsel %vm2034_vm0, 1.0, %v1737_v1 }
  0x2c   : > { %vm2057_vm1 = vmand %vm472_vm10, %vm2790_vm2  ;;  %vm2835_vm2 = vcmp.ge.f32.partialorder %v1928_v29, 0.0  ;;  %v2145_v22 = vsel %vm2051_vm6, 1.0, %v1737_v1  ;;  %vm2853_vm6 = vcmp.ge.f32.partialorder %v1956_v34, 0.0 }
  0x2d   : > { %vm2071_vm10 = vmand %vm1946_vm11, %vm2832_vm7  ;;  %v2150_v23 = vsel %vm2057_vm1, 1.0, %v1737_v1 }
  0x2e   : > { %vm2107_vm7 = vmand %vm513_vm9, %vm515_vm8  ;;  %vm2845_vm9 = vcmp.lt.s32.totalorder %v1908_v12, 17 }
  0x2f   : > { %552 = vrot.lane.b32.xlu1 %v1860_v3, %s1745_s24  ;;  %550 = vrot.lane.b32.xlu0 %v1852_v2, %s1745_s24  ;;  %vm2844_vm0 = vmmov %vm2843_vm12 }
  0x30   : > { %vm2846_vm8 = vmmov %vm2845_vm9 }
  0x31   : > { %vm2130_vm15 = vmand %vm514_vm4, %vm516_vm14  ;;  %vm2850_vm14 = vcmp.le.f32.partialorder %v1928_v29, 15.0 }
  0x32   : > { %vm520_vm1 = vmand %vm2130_vm15, %vm2853_vm6 }
  0x33   : > { %601 = vperm.xlu0 %1683, %v598_v5   ;;  %683 = vperm.xlu1 %1684, %v670_v6  }
  0x37   : > { %1686 = vset.pattern.permute.xlu0 %v1748_v8  ;;  %1685 = vset.pattern.permute.xlu1 %v1746_v4 }
  0x38   : > { %701 = vperm.xlu0 %1686, %v670_v6   ;;  %673 = vperm.xlu1 %1685, %v670_v6  }
  0x3c   : > { %1689 = vset.pattern.permute.xlu0 %v1746_v4  ;;  %1687 = vset.pattern.permute.xlu1 %v1749_v9 }
  0x3d   : > { %719 = vperm.xlu1 %1687, %v670_v6  }
  0x41   : > { %1688 = vset.pattern.permute.xlu1 %v1746_v4 }
  0x42   : > { %739 = vperm.xlu1 %1688, %v736_v10  }
  0x46   : > { %1690 = vset.pattern.permute.xlu1 %v1747_v7 }
  0x85   : > { %v407_v41 = vpop.permute.xlu1 %406  ;;  %v374_v42 = vpop.permute.xlu0 %373 }
  0x89   : > { %v432_v49 = vpop.permute.xlu0 %431  ;;  %v409_v50 = vpop.permute.xlu1 %408 }
  0x8a   : > { %v411_v52 = vsel %vm2791_vm13, %v407_v41, %v409_v50  ;;  %v412_v53 = vsel %vm2791_vm13, %v409_v50, %v407_v41  ;;  %vm2081_vm13 = vmand %vm2011_vm3, %vm2835_vm2 }
  0x8b   : > { %v427_v55 = vmul.f32 %v2042_v46, %v412_v53  ;;  %v428_v56 = vmul.f32 %v2047_v47, %v411_v52  ;;  %vm2116_vm2 = vmand %vm2071_vm10, %vm2840_vm5  ;;  %vm2849_vm10 = vcmp.ge.f32.partialorder %v1944_v32, 0.0 }
  0x8c   : > { %vm519_vm5 = vmand %vm2107_vm7, %vm2849_vm10  ;;  %vm2859_vm10 = vcmp.ge.f32.partialorder %v1920_v26, 0.0  ;;  %v2184_v40 = vsel %vm2116_vm2, 1.0, %v1737_v1  ;;  %vm2864_vm2 = vcmp.le.f32.partialorder %v1920_v26, 15.0 }
  0x8d   : > { %429 = vst [vmem:[#allocation2 + $0x10] sm:$0xf] %v427_v55  ;;  %430 = vst [vmem:[#allocation2 + $0x18] sm:$0xf] %v428_v56  ;;  %v434_v63 = vpop.permute.xlu1 %433  ;;  %v376_v0 = vpop.permute.xlu0 %375 }
  0x8e   : > { %v436_v6 = vsel %vm2843_vm12, %v432_v49, %v434_v63  ;;  %v437_v10 = vsel %vm2844_vm0, %v434_v63, %v432_v49  ;;  %v378_v13 = vsel %vm2845_vm9, %v374_v42, %v376_v0  ;;  %v379_v14 = vsel %vm2846_vm8, %v376_v0, %v374_v42  ;;  %vm2156_vm4 = vmand %vm2081_vm13, %vm2850_vm14 }
  0x8f   : > { %v452_v16 = vmul.f32 %v2088_v58, %v437_v10  ;;  %v453_v17 = vmul.f32 %v2093_v59, %v436_v6  ;;  %v402_v18 = vmul.f32 %v2098_v60, %v379_v14  ;;  %v403_v19 = vmul.f32 %v2103_v61, %v378_v13  ;;  %vm538_vm14 = vmand %vm2107_vm7, %vm2859_vm10 }
  0x90   : > { %vm2854_vm12 = vcmp.lt.s32.totalorder %v1908_v12, 1  ;;  %vm2856_vm13 = vcmp.le.f32.partialorder %v1944_v32, 15.0  ;;  %vm2794_vm8 = vcmp.lt.s32.totalorder %v1908_v12, 127  ;;  %v2189_v32 = vsel %vm2156_vm4, 1.0, %v1737_v1  ;;  %vm2207_vm4 = vmand %vm538_vm14, %vm2864_vm2 }
  0x91   : > { %454 = vst [vmem:[#allocation2 + $0x20] sm:$0xf] %v452_v16  ;;  %455 = vst [vmem:[#allocation2 + $0x28] sm:$0xf] %v453_v17  ;;  %v459_v25 = vpop.permute.xlu1 %458  ;;  %v457_v30 = vpop.permute.xlu0 %456  ;;  %v2260_v15 = vsel %vm2207_vm4, 1.0, %v1737_v1  ;;  %vm554_vm4 = vcmp.lt.s32.totalorder %v1908_v12, 111 }
  0x92   : > { %404 = vst [vmem:[#allocation2] sm:$0xf] %v402_v18  ;;  %405 = vst [vmem:[#allocation2 + $0x8] sm:$0xf] %v403_v19  ;;  %v461_v31 = vsel %vm2854_vm12, %v457_v30, %v459_v25 }
  0x93   : > { %vm2855_vm0 = vmmov %vm2854_vm12  ;;  %v480_v38 = vmul.f32 %v2150_v23, %v461_v31  ;;  %vm2861_vm12 = vcmp.ge.f32.partialorder %v1922_v27, 0.0 }
  0x94   : > { %v462_v35 = vsel %vm2855_vm0, %v459_v25, %v457_v30  ;;  %vm2170_vm9 = vmand %vm519_vm5, %vm2856_vm13  ;;  %vm2860_vm5 = vcmp.le.f32.partialorder %v1956_v34, 15.0  ;;  %v573_v50 = vld [vmem:[#allocation2 + $0x18] sm:$0xff]  ;;  %vm2867_vm13 = vcmp.ge.f32.partialorder %v1925_v28, 0.0  ;;  %v572_v56 = vld [vmem:[#allocation2 + $0x10] sm:$0xff] }
  0x95   : > { %v479_v37 = vmul.f32 %v2145_v22, %v462_v35  ;;  %vm522_vm6 = vmand %vm520_vm1, %vm2860_vm5  ;;  %482 = vst [vmem:[#allocation2 + $0x38] sm:$0xf] %v480_v38  ;;  %v488_v41 = vpop.permute.xlu1 %487  ;;  %v486_v42 = vpop.permute.xlu0 %485  ;;  %vm508_vm1 = vcmp.lt.s32.totalorder %v1908_v12, 113  ;;  %v2225_v52 = vsel %vm2170_vm9, 1.0, %v1737_v1  ;;  %vm2871_vm9 = vcmp.ge.f32.partialorder %v1928_v29, 0.0  ;;  %v579_v38 = vld [vmem:[#allocation2 + $0x48] sm:$0xff] }
  0x96   : > { %vm2197_vm0 = vmand %vm2130_vm15, %vm2861_vm12  ;;  %v490_v44 = vsel %vm2794_vm8, %v486_v42, %v488_v41  ;;  %v491_v45 = vsel %vm2794_vm8, %v488_v41, %v486_v42  ;;  %v2228_v53 = vsel %vm522_vm6, 1.0, %v1737_v1  ;;  %vm535_vm6 = vcmp.lt.s32.totalorder %v1908_v12, 112  ;;  %v578_v41 = vld [vmem:[#allocation2 + $0x40] sm:$0xff] }
  0x97   : > { %481 = vst [vmem:[#allocation2 + $0x30] sm:$0xf] %v479_v37  ;;  %v500_v48 = vmul.f32 %v2184_v40, %v490_v44  ;;  %v501_v49 = vmul.f32 %v2189_v32, %v491_v45  ;;  %vm2218_vm10 = vmand %vm2107_vm7, %vm2867_vm13  ;;  %vm2870_vm7 = vcmp.le.f32.partialorder %v1922_v27, 15.0  ;;  %vm2874_vm12 = vcmp.le.f32.partialorder %v1925_v28, 15.0 }
  0x98   : > { %vm541_vm14 = vmand %vm2197_vm0, %vm2870_vm7  ;;  %v575_v16 = vld [vmem:[#allocation2 + $0x28] sm:$0xff]  ;;  %v574_v24 = vld [vmem:[#allocation2 + $0x20] sm:$0xff]  ;;  %vm2792_vm13 = vcmask 1043456   ;;  %vm2878_vm7 = vcmp.lt.s32.totalorder %v1908_v12, 17 }
  0x99   : > { %v571_v54 = vld [vmem:[#allocation2 + $0x8] sm:$0xff]  ;;  %v570_v55 = vld [vmem:[#allocation2] sm:$0xff]  ;;  %502 = vst [vmem:[#allocation2 + $0x50] sm:$0xf] %v500_v48  ;;  %503 = vst [vmem:[#allocation2 + $0x58] sm:$0xf] %v501_v49  ;;  %v507_v57 = vpop.permute.xlu1 %506  ;;  %v505_v63 = vpop.permute.xlu0 %504 }
  0x9a   : > { %v589_v62 = vpack.c.bf16 %v573_v50, %v571_v54  ;;  %v588_v0 = vpack.c.bf16 %v572_v56, %v570_v55  ;;  %v509_v5 = vsel %vm508_vm1, %v505_v63, %v507_v57  ;;  %v510_v6 = vsel %vm508_vm1, %v507_v57, %v505_v63  ;;  %vm2242_vm5 = vmand %vm2130_vm15, %vm2871_vm9 }
  0x9b   : > { %v527_v13 = vmul.f32 %v2225_v52, %v509_v5  ;;  %v528_v14 = vmul.f32 %v2228_v53, %v510_v6  ;;  %vm2253_vm0 = vmand %vm2218_vm10, %vm2874_vm12  ;;  %v2263_v18 = vsel %vm541_vm14, 1.0, %v1737_v1  ;;  %vm2877_vm15 = vcmp.le.f32.partialorder %v1928_v29, 15.0 }
  0x9c   : > { %615 = vmatprep.subr.bf16.mxu0 %v589_v62  ;;  %v577_v19 = vld [vmem:[#allocation2 + $0x38] sm:$0xff]  ;;  %vm560_vm2 = vmand %vm2242_vm5, %vm2877_vm15  ;;  %v2279_v29 = vsel %vm2253_vm0, 1.0, %v1737_v1  ;;  %vm604_vm10 = vcmask 588800   ;;  %vm2392_vm9 = vcmp.lt.s32.totalorder %v337_v11, 256  ;;  %vm2882_vm5 = vcmp.lt.s32.totalorder %v1908_v12, 16 }
  0x9d   : > { %616 = vmatpush1.bf16.msra.mxu0 %v588_v0  ;;  %529 = vst [vmem:[#allocation2 + $0x60] sm:$0xf] %v527_v13  ;;  %530 = vst [vmem:[#allocation2 + $0x68] sm:$0xf] %v528_v14  ;;  %v534_v28 = vpop.permute.xlu1 %533  ;;  %v532_v30 = vpop.permute.xlu0 %531  ;;  %v591_v31 = vpack.c.bf16 %v577_v19, %v575_v16  ;;  %v2282_v44 = vsel %vm560_vm2, 1.0, %v1737_v1 }
  0x9e   : > { %v576_v25 = vld [vmem:[#allocation2 + $0x30] sm:$0xff]  ;;  %v536_v36 = vsel %vm535_vm6, %v532_v30, %v534_v28  ;;  %v537_v37 = vsel %vm535_vm6, %v534_v28, %v532_v30  ;;  %vm2879_vm14 = vmmov %vm2878_vm7 }
  0x9f   : > { %v590_v35 = vpack.c.bf16 %v576_v25, %v574_v24  ;;  %v546_v42 = vmul.f32 %v2260_v15, %v536_v36  ;;  %v547_v43 = vmul.f32 %v2263_v18, %v537_v37  ;;  %617 = vmatprep.subr.bf16.mxu0 %v591_v31  ;;  %v569_v24 = vld [vmem:[%s2773_s1] sm:$0x3]  ;;  %vm2883_vm12 = vmmov %vm2882_vm5 }
  0xa0   : > { %v581_v45 = vld [vmem:[#allocation2 + $0x58] sm:$0xff]  ;;  %v580_v34 = vld [vmem:[#allocation2 + $0x50] sm:$0xff] }
  0xa1   : > { %618 = vmatpush1.bf16.msra.mxu0 %v590_v35  ;;  %548 = vst [vmem:[#allocation2 + $0x70] sm:$0xf] %v546_v42  ;;  %549 = vst [vmem:[#allocation2 + $0x78] sm:$0xf] %v547_v43  ;;  %v553_v48 = vpop.permute.xlu1 %552  ;;  %v551_v49 = vpop.permute.xlu0 %550  ;;  %v593_v50 = vpack.c.bf16 %v581_v45, %v579_v38  ;;  %v592_v51 = vpack.c.bf16 %v580_v34, %v578_v41 }
  0xa2   : > { %v555_v54 = vsel %vm554_vm4, %v551_v49, %v553_v48  ;;  %v556_v55 = vsel %vm554_vm4, %v553_v48, %v551_v49 }
  0xa3   : > { %v565_v56 = vmul.f32 %v2279_v29, %v555_v54  ;;  %v566_v57 = vmul.f32 %v2282_v44, %v556_v55  ;;  %619 = vmatprep.subr.bf16.mxu0 %v593_v50  ;;  %v2296_v50 = vshrl.u32 %v337_v11, 7 }
  0xa4   : > { %v583_v63 = vld [vmem:[#allocation2 + $0x68] sm:$0xff]  ;;  %v582_v0 = vld [vmem:[#allocation2 + $0x60] sm:$0xff] }
  0xa5   : > { %620 = vmatpush1.bf16.msra.mxu0 %v592_v51  ;;  %567 = vst [vmem:[#allocation2 + $0x80] sm:$0xf] %v565_v56  ;;  %568 = vst [vmem:[#allocation2 + $0x88] sm:$0xf] %v566_v57  ;;  %v2299_v54 = vsub.s32 0, %v2296_v50 }
  0xa8   : > { %v585_v62 = vld [vmem:[#allocation2 + $0x78] sm:$0xff]  ;;  %v584_v5 = vld [vmem:[#allocation2 + $0x70] sm:$0xff] }
  0xa9   : > { %v595_v6 = vpack.c.bf16 %v585_v62, %v583_v63  ;;  %v594_v10 = vpack.c.bf16 %v584_v5, %v582_v0 }
  0xab   : > { %621 = vmatprep.subr.bf16.mxu0 %v595_v6 }
  0xac   : > { %622 = vmatpush1.bf16.msra.mxu0 %v594_v10  ;;  %v587_v13 = vld [vmem:[#allocation2 + $0x88] sm:$0xff]  ;;  %v586_v14 = vld [vmem:[#allocation2 + $0x80] sm:$0xff] }
  0xad   : > { %v597_v16 = vpack.c.bf16 %v587_v13, %v587_v13  ;;  %v596_v17 = vpack.c.bf16 %v586_v14, %v586_v14 }
  0xaf   : > { %1623 = vmatprep.subr.msk.bf16.mxu0 %vm2792_vm13, %v597_v16  ;;  %v610_v19 = vsel %vm2792_vm13, %v596_v17, 0 }
  0xb0   : > { %624 = vmatpush1.bf16.msra.mxu0 %v610_v19 }
  0xb2   : > { %v602_v25 = vpop.permute.xlu0 %601  ;;  %v684_v42 = vpop.permute.xlu1 %683 }
  0xb3   : > { %1624 = vmatmul.mubr.msk.bf16.vlgmr.msra.gmra.mrb[0].mxu0 %vm604_vm10, %v569_v24  ;;  %v689_v0 = vrot.slane %v684_v42, %v2299_v54 }
  0xb7   : > { %v674_v49 = vpop.permute.xlu1 %673  ;;  %v702_v51 = vpop.permute.xlu0 %701 }
  0xb8   : > { %v707_v56 = vrot.slane %v702_v51, %v2299_v54  ;;  %v679_v5 = vrot.slane %v674_v49, %v2299_v54 }
  0xbc   : > { %v720_v55 = vpop.permute.xlu1 %719 }
  0xbd   : > { %v725_v6 = vrot.slane %v720_v55, %v2299_v54 }
 0x186   : > { %v649_v28 = vpop.f32.mrb[0].mxu0 }
 0x187   : > { %v650_v30 = vadd.f32 %v649_v28, %v602_v25  ;;  %v651_v31 = vpop.f32.mrb[1].mxu0 }
 0x188   : > { %v652_v35 = vadd.f32 %v651_v31, %v602_v25  ;;  %v653_v36 = vpop.f32.mrb[2].mxu0 }
 0x189   : > { %v1625_v37 = vmul.f32 -1.442695, %v650_v30  ;;  %v654_v38 = vpop.f32.mrb[3].mxu0 }
 0x18a   : > { %v1626_v41 = vmul.f32 -1.442695, %v652_v35 }
 0x18b   : > { %1697 = vpow2.f32 %v1625_v37  ;;  %v740_v37 = vpop.permute.xlu1 %739 }
 0x18c   : > { %1699 = vpow2.f32 %v1626_v41 }
 0x195   : > { %v1698_v43 = vpop.eup %1697 }
 0x196   : > { %v1700_v45 = vpop.eup %1699  ;;  %v662_v34 = vadd.f32 1.0, %v1698_v43 }
 0x197   : > { %v663_v48 = vadd.f32 1.0, %v1700_v45 }
 0x198   : > { %1701 = vrcp.f32 %v662_v34  ;;  %v745_v34 = vrot.slane %v740_v37, %v2299_v54 }
 0x199   : > { %1703 = vrcp.f32 %v663_v48 }
 0x1a2   : > { %v1702_v57 = vpop.eup %1701 }
 0x1a3   : > { %v1704_v63 = vpop.eup %1703  ;;  %v668_v62 = vmul.f32 %v1702_v57, %v650_v30  ;;  %v1397_v57 = vld [vmem:[%s2777_s5] sm:$0x3] }
 0x1a4   : > { %v669_v10 = vmul.f32 %v1704_v63, %v652_v35  ;;  %v1461_v63 = vld [vmem:[%s2778_s6] sm:$0x3] }
 0x1a5   : > { %v690_v13 = vmul.f32 %v689_v0, %v668_v62  ;;  %v708_v14 = vmul.f32 %v707_v56, %v668_v62  ;;  %v680_v24 = vmul.f32 %v679_v5, %v668_v62  ;;  %v726_v25 = vmul.f32 %v725_v6, %v668_v62  ;;  %v1483_v62 = vld [vmem:[%s2779_s7] sm:$0xf] }
 0x1a6   : > { %v691_v16 = vmul.f32 %v689_v0, %v669_v10  ;;  %v709_v17 = vmul.f32 %v707_v56, %v669_v10  ;;  %v681_v31 = vmul.f32 %v679_v5, %v669_v10  ;;  %v727_v36 = vmul.f32 %v725_v6, %v669_v10 }
 0x1a7   : > { %v694_v19 = vrot.slane %v690_v13, 1  ;;  %v712_v30 = vrot.slane %v708_v14, 2  ;;  %v730_v43 = vrot.slane %v726_v25, 3 }
 0x1a8   : > { %v695_v28 = vrot.slane %v691_v16, 1  ;;  %v713_v42 = vrot.slane %v709_v17, 2  ;;  %v731_v35 = vrot.slane %v727_v36, 3 }
 0x1a9   : > { %v698_v38 = vadd.f32 %v694_v19, %v680_v24 }
 0x1aa   : > { %v699_v41 = vadd.f32 %v695_v28, %v681_v31 }
 0x1ab   : > { %v716_v45 = vadd.f32 %v712_v30, %v698_v38 }
 0x1ac   : > { %v717_v48 = vadd.f32 %v713_v42, %v699_v41 }
 0x1ad   : > { %v734_v49 = vadd.f32 %v730_v43, %v716_v45 }
 0x1ae   : > { %v735_v51 = vadd.f32 %v731_v35, %v717_v48  ;;  %v990_v35 = vadd.f32 -3.0, %v1914_v21 }
 0x1af   : > { %v2306_v55 = vadd.f32 %v745_v34, %v734_v49 }
 0x1b0   : > { %v2308_v56 = vadd.f32 %v745_v34, %v735_v51  ;;  %v989_v34 = vadd.f32 -3.0, %v1912_v20  ;;  %vm992_vm15 = vcmp.ge.f32.partialorder %v990_v35, 0.0 }
 0x1b1   : > { %748 = vrot.lane.b32.xlu0 %v2306_v55, %s1739_s18 }
 0x1b2   : > { %750 = vrot.lane.b32.xlu1 %v2308_v56, %s1739_s18  ;;  %s1756_s18 = smov 3   ;;  %vm991_vm0 = vcmp.ge.f32.partialorder %v989_v34, 0.0  ;;  %vm993_vm2 = vcmp.le.f32.partialorder %v989_v34, 15.0 }
 0x1b5   : > { %780 = vrot.lane.b32.xlu0 %v2306_v55, %s1745_s24 }
 0x1b6   : > { %782 = vrot.lane.b32.xlu1 %v2308_v56, %s1745_s24 }
 0x1b9   : > { %808 = vrot.lane.b32.xlu0 %v2306_v55, %s1738_s17 }
 0x1ba   : > { %810 = vrot.lane.b32.xlu1 %v2308_v56, %s1738_s17  ;;  %s1755_s17 = smov 83  }
 0x1bd   : > { %837 = vrot.lane.b32.xlu0 %v2306_v55, %s1744_s23 }
 0x1be   : > { %839 = vrot.lane.b32.xlu1 %v2308_v56, %s1744_s23 }
 0x1c1   : > { %866 = vrot.lane.b32.xlu0 %v2306_v55, %s1740_s19 }
 0x1c2   : > { %868 = vrot.lane.b32.xlu1 %v2308_v56, %s1740_s19  ;;  %s1757_s19 = smov 125  }
 0x1c5   : > { %895 = vrot.lane.b32.xlu0 %v2306_v55, %s1743_s22 }
 0x1c6   : > { %897 = vrot.lane.b32.xlu1 %v2308_v56, %s1743_s22 }
 0x1c9   : > { %924 = vrot.lane.b32.xlu0 %v2306_v55, %s1741_s20 }
 0x1ca   : > { %926 = vrot.lane.b32.xlu1 %v2308_v56, %s1741_s20 }
 0x1cd   : > { %953 = vrot.lane.b32.xlu0 %v2306_v55, %s1742_s21 }
 0x1ce   : > { %955 = vrot.lane.b32.xlu1 %v2308_v56, %s1742_s21 }
 0x1d1   : > { %982 = vrot.lane.b32.xlu0 %v2306_v55, %s1750_s10 }
 0x1d2   : > { %984 = vrot.lane.b32.xlu1 %v2308_v56, %s1750_s10 }
 0x1d5   : > { %1034 = vrot.lane.b32.xlu0 %v2306_v55, %s1751_s13 }
 0x1d6   : > { %1036 = vrot.lane.b32.xlu1 %v2308_v56, %s1751_s13 }
 0x1d9   : > { %1086 = vrot.lane.b32.xlu0 %v2306_v55, %s1752_s14 }
 0x1da   : > { %1088 = vrot.lane.b32.xlu1 %v2308_v56, %s1752_s14 }
 0x1dd   : > { %1124 = vrot.lane.b32.xlu0 %v2306_v55, %s1753_s15 }
 0x1de   : > { %1126 = vrot.lane.b32.xlu1 %v2308_v56, %s1753_s15 }
 0x1e1   : > { %1162 = vrot.lane.b32.xlu0 %v2306_v55, %s1754_s16 }
 0x1e2   : > { %1164 = vrot.lane.b32.xlu1 %v2308_v56, %s1754_s16 }
 0x1e5   : > { %1200 = vrot.lane.b32.xlu0 %v2306_v55, %s1755_s17 }
 0x1e6   : > { %1202 = vrot.lane.b32.xlu1 %v2308_v56, %s1755_s17 }
 0x1e9   : > { %1238 = vrot.lane.b32.xlu0 %v2306_v55, %s1756_s18 }
 0x1ea   : > { %1240 = vrot.lane.b32.xlu1 %v2308_v56, %s1756_s18 }
 0x1ed   : > { %1276 = vrot.lane.b32.xlu0 %v2306_v55, %s1757_s19 }
 0x1ee   : > { %1278 = vrot.lane.b32.xlu1 %v2308_v56, %s1757_s19 }
 0x1f1   : > { %1400 = vperm.xlu0 %1689, %v1397_v57  }
 0x1f2   : > { %1414 = vperm.xlu1 %1690, %v1397_v57  }
 0x1f5   : > { %1692 = vset.pattern.permute.xlu0 %v1749_v9  ;;  %v1758_v9 = vmov 1966171168  }
 0x1f6   : > { %1691 = vset.pattern.permute.xlu1 %v1748_v8  ;;  %1446 = vperm.xlu0 %1692, %v1397_v57   ;;  %v1515_v8 = vld [vmem:[%s2780_s8] sm:$0xf]  ;;  %v760_v0 = vunpack.c.l.s4 %v1758_v9 }
 0x1f7   : > { %1430 = vperm.xlu1 %1691, %v1397_v57  }
 0x1f8   : > { %v761_v5 = vunpack.c.0.s8 %v760_v0  ;;  %v2422_v0 = vadd.f32 -3.0, %v1922_v27 }
 0x1fa   : > { %1694 = vset.pattern.permute.xlu0 %v1747_v7  ;;  %v2380_v14 = vsub.s32 %v761_v5, %v2296_v50 }
 0x1fb   : > { %1693 = vset.pattern.permute.xlu1 %v1746_v4  ;;  %1500 = vperm.xlu0 %1694, %v1483_v62  }
 0x1fc   : > { %1464 = vperm.xlu1 %1693, %v1461_v63  }
 0x1ff   : > { %1695 = vset.pattern.permute.xlu0 %v1746_v4 }
 0x200   : > { %1486 = vperm.xlu1 %1693, %v1483_v62  }
 0x204   : > { %1518 = vperm.xlu1 %1693, %v1515_v8   ;;  %v2419_v8 = vadd.f32 -3.0, %v1920_v26 }
 0x223   : > { %v749_v6 = vpop.permute.xlu0 %748 }
 0x224   : > { %v751_v10 = vpop.permute.xlu1 %750 }
 0x225   : > { %v752_v7 = vsel %vm2878_vm7, %v749_v6, %v751_v10  ;;  %v753_v13 = vsel %vm2879_vm14, %v751_v10, %v749_v6  ;;  %vm2437_vm7 = vmand %vm991_vm0, %vm993_vm2  ;;  %vm2793_vm14 = vcmp.ge.f32.partialorder %v2419_v8, 0.0 }
 0x226   : > { %v754_v4 = vmul.f32 %v2098_v60, %v753_v13  ;;  %v755_v16 = vmul.f32 %v2103_v61, %v752_v7  ;;  %v1041_v7 = vadd.f32 3.0, %v1912_v20  ;;  %v1042_v13 = vadd.f32 3.0, %v1914_v21 }
 0x227   : > { %v781_v17 = vpop.permute.xlu0 %780 }
 0x228   : > { %v758_v19 = vcombine.low %v754_v4, %v755_v16  ;;  %v783_v24 = vpop.permute.xlu1 %782  ;;  %vm1043_vm0 = vcmp.ge.f32.partialorder %v1041_v7, 0.0  ;;  %vm1045_vm2 = vcmp.le.f32.partialorder %v1041_v7, 15.0 }
 0x229   : > { %v784_v25 = vsel %vm554_vm4, %v781_v17, %v783_v24  ;;  %v785_v28 = vsel %vm554_vm4, %v783_v24, %v781_v17  ;;  %vm2884_vm4 = vcmp.lt.s32.totalorder %v1908_v12, 15  ;;  %vm2481_vm13 = vmand %vm1043_vm0, %vm1045_vm2  ;;  %vm2898_vm0 = vcmp.lt.s32.totalorder %v1908_v12, 1 }
 0x22a   : > { %v765_v31 = vrot.slane %v758_v19, %v2380_v14  ;;  %v786_v36 = vmul.f32 %v2279_v29, %v784_v25  ;;  %v787_v37 = vmul.f32 %v2282_v44, %v785_v28  ;;  %vm2885_vm10 = vmmov %vm2884_vm4 }
 0x22b   : > { %v809_v61 = vpop.permute.xlu0 %808  ;;  %vm2899_vm2 = vmmov %vm2898_vm0 }
 0x22c   : > { %v772_v38 = vrot.slane %v765_v31, %v2380_v14  ;;  %v790_v30 = vcombine.low %v786_v36, %v787_v37  ;;  %v811_v41 = vpop.permute.xlu1 %810  ;;  %v2466_v37 = vadd.f32 3.0, %v1922_v27 }
 0x22d   : > { %v812_v42 = vsel %vm2882_vm5, %v809_v61, %v811_v41  ;;  %v813_v43 = vsel %vm2883_vm12, %v811_v41, %v809_v61  ;;  %vm2795_vm12 = vcmp.ge.f32.partialorder %v2422_v0, 0.0 }
 0x22e   : > { %778 = vst.msk [vmem:[#allocation3] ss:$8 sm:$0x3] %vm2392_vm9, %v772_v38  ;;  %v797_v29 = vrot.slane %v790_v30, %v2380_v14  ;;  %v814_v11 = vmul.f32 %v2042_v46, %v813_v43  ;;  %v815_v44 = vmul.f32 %v2047_v47, %v812_v42  ;;  %vm2799_vm8 = vcmp.ge.f32.partialorder %v2466_v37, 0.0 }
 0x22f   : > { %v838_v45 = vpop.permute.xlu0 %837 }
 0x230   : > { %v804_v48 = vrot.slane %v797_v29, %v2380_v14  ;;  %v818_v49 = vcombine.low %v814_v11, %v815_v44  ;;  %v840_v51 = vpop.permute.xlu1 %839 }
 0x231   : > { %v841_v57 = vsel %vm535_vm6, %v838_v45, %v840_v51  ;;  %v842_v63 = vsel %vm535_vm6, %v840_v51, %v838_v45  ;;  %vm994_vm6 = vcmp.le.f32.partialorder %v990_v35, 15.0 }
 0x232   : > { %806 = vst.msk [vmem:[#allocation4] ss:$8 sm:$0x3] %vm2392_vm9, %v804_v48  ;;  %v825_v46 = vrot.slane %v818_v49, %v2380_v14  ;;  %v843_v47 = vmul.f32 %v2260_v15, %v841_v57  ;;  %v844_v62 = vmul.f32 %v2263_v18, %v842_v63  ;;  %vm2443_vm5 = vmand %vm992_vm15, %vm994_vm6  ;;  %vm1044_vm6 = vcmp.ge.f32.partialorder %v1042_v13, 0.0 }
 0x233   : > { %v867_v9 = vpop.permute.xlu0 %866  ;;  %vm2461_vm15 = vmand %vm2437_vm7, %vm2793_vm14 }
 0x234   : > { %v832_v5 = vrot.slane %v825_v46, %v2380_v14  ;;  %v847_v6 = vcombine.low %v843_v47, %v844_v62  ;;  %v869_v10 = vpop.permute.xlu1 %868 }
 0x235   : > { %v870_v15 = vsel %vm2884_vm4, %v867_v9, %v869_v10  ;;  %v871_v18 = vsel %vm2885_vm10, %v869_v10, %v867_v9  ;;  %vm2796_vm4 = vcmp.le.f32.partialorder %v2419_v8, 15.0  ;;  %vm1046_vm10 = vcmp.le.f32.partialorder %v1042_v13, 15.0 }
 0x236   : > { %835 = vst.msk [vmem:[#allocation3 + $0x1] ss:$8 sm:$0x3] %vm2392_vm9, %v832_v5  ;;  %v854_v4 = vrot.slane %v847_v6, %v2380_v14  ;;  %v872_v16 = vmul.f32 %v2088_v58, %v871_v18  ;;  %v873_v17 = vmul.f32 %v2093_v59, %v870_v15  ;;  %v2450_v58 = vadd.f32 3.0, %v1920_v26  ;;  %vm2501_vm14 = vmand %vm1044_vm6, %vm1046_vm10 }
 0x237   : > { %v896_v19 = vpop.permute.xlu0 %895  ;;  %vm2903_vm10 = vcmp.le.f32.partialorder %v2422_v0, 15.0  ;;  %vm2906_vm6 = vcmp.lt.s32.totalorder %v1908_v12, 127 }
 0x238   : > { %v861_v59 = vrot.slane %v854_v4, %v2380_v14  ;;  %v876_v24 = vcombine.low %v872_v16, %v873_v17  ;;  %v898_v25 = vpop.permute.xlu1 %897  ;;  %vm2907_vm3 = vmmov %vm2906_vm6 }
 0x239   : > { %v899_v28 = vsel %vm508_vm1, %v896_v19, %v898_v25  ;;  %v900_v31 = vsel %vm508_vm1, %v898_v25, %v896_v19  ;;  %vm2477_vm1 = vmand %vm2443_vm5, %vm2795_vm12 }
 0x23a   : > { %864 = vst.msk [vmem:[#allocation4 + $0x1] ss:$8 sm:$0x3] %vm2392_vm9, %v861_v59  ;;  %v883_v61 = vrot.slane %v876_v24, %v2380_v14  ;;  %v901_v38 = vmul.f32 %v2225_v52, %v899_v28  ;;  %v902_v30 = vmul.f32 %v2228_v53, %v900_v31  ;;  %vm2492_vm12 = vmand %vm2461_vm15, %vm2796_vm4  ;;  %vm2902_vm15 = vcmp.ge.f32.partialorder %v2450_v58, 0.0 }
 0x23b   : > { %v925_v42 = vpop.permute.xlu0 %924  ;;  %vm2800_vm4 = vcmp.le.f32.partialorder %v2466_v37, 15.0  ;;  %v1627_v7 = vsel %vm2492_vm12, 1.0, %v1737_v1  ;;  %vm2915_vm12 = vcmp.le.f32.partialorder %v1920_v26, 15.0 }
 0x23c   : > { %v890_v52 = vrot.slane %v883_v61, %v2380_v14  ;;  %v905_v29 = vcombine.low %v901_v38, %v902_v30  ;;  %v927_v53 = vpop.permute.xlu1 %926 }
 0x23d   : > { %v928_v44 = vsel %vm2898_vm0, %v925_v42, %v927_v53  ;;  %v929_v45 = vsel %vm2899_vm2, %v927_v53, %v925_v42  ;;  %vm1053_vm0 = vmand %vm2481_vm13, %vm2902_vm15 }
 0x23e   : > { %893 = vst.msk [vmem:[#allocation3 + $0x2] ss:$8 sm:$0x3] %vm2392_vm9, %v890_v52  ;;  %v912_v35 = vrot.slane %v905_v29, %v2380_v14  ;;  %v930_v48 = vmul.f32 %v2145_v22, %v929_v45  ;;  %v931_v49 = vmul.f32 %v2150_v23, %v928_v44  ;;  %vm2520_vm2 = vmand %vm2477_vm1, %vm2903_vm10  ;;  %vm2908_vm1 = vcmp.le.f32.partialorder %v2450_v58, 15.0 }
 0x23f   : > { %v954_v51 = vpop.permute.xlu0 %953  ;;  %vm1054_vm15 = vmand %vm2501_vm14, %vm2799_vm8  ;;  %vm2911_vm8 = vcmp.ge.f32.partialorder %v1920_v26, 0.0  ;;  %v1628_v15 = vsel %vm2520_vm2, 1.0, %v1737_v1 }
 0x240   : > { %v919_v22 = vrot.slane %v912_v35, %v2380_v14  ;;  %v934_v63 = vcombine.low %v930_v48, %v931_v49  ;;  %v956_v23 = vpop.permute.xlu1 %955  ;;  %vm2536_vm10 = vmand %vm1053_vm0, %vm2908_vm1 }
 0x241   : > { %v957_v46 = vsel %vm2906_vm6, %v954_v51, %v956_v23  ;;  %v958_v47 = vsel %vm2907_vm3, %v956_v23, %v954_v51  ;;  %vm986_vm6 = vcmp.lt.s32.totalorder %v1908_v12, 51  ;;  %vm1093_vm3 = vmand %vm2437_vm7, %vm2911_vm8  ;;  %vm2914_vm8 = vcmp.ge.f32.partialorder %v1922_v27, 0.0 }
 0x242   : > { %922 = vst.msk [vmem:[#allocation4 + $0x2] ss:$8 sm:$0x3] %vm2392_vm9, %v919_v22  ;;  %v941_v9 = vrot.slane %v934_v63, %v2380_v14  ;;  %v959_v5 = vmul.f32 %v2184_v40, %v957_v46  ;;  %v960_v6 = vmul.f32 %v2189_v32, %v958_v47  ;;  %vm2558_vm0 = vmand %vm1054_vm15, %vm2800_vm4  ;;  %vm1038_vm15 = vcmp.lt.s32.totalorder %v1908_v12, 77 }
 0x243   : > { %v983_v10 = vpop.permute.xlu0 %982  ;;  %vm1094_vm1 = vmand %vm2443_vm5, %vm2914_vm8  ;;  %vm2918_vm4 = vcmp.ge.f32.partialorder %v1920_v26, 0.0  ;;  %v1629_v28 = vsel %vm2536_vm10, 1.0, %v1737_v1  ;;  %v1630_v31 = vsel %vm2558_vm0, 1.0, %v1737_v1  ;;  %vm2923_vm10 = vcmp.le.f32.partialorder %v1920_v26, 15.0 }
 0x244   : > { %v948_v32 = vrot.slane %v941_v9, %v2380_v14  ;;  %v963_v18 = vcombine.low %v959_v5, %v960_v6  ;;  %v985_v13 = vpop.permute.xlu1 %984  ;;  %vm2569_vm2 = vmand %vm1093_vm3, %vm2915_vm12  ;;  %vm2919_vm3 = vcmp.le.f32.partialorder %v1922_v27, 15.0 }
 0x245   : > { %v987_v4 = vsel %vm986_vm6, %v983_v10, %v985_v13  ;;  %v988_v16 = vsel %vm986_vm6, %v985_v13, %v983_v10  ;;  %vm1131_vm6 = vmand %vm2481_vm13, %vm2918_vm4  ;;  %vm2922_vm4 = vcmp.ge.f32.partialorder %v1922_v27, 0.0  ;;  %v1631_v26 = vsel %vm2569_vm2, 1.0, %v1737_v1 }
 0x246   : > { %951 = vst.msk [vmem:[#allocation3 + $0x3] ss:$8 sm:$0x3] %vm2392_vm9, %v948_v32  ;;  %v970_v19 = vrot.slane %v963_v18, %v2380_v14  ;;  %v1011_v59 = vmul.f32 %v1627_v7, %v988_v16  ;;  %v1012_v24 = vmul.f32 %v1628_v15, %v987_v4  ;;  %vm2589_vm8 = vmand %vm1094_vm1, %vm2919_vm3  ;;  %vm1090_vm1 = vcmp.lt.s32.totalorder %v1908_v12, 48 }
 0x247   : > { %v1035_v25 = vpop.permute.xlu0 %1034  ;;  %vm1132_vm12 = vmand %vm2501_vm14, %vm2922_vm4  ;;  %vm2926_vm3 = vcmp.ge.f32.partialorder %v2450_v58, 0.0  ;;  %v1632_v45 = vsel %vm2589_vm8, 1.0, %v1737_v1  ;;  %vm2933_vm2 = vcmp.le.f32.partialorder %v2450_v58, 15.0 }
 0x248   : > { %v977_v61 = vrot.slane %v970_v19, %v2380_v14  ;;  %v1015_v38 = vcombine.low %v1011_v59, %v1012_v24  ;;  %v1037_v30 = vpop.permute.xlu1 %1036  ;;  %vm2600_vm0 = vmand %vm1131_vm6, %vm2923_vm10  ;;  %vm2927_vm6 = vcmp.le.f32.partialorder %v1922_v27, 15.0 }
 0x249   : > { %v1039_v41 = vsel %vm1038_vm15, %v1035_v25, %v1037_v30  ;;  %v1040_v42 = vsel %vm1038_vm15, %v1037_v30, %v1035_v25  ;;  %vm1169_vm15 = vmand %vm2437_vm7, %vm2926_vm3  ;;  %vm2930_vm7 = vcmp.ge.f32.partialorder %v2466_v37, 0.0  ;;  %v1633_v47 = vsel %vm2600_vm0, 1.0, %v1737_v1 }
 0x24a   : > { %980 = vst.msk [vmem:[#allocation4 + $0x3] ss:$8 sm:$0x3] %vm2392_vm9, %v977_v61  ;;  %v1022_v29 = vrot.slane %v1015_v38, %v2380_v14  ;;  %v1063_v53 = vmul.f32 %v1629_v28, %v1039_v41  ;;  %v1064_v11 = vmul.f32 %v1630_v31, %v1040_v42  ;;  %vm2620_vm4 = vmand %vm1132_vm12, %vm2927_vm6  ;;  %vm2936_vm12 = vcmp.ge.f32.partialorder %v2419_v8, 0.0 }
 0x24b   : > { %v1087_v44 = vpop.permute.xlu0 %1086  ;;  %vm2629_vm10 = vmand %vm2443_vm5, %vm2930_vm7  ;;  %vm1128_vm5 = vcmp.lt.s32.totalorder %v1908_v12, 80  ;;  %v1634_v62 = vsel %vm2620_vm4, 1.0, %v1737_v1  ;;  %vm2937_vm3 = vcmp.ge.f32.partialorder %v2422_v0, 0.0  ;;  %vm2939_vm0 = vcmp.le.f32.partialorder %v2419_v8, 15.0 }
 0x24c   : > { %v1029_v48 = vrot.slane %v1022_v29, %v2380_v14  ;;  %v1067_v49 = vcombine.low %v1063_v53, %v1064_v11  ;;  %v1089_v20 = vpop.permute.xlu1 %1088  ;;  %vm2635_vm8 = vmand %vm1169_vm15, %vm2933_vm2  ;;  %vm2942_vm4 = vcmp.le.f32.partialorder %v2422_v0, 15.0 }
 0x24d   : > { %v1091_v57 = vsel %vm1090_vm1, %v1087_v44, %v1089_v20  ;;  %v1092_v22 = vsel %vm1090_vm1, %v1089_v20, %v1087_v44  ;;  %vm1207_vm1 = vmand %vm2481_vm13, %vm2936_vm12  ;;  %vm2938_vm13 = vcmp.le.f32.partialorder %v2466_v37, 15.0  ;;  %v1635_v13 = vsel %vm2635_vm8, 1.0, %v1737_v1 }
 0x24e   : > { %1032 = vst.msk [vmem:[#allocation3 + $0x4] ss:$8 sm:$0x3] %vm2392_vm9, %v1029_v48  ;;  %v1074_v63 = vrot.slane %v1067_v49, %v2380_v14  ;;  %v1101_v23 = vmul.f32 %v1631_v26, %v1092_v22  ;;  %v1102_v46 = vmul.f32 %v1632_v45, %v1091_v57  ;;  %vm1208_vm15 = vmand %vm2501_vm14, %vm2937_vm3  ;;  %vm1166_vm14 = vcmp.lt.s32.totalorder %v1908_v12, 45 }
 0x24f   : > { %v1125_v21 = vpop.permute.xlu0 %1124  ;;  %vm1172_vm6 = vmand %vm2629_vm10, %vm2938_vm13  ;;  %vm1204_vm8 = vcmp.lt.s32.totalorder %v1908_v12, 83 }
 0x250   : > { %v1081_v9 = vrot.slane %v1074_v63, %v2380_v14  ;;  %v1105_v5 = vcombine.low %v1101_v23, %v1102_v46  ;;  %v1127_v6 = vpop.permute.xlu1 %1126  ;;  %vm2664_vm7 = vmand %vm1207_vm1, %vm2939_vm0  ;;  %v1636_v4 = vsel %vm1172_vm6, 1.0, %v1737_v1  ;;  %vm2947_vm1 = vnez %v2820_v39 }
 0x251   : > { %v1129_v43 = vsel %vm1128_vm5, %v1125_v21, %v1127_v6  ;;  %v1130_v10 = vsel %vm1128_vm5, %v1127_v6, %v1125_v21  ;;  %vm2674_vm10 = vmand %vm1208_vm15, %vm2942_vm4  ;;  %v1637_v38 = vsel %vm2664_vm7, 1.0, %v1737_v1  ;;  %vm2953_vm7 = vcmp.ge.f32.partialorder %v2466_v37, 0.0  ;;  %v1317_v23 = vld [vmem:[#allocation4 + $0x8] sm:$0xf]  ;;  %v1315_v6 = vld [vmem:[#allocation3 + $0x8] sm:$0xf] }
 0x252   : > { %1084 = vst.msk [vmem:[#allocation4 + $0x4] ss:$8 sm:$0x3] %vm2392_vm9, %v1081_v9  ;;  %v1112_v34 = vrot.slane %v1105_v5, %v2380_v14  ;;  %v1139_v15 = vmul.f32 %v1633_v47, %v1129_v43  ;;  %v1140_v40 = vmul.f32 %v1634_v62, %v1130_v10  ;;  %vm2945_vm2 = vmmov %vm2936_vm12  ;;  %v1638_v30 = vsel %vm2674_vm10, 1.0, %v1737_v1 }
 0x253   : > { %v1163_v18 = vpop.permute.xlu0 %1162  ;;  %vm1245_vm5 = vmand %vm1946_vm11, %vm2945_vm2  ;;  %vm1242_vm10 = vcmp.lt.s32.totalorder %v1908_v12, 3  ;;  %v1325_v62 = vrot.slane %v2308_v56, %v2299_v54 }
 0x254   : > { %v1119_v16 = vrot.slane %v1112_v34, %v2380_v14  ;;  %v1143_v17 = vcombine.low %v1139_v15, %v1140_v40  ;;  %v1165_v19 = vpop.permute.xlu1 %1164  ;;  %vm2946_vm12 = vmmov %vm2937_vm3 }
 0x255   : > { %vm1246_vm3 = vmand %vm2947_vm1, %vm2946_vm12  ;;  %v1167_v59 = vsel %vm1166_vm14, %v1163_v18, %v1165_v19  ;;  %v1168_v24 = vsel %vm1166_vm14, %v1165_v19, %v1163_v18  ;;  %vm2952_vm14 = vcmp.ge.f32.partialorder %v2450_v58, 0.0  ;;  %vm2955_vm12 = vcmp.le.f32.partialorder %v2466_v37, 15.0 }
 0x256   : > { %1122 = vst.msk [vmem:[#allocation3 + $0x5] ss:$8 sm:$0x3] %vm2392_vm9, %v1119_v16  ;;  %v1150_v25 = vrot.slane %v1143_v17, %v2380_v14  ;;  %v1177_v28 = vmul.f32 %v1635_v13, %v1168_v24  ;;  %v1178_v31 = vmul.f32 %v1636_v4, %v1167_v59  ;;  %vm2948_vm15 = vmmov %vm2939_vm0  ;;  %v1321_v37 = vrot.slane %v2306_v55, %v2299_v54 }
 0x257   : > { %vm2697_vm13 = vmand %vm1245_vm5, %vm2948_vm15  ;;  %v1201_v61 = vpop.permute.xlu0 %1200  ;;  %v1329_v55 = vsub.f32 %v1325_v62, %v1317_v23  ;;  %v1327_v32 = vsub.f32 %v1325_v62, %v1315_v6 }
 0x258   : > { %vm2951_vm6 = vmmov %vm2942_vm4  ;;  %v1157_v41 = vrot.slane %v1150_v25, %v2380_v14  ;;  %v1181_v42 = vcombine.low %v1177_v28, %v1178_v31  ;;  %v1203_v8 = vpop.permute.xlu1 %1202  ;;  %v1639_v33 = vsel %vm2697_vm13, 1.0, %v1737_v1  ;;  %vm1356_vm13 = vcmask 1047556  }
 0x259   : > { %vm1248_vm0 = vmand %vm1246_vm3, %vm2951_vm6  ;;  %v1205_v52 = vsel %vm1204_vm8, %v1201_v61, %v1203_v8  ;;  %v1206_v29 = vsel %vm1204_vm8, %v1203_v8, %v1201_v61  ;;  %vm1280_vm3 = vcmp.lt.s32.totalorder %v1908_v12, 125  ;;  %v1314_v12 = vld [vmem:[#allocation3] sm:$0xf]  ;;  %v1331_v13 = vmul.f32 %v1329_v55, %v1327_v32 }
 0x25a   : > { %vm1283_vm4 = vmand %vm1946_vm11, %vm2952_vm14  ;;  %1160 = vst.msk [vmem:[#allocation4 + $0x5] ss:$8 sm:$0x3] %vm2392_vm9, %v1157_v41  ;;  %v1188_v0 = vrot.slane %v1181_v42, %v2380_v14  ;;  %v1215_v53 = vmul.f32 %v1637_v38, %v1205_v52  ;;  %v1216_v11 = vmul.f32 %v1638_v30, %v1206_v29  ;;  %v1640_v26 = vsel %vm1248_vm0, 1.0, %v1737_v1 }
 0x25b   : > { %vm1284_vm2 = vmand %vm2947_vm1, %vm2953_vm7  ;;  %v1239_v44 = vpop.permute.xlu0 %1238  ;;  %vm2954_vm11 = vcmp.le.f32.partialorder %v2450_v58, 15.0  ;;  %v1316_v58 = vld [vmem:[#allocation4] sm:$0xf]  ;;  %v1326_v40 = vsub.f32 %v1321_v37, %v1314_v12  ;;  %vm2956_vm8 = vcmask 1043456  }
 0x25c   : > { %vm1285_vm5 = vmand %vm1283_vm4, %vm2954_vm11  ;;  %v1195_v39 = vrot.slane %v1188_v0, %v2380_v14  ;;  %v1219_v45 = vcombine.low %v1215_v53, %v1216_v11  ;;  %v1241_v35 = vpop.permute.xlu1 %1240  ;;  %v1328_v43 = vsub.f32 %v1321_v37, %v1316_v58 }
 0x25d   : > { %vm1286_vm1 = vmand %vm1284_vm2, %vm2955_vm12  ;;  %v1243_v48 = vsel %vm1242_vm10, %v1239_v44, %v1241_v35  ;;  %v1244_v49 = vsel %vm1242_vm10, %v1241_v35, %v1239_v44  ;;  %v1641_v27 = vsel %vm1285_vm5, 1.0, %v1737_v1 }
 0x25e   : > { %1198 = vst.msk [vmem:[#allocation3 + $0x6] ss:$8 sm:$0x3] %vm2392_vm9, %v1195_v39  ;;  %v1226_v20 = vrot.slane %v1219_v45, %v2380_v14  ;;  %v1253_v51 = vmul.f32 %v1639_v33, %v1244_v49  ;;  %v1254_v57 = vmul.f32 %v1640_v26, %v1243_v48  ;;  %v1642_v63 = vsel %vm1286_vm1, 1.0, %v1737_v1  ;;  %vm2957_vm15 = vmmov %vm2956_vm8 }
 0x25f   : > { %v1277_v22 = vpop.permute.xlu0 %1276  ;;  %v1330_v18 = vmul.f32 %v1328_v43, %v1326_v40  ;;  %v1339_v17 = vsel %vm2957_vm15, %v1331_v13, inf }
 0x260   : > { %v1233_v46 = vrot.slane %v1226_v20, %v2380_v14  ;;  %v1257_v21 = vcombine.low %v1253_v51, %v1254_v57  ;;  %v1279_v47 = vpop.permute.xlu1 %1278  ;;  %v1340_v59 = vrot.slane %v1339_v17, 4 }
 0x261   : > { %v1281_v9 = vsel %vm1280_vm3, %v1277_v22, %v1279_v47  ;;  %v1282_v5 = vsel %vm1280_vm3, %v1279_v47, %v1277_v22  ;;  %v1332_v16 = vsel %vm2956_vm8, %v1330_v18, inf  ;;  %v1435_v18 = vsub.s32 2, %v2296_v50 }
 0x262   : > { %1236 = vst.msk [vmem:[#allocation4 + $0x6] ss:$8 sm:$0x3] %vm2392_vm9, %v1233_v46  ;;  %v1264_v1 = vrot.slane %v1257_v21, %v2380_v14  ;;  %v1291_v10 = vmul.f32 %v1641_v27, %v1281_v9  ;;  %v1292_v7 = vmul.f32 %v1642_v63, %v1282_v5  ;;  %v1333_v19 = vrot.slane %v1332_v16, 4 }
 0x263   : > { %v1341_v31 = vmin.f32 %v1339_v17, %v1340_v59  ;;  %v1451_v59 = vsub.s32 3, %v2296_v50 }
 0x264   : > { %v1271_v34 = vrot.slane %v1264_v1, %v2380_v14  ;;  %v1295_v15 = vcombine.low %v1291_v10, %v1292_v7  ;;  %v1334_v28 = vmin.f32 %v1332_v16, %v1333_v19 }
 0x265   : > { %v1342_v52 = vrot.slane %v1341_v31, 2 }
 0x266   : > { %1274 = vst.msk [vmem:[#allocation3 + $0x7] ss:$8 sm:$0x3] %vm2392_vm9, %v1271_v34  ;;  %v1302_v56 = vrot.slane %v1295_v15, %v2380_v14  ;;  %v1335_v8 = vrot.slane %v1334_v28, 2 }
 0x267   : > { %v1343_v33 = vmin.f32 %v1341_v31, %v1342_v52 }
 0x268   : > { %v1309_v4 = vrot.slane %v1302_v56, %v2380_v14  ;;  %v1336_v44 = vmin.f32 %v1334_v28, %v1335_v8  ;;  %v1419_v56 = vsub.s32 1, %v2296_v50 }
 0x269   : > { %v1344_v49 = vrot.slane %v1343_v33, 1 }
 0x26a   : > { %1312 = vst.msk [vmem:[#allocation4 + $0x7] ss:$8 sm:$0x3] %vm2392_vm9, %v1309_v4  ;;  %v1337_v48 = vrot.slane %v1336_v44, 1 }
 0x26b   : > { %v1345_v27 = vmin.f32 %v1343_v33, %v1344_v49 }
 0x26c   : > { %v1338_v22 = vmin.f32 %v1336_v44, %v1337_v48 }
 0x26d   : > { %v1346_v24 = vld [vmem:[#allocation3] sm:$0xf0]  ;;  %v1347_v25 = vld [vmem:[#allocation3 + $0x8] sm:$0xf0] }
 0x26e   : > { %v1350_v38 = vsub.f32 %v1321_v37, %v1346_v24  ;;  %v1351_v30 = vsub.f32 %v1325_v62, %v1347_v25 }
 0x270   : > { %v1401_v16 = vpop.permute.xlu0 %1400 }
 0x271   : > { %v1348_v36 = vld [vmem:[#allocation4] sm:$0xf0]  ;;  %v1349_v61 = vld [vmem:[#allocation4 + $0x8] sm:$0xf0]  ;;  %v1415_v4 = vpop.permute.xlu1 %1414 }
 0x272   : > { %v1352_v41 = vsub.f32 %v1321_v37, %v1348_v36  ;;  %v1353_v42 = vsub.f32 %v1325_v62, %v1349_v61 }
 0x274   : > { %v1354_v14 = vmul.f32 %v1352_v41, %v1350_v38  ;;  %v1355_v60 = vmul.f32 %v1353_v42, %v1351_v30 }
 0x276   : > { %v1357_v29 = vsel %vm1356_vm13, %v1354_v14, inf  ;;  %v1364_v0 = vsel %vm1356_vm13, %v1355_v60, inf  ;;  %v1431_v60 = vpop.permute.xlu1 %1430 }
 0x277   : > { %v1358_v53 = vrot.slane %v1357_v29, 4  ;;  %v1365_v11 = vrot.slane %v1364_v0, 4 }
 0x279   : > { %v1359_v26 = vmin.f32 %v1357_v29, %v1358_v53  ;;  %v1366_v39 = vmin.f32 %v1364_v0, %v1365_v11  ;;  %v1447_v29 = vpop.permute.xlu0 %1446 }
 0x27b   : > { %v1360_v45 = vrot.slane %v1359_v26, 2  ;;  %v1367_v35 = vrot.slane %v1366_v39, 2 }
 0x27d   : > { %v1361_v20 = vmin.f32 %v1359_v26, %v1360_v45  ;;  %v1368_v51 = vmin.f32 %v1366_v39, %v1367_v35  ;;  %v1465_v45 = vpop.permute.xlu1 %1464 }
 0x27f   : > { %v1362_v57 = vrot.slane %v1361_v20, 1  ;;  %v1369_v58 = vrot.slane %v1368_v51, 1 }
 0x281   : > { %v1363_v63 = vmin.f32 %v1361_v20, %v1362_v57  ;;  %v1370_v23 = vmin.f32 %v1368_v51, %v1369_v58 }
 0x283   : > { %v1373_v37 = vadd.f32 %v1363_v63, %v1338_v22  ;;  %v1374_v46 = vadd.f32 %v1370_v23, %v1345_v27  ;;  %v1371_v21 = vmax.f32 %v1338_v22, %v1363_v63  ;;  %v1372_v47 = vmax.f32 %v1345_v27, %v1370_v23 }
 0x285   : > { %v1375_v62 = vmul.f32 0.5, %v1373_v37  ;;  %v1376_v9 = vmul.f32 0.5, %v1374_v46  ;;  %v1487_v46 = vpop.permute.xlu1 %1486 }
 0x287   : > { %v1377_v5 = vadd.f32 %v1375_v62, %v1371_v21  ;;  %v1378_v12 = vadd.f32 %v1376_v9, %v1372_v47  ;;  %v1501_v47 = vpop.permute.xlu0 %1500 }
 0x289   : > { %v1379_v6 = vmul.f32 0.5, %v1377_v5  ;;  %v1380_v43 = vmul.f32 0.5, %v1378_v12 }
 0x28b   : > { %v1381_v1 = vmax.f32 %v1379_v6, 0.0  ;;  %v1382_v10 = vmax.f32 %v1380_v43, 0.0 }
 0x28d   : > { %v1643_v7 = vmul.f32 -1.442695, %v1381_v1  ;;  %v1644_v55 = vmul.f32 -1.442695, %v1382_v10 }
 0x28f   : > { %1705 = vpow2.f32 %v1643_v7 }
 0x290   : > { %1707 = vpow2.f32 %v1644_v55  ;;  %v1519_v55 = vpop.permute.xlu1 %1518 }
 0x299   : > { %v1706_v34 = vpop.eup %1705 }
 0x29a   : > { %v1708_v15 = vpop.eup %1707  ;;  %v1389_v40 = vadd.f32 1.0, %v1706_v34 }
 0x29b   : > { %v1390_v32 = vadd.f32 1.0, %v1708_v15 }
 0x29c   : > { %1709 = vrcp.f32 %v1389_v40 }
 0x29d   : > { %1711 = vrcp.f32 %v1390_v32 }
 0x2a6   : > { %v1710_v13 = vpop.eup %1709 }
 0x2a7   : > { %v1712_v17 = vpop.eup %1711  ;;  %v1395_v19 = vmul.f32 %v1710_v13, %v1852_v2 }
 0x2a8   : > { %v1396_v24 = vmul.f32 %v1712_v17, %v1860_v3 }
 0x2a9   : > { %v1420_v25 = vrot.slane %v1395_v19, %v1419_v56  ;;  %v1436_v28 = vrot.slane %v1395_v19, %v1435_v18  ;;  %v1406_v31 = vrot.slane %v1395_v19, %v2299_v54  ;;  %v1452_v42 = vrot.slane %v1395_v19, %v1451_v59 }
 0x2aa   : > { %v1424_v36 = vrot.slane %v1396_v24, %v1419_v56  ;;  %v1440_v61 = vrot.slane %v1396_v24, %v1435_v18  ;;  %v1410_v38 = vrot.slane %v1396_v24, %v2299_v54  ;;  %v1456_v52 = vrot.slane %v1396_v24, %v1451_v59 }
 0x2ab   : > { %v1425_v30 = vmul.f32 %v1420_v25, %v1415_v4  ;;  %v1411_v41 = vmul.f32 %v1406_v31, %v1401_v16  ;;  %v1441_v0 = vmul.f32 %v1436_v28, %v1431_v60  ;;  %v1457_v44 = vmul.f32 %v1452_v42, %v1447_v29 }
 0x2ac   : > { %v1426_v14 = vmul.f32 %v1424_v36, %v1415_v4  ;;  %v1412_v8 = vmul.f32 %v1410_v38, %v1401_v16  ;;  %v1442_v53 = vmul.f32 %v1440_v61, %v1431_v60  ;;  %v1458_v26 = vmul.f32 %v1456_v52, %v1447_v29 }
 0x2ad   : > { %v1427_v50 = vadd.f32 %v1425_v30, %v1411_v41 }
 0x2ae   : > { %v1428_v3 = vadd.f32 %v1426_v14, %v1412_v8 }
 0x2af   : > { %v1443_v11 = vadd.f32 %v1441_v0, %v1427_v50 }
 0x2b0   : > { %v1444_v33 = vadd.f32 %v1442_v53, %v1428_v3 }
 0x2b1   : > { %v1459_v39 = vadd.f32 %v1457_v44, %v1443_v11 }
 0x2b2   : > { %v1460_v35 = vadd.f32 %v1458_v26, %v1444_v33 }
 0x2b3   : > { %v1467_v48 = vadd.f32 %v1465_v45, %v1459_v39 }
 0x2b4   : > { %v1468_v49 = vadd.f32 %v1465_v45, %v1460_v35 }
 0x2b5   : > { %v1645_v20 = vmul.f32 -1.442695, %v1467_v48 }
 0x2b6   : > { %v1646_v51 = vmul.f32 -1.442695, %v1468_v49 }
 0x2b7   : > { %1713 = vpow2.f32 %v1645_v20 }
 0x2b8   : > { %1715 = vpow2.f32 %v1646_v51 }
 0x2c1   : > { %v1714_v57 = vpop.eup %1713 }
 0x2c2   : > { %v1716_v58 = vpop.eup %1715  ;;  %v1475_v22 = vadd.f32 1.0, %v1714_v57 }
 0x2c3   : > { %v1476_v27 = vadd.f32 1.0, %v1716_v58 }
 0x2c4   : > { %1717 = vrcp.f32 %v1475_v22 }
 0x2c5   : > { %1719 = vrcp.f32 %v1476_v27 }
 0x2ce   : > { %v1718_v63 = vpop.eup %1717 }
 0x2cf   : > { %v1720_v23 = vpop.eup %1719  ;;  %v1481_v37 = vmul.f32 %v1718_v63, %v1467_v48 }
 0x2d0   : > { %v1482_v21 = vmul.f32 %v1720_v23, %v1468_v49 }
 0x2d1   : > { %v1492_v62 = vrot.slane %v1481_v37, %v2299_v54  ;;  %v1506_v9 = vrot.slane %v1481_v37, %v1419_v56 }
 0x2d2   : > { %v1496_v5 = vrot.slane %v1482_v21, %v2299_v54  ;;  %v1510_v12 = vrot.slane %v1482_v21, %v1419_v56 }
 0x2d3   : > { %v1497_v6 = vmul.f32 %v1492_v62, %v1487_v46  ;;  %v1511_v43 = vmul.f32 %v1506_v9, %v1501_v47 }
 0x2d4   : > { %v1498_v1 = vmul.f32 %v1496_v5, %v1487_v46  ;;  %v1512_v10 = vmul.f32 %v1510_v12, %v1501_v47 }
 0x2d5   : > { %v1513_v7 = vadd.f32 %v1511_v43, %v1497_v6 }
 0x2d6   : > { %v1514_v34 = vadd.f32 %v1512_v10, %v1498_v1 }
 0x2d7   : > { %v1521_v15 = vadd.f32 %v1519_v55, %v1513_v7 }
 0x2d8   : > { %v1522_v40 = vadd.f32 %v1519_v55, %v1514_v34 }
 0x2d9   : > { %v1647_v32 = vmul.f32 -1.442695, %v1521_v15 }
 0x2da   : > { %v1648_v18 = vmul.f32 -1.442695, %v1522_v40 }
 0x2db   : > { %1721 = vpow2.f32 %v1647_v32 }
 0x2dc   : > { %1723 = vpow2.f32 %v1648_v18 }
 0x2e5   : > { %v1722_v13 = vpop.eup %1721 }
 0x2e6   : > { %v1724_v4 = vpop.eup %1723  ;;  %v1529_v16 = vadd.f32 1.0, %v1722_v13 }
 0x2e7   : > { %v1530_v17 = vadd.f32 1.0, %v1724_v4 }
 0x2e8   : > { %1725 = vrcp.f32 %v1529_v16 }
 0x2e9   : > { %1727 = vrcp.f32 %v1530_v17 }
 0x2f2   : > { %v1726_v54 = vpop.eup %1725 }
 0x2f3   : > { %v1728_v56 = vpop.eup %1727  ;;  %v1535_v19 = vadd.f32 1.0, %v1726_v54 }
 0x2f4   : > { %v1536_v59 = vadd.f32 1.0, %v1728_v56 }
 0x2f6   : > { %v1539_v24 = vcombine.low %v1535_v19, %v1536_v59 }
 0x2f8   : > { %v1541_v25 = vmul.f32 %v1539_v24, %v1852_v2 }
 0x2fa   : > { %1542 = vst [vmem:[%s334_s30] sm:$0xff] %v1541_v25 }
 0x2fb PF: > { %s21_s11 = sadd.s32 1, %s1735_s11  }
 0x2fc   : > { %p18_p4 = scmp.ge.s32.totalorder %s21_s11, 4  }
 0x2fe   :  { %20 = sbr.rel (!%p18_p4) target bundleno = 3 (0x3), region = 100 }

</bundles_post_ra>
